<compile_context>
chip_gen: v7x
topology: tpu7x:2x2x1
jax: 0.10.0
libtpu: 0.0.40
codegen_flags: <defaults>
</compile_context>

<pallas_src>
import jax
import jax.numpy as jnp
from jax.experimental import pallas as pl
from jax.experimental.pallas import tpu as pltpu

_LANE = 128
_SUBLANE = 8
_TS_MAX = 1024  # max systems per tile (feats tile stays ~1-2 MiB)


def _round_up(x, m):
    return (x + m - 1) // m * m


def mad_explorer_kernel(
    feats_ref,   # [TS, AFP]   lane-dense per-atom feats (atoms flattened into lanes)
    sum_ref,     # [AFP, FP]   block-diag (1/A): per-feature mean over atoms via MXU
    bcast_ref,   # [FP, AFP]   block-diag ones: broadcast mean back over atoms via MXU
    w1m_ref,     # [AFP, H1P]  first Linear acting on raw feats (atom-mean + mean-half
                 #             feature scaler folded in)
    w1s_ref,     # [FP, H1P]   first Linear acting on the per-feature std (scaler folded)
    b1_ref,      # [1, H1P]    effective bias (scaler offsets folded in)
    w2_ref,      # [H1P, H2P]
    b2_ref,      # [1, H2P]
    w3_ref,      # [H2P, OP]   projection-scaler std folded in
    b3_ref,      # [1, OP]     projection-scaler mean folded in
    out_ref,     # [TS, OP]
):
    x = feats_ref[...]
    if x.dtype != jnp.float32:
        x = x.astype(jnp.float32)  # accept bf16 feats; reduce/matmul in f32

    # --- mean over atoms (MXU, block-diagonal 1/A matrix)
    mean = jnp.dot(x, sum_ref[...], preferred_element_type=jnp.float32)        # [TS, FP]
    # --- two-pass centered variance: broadcast mean over atoms (MXU), square, sum (MXU)
    mean_b = jnp.dot(mean, bcast_ref[...], preferred_element_type=jnp.float32)  # [TS, AFP]
    dev = x - mean_b
    var = jnp.dot(dev * dev, sum_ref[...], preferred_element_type=jnp.float32)  # [TS, FP]
    std = jnp.sqrt(jnp.maximum(var, 0.0))                                       # ddof=0

    # --- MLPProjector with the feature scaler folded into W1 / b1:
    #     concat([(mean-fm_m)/fs_m, (std-fm_s)/fs_s]) @ W1 + b1
    #       == x @ W1m_big + std @ W1s_scaled + b1_eff
    h1 = jnp.dot(x, w1m_ref[...], preferred_element_type=jnp.float32)
    h1 = h1 + jnp.dot(std, w1s_ref[...], preferred_element_type=jnp.float32)
    h1 = jnp.maximum(h1 + b1_ref[...], 0.0)

    h2 = jnp.dot(h1, w2_ref[...], preferred_element_type=jnp.float32)
    h2 = jnp.maximum(h2 + b2_ref[...], 0.0)

    # --- last Linear with projection_scaler.inverse_transform folded in
    out_ref[...] = jnp.dot(h2, w3_ref[...], preferred_element_type=jnp.float32) + b3_ref[...]


@jax.jit
def mad_explorer_forward(feats, params):
    """feats: [S, A, F] per-atom features; params: dict of raw (unfolded) arrays."""
    S, A, F = feats.shape
    H1 = params["b1"].shape[-1]
    H2 = params["b2"].shape[-1]
    O = params["b3"].shape[-1]

    AF = A * F
    AFP = _round_up(AF, _LANE)
    FP = _round_up(F, _LANE)
    H1P = _round_up(H1, _LANE)
    H2P = _round_up(H2, _LANE)
    OP = _round_up(O, _LANE)
    f32 = jnp.float32

    # ---- fold all affine scalers into the MLP weights (one-time, wrapper-side)
    inv_fstd_m = 1.0 / params["fstd_m"]                      # [1, F]
    inv_fstd_s = 1.0 / params["fstd_s"]                      # [1, F]
    w1m_scaled = params["w1m"] * inv_fstd_m.T                # [F, H1]
    w1s_scaled = params["w1s"] * inv_fstd_s.T                # [F, H1]
    # atom-mean folded into the first matmul: stack A copies of w1m_scaled / A
    w1m_big = jnp.tile(w1m_scaled / A, (A, 1))               # [AF, H1]
    b1_eff = (params["b1"]
              - (params["fmean_m"] * inv_fstd_m) @ params["w1m"]
              - (params["fmean_s"] * inv_fstd_s) @ params["w1s"])             # [1, H1]
    # projection_scaler.inverse_transform folded into the last Linear
    w3_eff = params["w3"] * params["pstd"]                   # [H2, O]
    b3_eff = params["b3"] * params["pstd"] + params["pmean"]  # [1, O]

    # ---- zero-pad to lane-dense shapes (padded rows/cols contribute exactly zero)
    def pad2(a, rows, cols):
        return jnp.pad(a, ((0, rows - a.shape[0]), (0, cols - a.shape[1])))

    w1m_big_p = pad2(w1m_big.astype(f32), AFP, H1P)
    w1s_p = pad2(w1s_scaled.astype(f32), FP, H1P)
    b1_p = pad2(b1_eff.astype(f32), 1, H1P)
    w2_p = pad2(params["w2"].astype(f32), H1P, H2P)
    b2_p = pad2(params["b2"].astype(f32), 1, H2P)
    w3_p = pad2(w3_eff.astype(f32), H2P, OP)
    b3_p = pad2(b3_eff.astype(f32), 1, OP)

    # MXU reduction matrices: bcast[f, a*F + f] = 1 ; sum = bcast.T / A
    bcast_mat = pad2(jnp.tile(jnp.eye(F, dtype=f32), (1, A)), FP, AFP)   # [FP, AFP]
    sum_mat = bcast_mat.T / A                                            # [AFP, FP]

    # ---- lane-dense feats layout: [S, A, F] -> [S, A*F] (contiguous, free)
    feats2d = pad2(feats.reshape(S, AF), S, AFP)

    # ---- system-axis tiling: big tiles, even grid count >= 2 (v7x megacore),
    #      minimal trailing padding for awkward S
    n_tiles = max(2, pl.cdiv(S, _TS_MAX))
    if n_tiles % 2:
        n_tiles += 1
    TS = _round_up(pl.cdiv(S, n_tiles), _SUBLANE)
    grid_len = pl.cdiv(S, TS)
    S_pad = grid_len * TS
    if S_pad != S:
        feats2d = jnp.pad(feats2d, ((0, S_pad - S), (0, 0)))

    params_flat = (sum_mat, bcast_mat, w1m_big_p, w1s_p, b1_p, w2_p, b2_p, w3_p, b3_p)

    def resident(arr):
        # whole array, same block every grid step -> stays VMEM-resident
        return pl.BlockSpec(arr.shape, lambda i: (0, 0))

    in_specs = [pl.BlockSpec((TS, AFP), lambda i: (i, 0))]
    in_specs += [resident(a) for a in params_flat]
    out_spec = pl.BlockSpec((TS, OP), lambda i: (i, 0))

    # ---- VMEM budget from PADDED shapes (sublane->8, lane->128), with
    # double-buffering of the streamed tiles and (conservatively) the params.
    def padded_bytes(a):
        r = _round_up(a.shape[0], _SUBLANE)
        c = _round_up(a.shape[1], _LANE)
        return r * c * a.dtype.itemsize

    feats_tile_b = TS * AFP * feats2d.dtype.itemsize
    out_tile_b = TS * OP * 4
    param_b = sum(padded_bytes(a) for a in params_flat)
    temp_b = TS * (3 * AFP + 3 * FP + H1P + H2P) * 4      # kernel-local temporaries
    vmem_limit = 2 * (feats_tile_b + out_tile_b) + 2 * param_b + temp_b + (4 << 20)
    vmem_limit = int(min(max(vmem_limit, 16 << 20), 48 << 20))  # safe on v7x (64 MiB)

    out = pl.pallas_call(
        mad_explorer_kernel,
        out_shape=jax.ShapeDtypeStruct((S_pad, OP), jnp.float32),
        grid=(grid_len,),
        in_specs=in_specs,
        out_specs=out_spec,
        compiler_params=pltpu.CompilerParams(
            dimension_semantics=("parallel",),   # system axis is embarrassingly parallel
            vmem_limit_bytes=vmem_limit,
        ),
    )(feats2d, *params_flat)

    return out[:S, :O]


def make_params(key, input_dim, hidden1, hidden2, output_dim):
    """Deterministic synthetic parameters (stand-in for load_checkpoint)."""
    F = input_dim // 2
    ks = jax.random.split(key, 10)
    u = lambda k, shape, s: (jax.random.uniform(k, shape, jnp.float32) - 0.5) * 2 * s

    w1 = u(ks[0], (input_dim, hidden1), (1.0 / input_dim) ** 0.5)  # torch Linear-ish init
    params = {
        # feature scaler (pre-split into mean / std halves of the descriptor)
        "fmean_m": u(ks[1], (1, F), 1.0),
        "fstd_m": jnp.abs(u(ks[2], (1, F), 1.0)) + 0.5,
        "fmean_s": u(ks[3], (1, F), 1.0),
        "fstd_s": jnp.abs(u(ks[4], (1, F), 1.0)) + 0.5,
        # MLPProjector weights (x @ W + b convention, W = torch weight.T)
        "w1m": w1[:F],
        "w1s": w1[F:],
        "b1": u(ks[5], (1, hidden1), 0.1),
        "w2": u(ks[6], (hidden1, hidden2), (1.0 / hidden1) ** 0.5),
        "b2": u(ks[7], (1, hidden2), 0.1),
        "w3": u(ks[8], (hidden2, output_dim), (1.0 / hidden2) ** 0.5),
        "b3": u(ks[9], (1, output_dim), 0.1),
        # projection scaler
        "pmean": jnp.arange(output_dim, dtype=jnp.float32).reshape(1, output_dim),
        "pstd": jnp.full((1, output_dim), 2.0, jnp.float32),
    }
    return params


def reference_forward(feats, p):
    """Pure-JAX reference mirroring the PyTorch semantics."""
    feats = feats.astype(jnp.float32)
    mean = jnp.mean(feats, axis=1)
    std = jnp.sqrt(jnp.mean((feats - mean[:, None, :]) ** 2, axis=1))
    desc = jnp.concatenate([mean, std], axis=1)
    fmean = jnp.concatenate([p["fmean_m"], p["fmean_s"]], axis=1)
    fstd = jnp.concatenate([p["fstd_m"], p["fstd_s"]], axis=1)
    x = (desc - fmean) / fstd
    w1 = jnp.concatenate([p["w1m"], p["w1s"]], axis=0)
    h1 = jax.nn.relu(x @ w1 + p["b1"])
    h2 = jax.nn.relu(h1 @ p["w2"] + p["b2"])
    proj = h2 @ p["w3"] + p["b3"]
    return proj * p["pstd"] + p["pmean"]


if __name__ == "__main__":
    # 512 systems, 8 atoms each, per-atom feature dim 32
    # => projector input_dim = 64 (mean ++ std), output_dim = 3.
    # TS is derived as 256 -> a 2-step "parallel" grid (both TCs on v7x).
    S, A, F = 512, 8, 32
    INPUT_DIM, H1, H2, OUT_DIM = 2 * F, 128, 64, 3

    key = jax.random.PRNGKey(0)
    k_feat, k_par = jax.random.split(key)
    feats = jax.random.normal(k_feat, (S, A, F), dtype=jnp.float32)
    params = make_params(k_par, INPUT_DIM, H1, H2, OUT_DIM)

    out = mad_explorer_forward(feats, params)
    out = jax.block_until_ready(out)

    ref = reference_forward(feats, params)
    assert out.shape == (S, OUT_DIM), out.shape
    assert jnp.allclose(out, ref, atol=2e-4, rtol=2e-4), (
        float(jnp.max(jnp.abs(out - ref)))
    )

    print("KERNEL_OK")
</pallas_src>

<mosaic_0001>
module attributes {stable_mosaic.version = 11 : i64} {
  func.func @mad_explorer_kernel(%arg0: i32, %arg1: memref<256x256xf32, #tpu.memory_space<vmem>>, %arg2: memref<256x128xf32, #tpu.memory_space<vmem>>, %arg3: memref<128x256xf32, #tpu.memory_space<vmem>>, %arg4: memref<256x128xf32, #tpu.memory_space<vmem>>, %arg5: memref<128x128xf32, #tpu.memory_space<vmem>>, %arg6: memref<1x128xf32, #tpu.memory_space<vmem>>, %arg7: memref<128x128xf32, #tpu.memory_space<vmem>>, %arg8: memref<1x128xf32, #tpu.memory_space<vmem>>, %arg9: memref<128x128xf32, #tpu.memory_space<vmem>>, %arg10: memref<1x128xf32, #tpu.memory_space<vmem>>, %arg11: memref<256x128xf32, #tpu.memory_space<vmem>>) attributes {dimension_semantics = [#tpu.dimension_semantics<parallel>], iteration_bounds = array<i64: 2>, scalar_prefetch = 0 : i64, scratch_operands = 0 : i64, tpu.core_type = #tpu.core_type<tc>, window_params = [{transform_indices = @transform_0, window_bounds = array<i64: 256, 256>}, {pipeline_mode = #tpu.pipeline_mode<synchronous>, transform_indices = @transform_1, window_bounds = array<i64: 256, 128>}, {pipeline_mode = #tpu.pipeline_mode<synchronous>, transform_indices = @transform_2, window_bounds = array<i64: 128, 256>}, {pipeline_mode = #tpu.pipeline_mode<synchronous>, transform_indices = @transform_3, window_bounds = array<i64: 256, 128>}, {pipeline_mode = #tpu.pipeline_mode<synchronous>, transform_indices = @transform_4, window_bounds = array<i64: 128, 128>}, {pipeline_mode = #tpu.pipeline_mode<synchronous>, transform_indices = @transform_5, window_bounds = array<i64: 1, 128>}, {pipeline_mode = #tpu.pipeline_mode<synchronous>, transform_indices = @transform_6, window_bounds = array<i64: 128, 128>}, {pipeline_mode = #tpu.pipeline_mode<synchronous>, transform_indices = @transform_7, window_bounds = array<i64: 1, 128>}, {pipeline_mode = #tpu.pipeline_mode<synchronous>, transform_indices = @transform_8, window_bounds = array<i64: 128, 128>}, {pipeline_mode = #tpu.pipeline_mode<synchronous>, transform_indices = @transform_9, window_bounds = array<i64: 1, 128>}, {transform_indices = @transform_10, window_bounds = array<i64: 256, 128>}]} {
    %c0 = arith.constant 0 : index
    %c0_0 = arith.constant 0 : index
    %0 = vector.load %arg1[%c0, %c0_0] : memref<256x256xf32, #tpu.memory_space<vmem>>, vector<256x256xf32>
    %c0_1 = arith.constant 0 : index
    %c0_2 = arith.constant 0 : index
    %1 = vector.load %arg2[%c0_1, %c0_2] : memref<256x128xf32, #tpu.memory_space<vmem>>, vector<256x128xf32>
    %cst = arith.constant dense<0.000000e+00> : vector<256x128xf32>
    %2 = tpu.matmul %0, %1, %cst {dimension_numbers = #tpu.dot_dimension_numbers<[1], [0], [0], [1], [0, 0, 1, 1], [], []>} : vector<256x256xf32>, vector<256x128xf32>, vector<256x128xf32> -> vector<256x128xf32>
    %c0_3 = arith.constant 0 : index
    %c0_4 = arith.constant 0 : index
    %3 = vector.load %arg3[%c0_3, %c0_4] : memref<128x256xf32, #tpu.memory_space<vmem>>, vector<128x256xf32>
    %cst_5 = arith.constant dense<0.000000e+00> : vector<256x256xf32>
    %4 = tpu.matmul %2, %3, %cst_5 {dimension_numbers = #tpu.dot_dimension_numbers<[1], [0], [0], [1], [0, 0, 1, 1], [], []>} : vector<256x128xf32>, vector<128x256xf32>, vector<256x256xf32> -> vector<256x256xf32>
    %5 = arith.subf %0, %4 : vector<256x256xf32>
    %6 = arith.mulf %5, %5 : vector<256x256xf32>
    %c0_6 = arith.constant 0 : index
    %c0_7 = arith.constant 0 : index
    %7 = vector.load %arg2[%c0_6, %c0_7] : memref<256x128xf32, #tpu.memory_space<vmem>>, vector<256x128xf32>
    %cst_8 = arith.constant dense<0.000000e+00> : vector<256x128xf32>
    %8 = tpu.matmul %6, %7, %cst_8 {dimension_numbers = #tpu.dot_dimension_numbers<[1], [0], [0], [1], [0, 0, 1, 1], [], []>} : vector<256x256xf32>, vector<256x128xf32>, vector<256x128xf32> -> vector<256x128xf32>
    %cst_9 = arith.constant 0.000000e+00 : f32
    %9 = vector.broadcast %cst_9 : f32 to vector<256x128xf32>
    %10 = arith.maximumf %8, %9 : vector<256x128xf32>
    %11 = math.sqrt %10 : vector<256x128xf32>
    %c0_10 = arith.constant 0 : index
    %c0_11 = arith.constant 0 : index
    %12 = vector.load %arg4[%c0_10, %c0_11] : memref<256x128xf32, #tpu.memory_space<vmem>>, vector<256x128xf32>
    %cst_12 = arith.constant dense<0.000000e+00> : vector<256x128xf32>
    %13 = tpu.matmul %0, %12, %cst_12 {dimension_numbers = #tpu.dot_dimension_numbers<[1], [0], [0], [1], [0, 0, 1, 1], [], []>} : vector<256x256xf32>, vector<256x128xf32>, vector<256x128xf32> -> vector<256x128xf32>
    %c0_13 = arith.constant 0 : index
    %c0_14 = arith.constant 0 : index
    %14 = vector.load %arg5[%c0_13, %c0_14] : memref<128x128xf32, #tpu.memory_space<vmem>>, vector<128x128xf32>
    %cst_15 = arith.constant dense<0.000000e+00> : vector<256x128xf32>
    %15 = tpu.matmul %11, %14, %cst_15 {dimension_numbers = #tpu.dot_dimension_numbers<[1], [0], [0], [1], [0, 0, 1, 1], [], []>} : vector<256x128xf32>, vector<128x128xf32>, vector<256x128xf32> -> vector<256x128xf32>
    %16 = arith.addf %13, %15 : vector<256x128xf32>
    %c0_16 = arith.constant 0 : index
    %c0_17 = arith.constant 0 : index
    %17 = vector.load %arg6[%c0_16, %c0_17] : memref<1x128xf32, #tpu.memory_space<vmem>>, vector<1x128xf32>
    %18 = vector.broadcast %17 : vector<1x128xf32> to vector<256x128xf32>
    %19 = arith.addf %16, %18 : vector<256x128xf32>
    %cst_18 = arith.constant 0.000000e+00 : f32
    %20 = vector.broadcast %cst_18 : f32 to vector<256x128xf32>
    %21 = arith.maximumf %19, %20 : vector<256x128xf32>
    %c0_19 = arith.constant 0 : index
    %c0_20 = arith.constant 0 : index
    %22 = vector.load %arg7[%c0_19, %c0_20] : memref<128x128xf32, #tpu.memory_space<vmem>>, vector<128x128xf32>
    %cst_21 = arith.constant dense<0.000000e+00> : vector<256x128xf32>
    %23 = tpu.matmul %21, %22, %cst_21 {dimension_numbers = #tpu.dot_dimension_numbers<[1], [0], [0], [1], [0, 0, 1, 1], [], []>} : vector<256x128xf32>, vector<128x128xf32>, vector<256x128xf32> -> vector<256x128xf32>
    %c0_22 = arith.constant 0 : index
    %c0_23 = arith.constant 0 : index
    %24 = vector.load %arg8[%c0_22, %c0_23] : memref<1x128xf32, #tpu.memory_space<vmem>>, vector<1x128xf32>
    %25 = vector.broadcast %24 : vector<1x128xf32> to vector<256x128xf32>
    %26 = arith.addf %23, %25 : vector<256x128xf32>
    %cst_24 = arith.constant 0.000000e+00 : f32
    %27 = vector.broadcast %cst_24 : f32 to vector<256x128xf32>
    %28 = arith.maximumf %26, %27 : vector<256x128xf32>
    %c0_25 = arith.constant 0 : index
    %c0_26 = arith.constant 0 : index
    %29 = vector.load %arg9[%c0_25, %c0_26] : memref<128x128xf32, #tpu.memory_space<vmem>>, vector<128x128xf32>
    %cst_27 = arith.constant dense<0.000000e+00> : vector<256x128xf32>
    %30 = tpu.matmul %28, %29, %cst_27 {dimension_numbers = #tpu.dot_dimension_numbers<[1], [0], [0], [1], [0, 0, 1, 1], [], []>} : vector<256x128xf32>, vector<128x128xf32>, vector<256x128xf32> -> vector<256x128xf32>
    %c0_28 = arith.constant 0 : index
    %c0_29 = arith.constant 0 : index
    %31 = vector.load %arg10[%c0_28, %c0_29] : memref<1x128xf32, #tpu.memory_space<vmem>>, vector<1x128xf32>
    %32 = vector.broadcast %31 : vector<1x128xf32> to vector<256x128xf32>
    %33 = arith.addf %30, %32 : vector<256x128xf32>
    %c0_30 = arith.constant 0 : index
    %c0_31 = arith.constant 0 : index
    %34 = vector.load %arg11[%c0_30, %c0_31] : memref<256x128xf32, #tpu.memory_space<vmem>>, vector<256x128xf32>
    tpu.vector_store %arg11[%c0_30, %c0_31], %33 {strides = array<i32>} : memref<256x128xf32, #tpu.memory_space<vmem>>, vector<256x128xf32>,
    return
  }
  func.func @transform_0(%arg0: i32) -> (i32, i32) {
    %c0_i32 = arith.constant 0 : i32
    %c0_i32_0 = arith.constant 0 : i32
    return %arg0, %c0_i32 : i32, i32
  }
  func.func @transform_1(%arg0: i32) -> (i32, i32) {
    %c0_i32 = arith.constant 0 : i32
    %c0_i32_0 = arith.constant 0 : i32
    %c0_i32_1 = arith.constant 0 : i32
    return %c0_i32, %c0_i32_0 : i32, i32
  }
  func.func @transform_2(%arg0: i32) -> (i32, i32) {
    %c0_i32 = arith.constant 0 : i32
    %c0_i32_0 = arith.constant 0 : i32
    %c0_i32_1 = arith.constant 0 : i32
    return %c0_i32, %c0_i32_0 : i32, i32
  }
  func.func @transform_3(%arg0: i32) -> (i32, i32) {
    %c0_i32 = arith.constant 0 : i32
    %c0_i32_0 = arith.constant 0 : i32
    %c0_i32_1 = arith.constant 0 : i32
    return %c0_i32, %c0_i32_0 : i32, i32
  }
  func.func @transform_4(%arg0: i32) -> (i32, i32) {
    %c0_i32 = arith.constant 0 : i32
    %c0_i32_0 = arith.constant 0 : i32
    %c0_i32_1 = arith.constant 0 : i32
    return %c0_i32, %c0_i32_0 : i32, i32
  }
  func.func @transform_5(%arg0: i32) -> (i32, i32) {
    %c0_i32 = arith.constant 0 : i32
    %c0_i32_0 = arith.constant 0 : i32
    %c0_i32_1 = arith.constant 0 : i32
    return %c0_i32, %c0_i32_0 : i32, i32
  }
  func.func @transform_6(%arg0: i32) -> (i32, i32) {
    %c0_i32 = arith.constant 0 : i32
    %c0_i32_0 = arith.constant 0 : i32
    %c0_i32_1 = arith.constant 0 : i32
    return %c0_i32, %c0_i32_0 : i32, i32
  }
  func.func @transform_7(%arg0: i32) -> (i32, i32) {
    %c0_i32 = arith.constant 0 : i32
    %c0_i32_0 = arith.constant 0 : i32
    %c0_i32_1 = arith.constant 0 : i32
    return %c0_i32, %c0_i32_0 : i32, i32
  }
  func.func @transform_8(%arg0: i32) -> (i32, i32) {
    %c0_i32 = arith.constant 0 : i32
    %c0_i32_0 = arith.constant 0 : i32
    %c0_i32_1 = arith.constant 0 : i32
    return %c0_i32, %c0_i32_0 : i32, i32
  }
  func.func @transform_9(%arg0: i32) -> (i32, i32) {
    %c0_i32 = arith.constant 0 : i32
    %c0_i32_0 = arith.constant 0 : i32
    %c0_i32_1 = arith.constant 0 : i32
    return %c0_i32, %c0_i32_0 : i32, i32
  }
  func.func @transform_10(%arg0: i32) -> (i32, i32) {
    %c0_i32 = arith.constant 0 : i32
    %c0_i32_0 = arith.constant 0 : i32
    return %arg0, %c0_i32 : i32, i32
  }
}

</mosaic_0001>

<bundles_post_ra>
// kernel: tile.19
= control target key start
LH: loop header
LB: loop body
LE: loop exit
PB: predicated region body
PF: predicated region fallthrough
CT: control target
= control target key end

     0   :  { %vm92_vm0 = vcmask 1047556   ;;  %s459_s14 = smov 96   ;;  %s460_s26 = smov 64   ;;  %vm3_vm1 = vcmask 261120   ;;  %vm96_vm2 = vcmask 1048320   ;;  %vm183_vm3 = vcmask 785920   ;;  %s904_s0 = inlined_call_operand.vmem [shape: f32[32,8,32], index: 0, kind: input, shape index: {}]   ;;  %s905_s1 = inlined_call_operand.vmem [shape: f32[32,256], index: 1, kind: output, shape index: {}]  }
   0x1   :  { %v392_v0 = vld [vmem:[%s904_s0 + $0x7] ss:$8 sm:$0xf]   ;;  %v387_v3 = vld [vmem:[%s904_s0 + $0x3] ss:$8 sm:$0xf]  }
   0x2   :  { %v393_v1 = vld [vmem:[%s904_s0 + $0x7] ss:$8 sm:$0xf0]   ;;  %v388_v4 = vld [vmem:[%s904_s0 + $0x3] ss:$8 sm:$0xf0]  }
   0x3   :  { %v114_v2 = vsel %vm92_vm0, %v393_v1, %v392_v0  ;;  %v93_v5 = vsel %vm92_vm0, %v388_v4, %v387_v3  ;;  %v395_v6 = vld [vmem:[%s904_s0 + $0x87] ss:$8 sm:$0xf]   ;;  %v389_v9 = vld [vmem:[%s904_s0 + $0x83] ss:$8 sm:$0xf]  }
   0x4   :  { %115 = vrot.lane.b32.xlu1 %v114_v2, %s459_s14  ;;  %v396_v7 = vld [vmem:[%s904_s0 + $0x87] ss:$8 sm:$0xf0]   ;;  %94 = vrot.lane.b32.xlu0 %v93_v5, %s459_s14  ;;  %v390_v10 = vld [vmem:[%s904_s0 + $0x83] ss:$8 sm:$0xf0]  }
   0x5   :  { %v125_v8 = vsel %vm92_vm0, %v396_v7, %v395_v6  ;;  %v103_v11 = vsel %vm92_vm0, %v390_v10, %v389_v9  ;;  %v401_v12 = vld [vmem:[%s904_s0 + $0xc3] ss:$8 sm:$0xf]   ;;  %v407_v18 = vld [vmem:[%s904_s0 + $0xc7] ss:$8 sm:$0xf]  }
   0x6   :  { %v402_v13 = vld [vmem:[%s904_s0 + $0xc3] ss:$8 sm:$0xf0]   ;;  %v408_v19 = vld [vmem:[%s904_s0 + $0xc7] ss:$8 sm:$0xf0]  }
   0x7   :  { %v398_v14 = vld [vmem:[%s904_s0 + $0x43] ss:$8 sm:$0xf]   ;;  %v147_v16 = vsel %vm92_vm0, %v402_v13, %v401_v12  ;;  %v404_v20 = vld [vmem:[%s904_s0 + $0x47] ss:$8 sm:$0xf]   ;;  %v169_v22 = vsel %vm92_vm0, %v408_v19, %v407_v18 }
   0x8   :  { %v399_v15 = vld [vmem:[%s904_s0 + $0x43] ss:$8 sm:$0xf0]   ;;  %126 = vrot.lane.b32.xlu1 %v125_v8, %s459_s14  ;;  %104 = vrot.lane.b32.xlu0 %v103_v11, %s459_s14  ;;  %v405_v21 = vld [vmem:[%s904_s0 + $0x47] ss:$8 sm:$0xf0]  }
   0x9   :  { %v136_v17 = vsel %vm92_vm0, %v399_v15, %v398_v14  ;;  %v158_v23 = vsel %vm92_vm0, %v405_v21, %v404_v20  ;;  %v412_v24 = vld [vmem:[%s904_s0 + $0x82] ss:$8 sm:$0xf]   ;;  %v418_v30 = vld [vmem:[%s904_s0 + $0x86] ss:$8 sm:$0xf]  }
   0xa   :  { %v413_v25 = vld [vmem:[%s904_s0 + $0x82] ss:$8 sm:$0xf0]   ;;  %v419_v31 = vld [vmem:[%s904_s0 + $0x86] ss:$8 sm:$0xf0]  }
   0xb   :  { %v410_v26 = vld [vmem:[%s904_s0 + $0x2] ss:$8 sm:$0xf]   ;;  %v190_v28 = vsel %vm92_vm0, %v413_v25, %v412_v24  ;;  %v415_v32 = vld [vmem:[%s904_s0 + $0x6] ss:$8 sm:$0xf]   ;;  %v212_v34 = vsel %vm92_vm0, %v419_v31, %v418_v30 }
   0xc   :  { %148 = vrot.lane.b32.xlu1 %v147_v16, %s459_s14  ;;  %137 = vrot.lane.b32.xlu0 %v136_v17, %s459_s14  ;;  %v411_v27 = vld [vmem:[%s904_s0 + $0x2] ss:$8 sm:$0xf0]   ;;  %v416_v33 = vld [vmem:[%s904_s0 + $0x6] ss:$8 sm:$0xf0]  }
   0xd   :  { %v180_v29 = vsel %vm92_vm0, %v411_v27, %v410_v26  ;;  %v201_v35 = vsel %vm92_vm0, %v416_v33, %v415_v32  ;;  %v424_v36 = vld [vmem:[%s904_s0 + $0xc2] ss:$8 sm:$0xf]   ;;  %v430_v40 = vld [vmem:[%s904_s0 + $0xc6] ss:$8 sm:$0xf]  }
   0xe   :  { %v425_v37 = vld [vmem:[%s904_s0 + $0xc2] ss:$8 sm:$0xf0]   ;;  %v431_v42 = vld [vmem:[%s904_s0 + $0xc6] ss:$8 sm:$0xf0]  }
   0xf   :  { %v421_v38 = vld [vmem:[%s904_s0 + $0x42] ss:$8 sm:$0xf]   ;;  %v234_v41 = vsel %vm92_vm0, %v425_v37, %v424_v36  ;;  %v427_v43 = vld [vmem:[%s904_s0 + $0x46] ss:$8 sm:$0xf]   ;;  %v256_v53 = vsel %vm92_vm0, %v431_v42, %v430_v40 }
  0x10   :  { %170 = vrot.lane.b32.xlu1 %v169_v22, %s459_s14  ;;  %159 = vrot.lane.b32.xlu0 %v158_v23, %s459_s14  ;;  %v422_v39 = vld [vmem:[%s904_s0 + $0x42] ss:$8 sm:$0xf0]   ;;  %v428_v45 = vld [vmem:[%s904_s0 + $0x46] ss:$8 sm:$0xf0]  }
  0x11   :  { %v223_v44 = vsel %vm92_vm0, %v422_v39, %v421_v38  ;;  %v367_v46 = vld [vmem:[%s904_s0 + $0x80] ss:$4 sm:$0xff]   ;;  %v245_v55 = vsel %vm92_vm0, %v428_v45, %v427_v43  ;;  %v435_v56 = vld [vmem:[%s904_s0 + $0x81] ss:$8 sm:$0xf]   ;;  %s461_s25 = smov 32  }
  0x12   :  { %368 = vst.msk [vmem:[%s905_s1 + $0x20] ss:$8 sm:$0x3] %vm3_vm1, %v367_v46   ;;  %369 = vst.msk [vmem:[%s905_s1 + $0x11] ss:$8 sm:$0xc] %vm3_vm1, %v367_v46  }
  0x13   :  { %370 = vst.msk [vmem:[%s905_s1 + $0x2] ss:$8 sm:$0x30] %vm3_vm1, %v367_v46   ;;  %371 = vst.msk [vmem:[%s905_s1 - $0xd] ss:$8 sm:$0xc0] %vm3_vm1, %v367_v46  }
  0x14   :  { %191 = vrot.lane.b32.xlu1 %v190_v28, %s460_s26  ;;  %181 = vrot.lane.b32.xlu0 %v180_v29, %s460_s26  ;;  %v372_v47 = vld [vmem:[%s904_s0 + $0xa0] ss:$4 sm:$0xff]   ;;  %v436_v57 = vld [vmem:[%s904_s0 + $0x81] ss:$8 sm:$0xf0]   ;;  %vm270_vm4 = vcmask 523520  }
  0x15   :  { %v2_v48 = vld [vmem:[%s904_s0] ss:$4 sm:$0xff]   ;;  %373 = vst.msk [vmem:[%s905_s1 + $0x24] ss:$8 sm:$0x3] %vm3_vm1, %v372_v47   ;;  %v277_v60 = vsel %vm92_vm0, %v436_v57, %v435_v56 }
  0x16   :  { %v352_v49 = vld [vmem:[%s904_s0 + $0x20] ss:$4 sm:$0xff]   ;;  %374 = vst.msk [vmem:[%s905_s1 + $0x15] ss:$8 sm:$0xc] %vm3_vm1, %v372_v47  }
  0x17   :  { %375 = vst.msk [vmem:[%s905_s1 + $0x6] ss:$8 sm:$0x30] %vm3_vm1, %v372_v47   ;;  %376 = vst.msk [vmem:[%s905_s1 - $0x9] ss:$8 sm:$0xc0] %vm3_vm1, %v372_v47  }
  0x18   :  { %213 = vrot.lane.b32.xlu1 %v212_v34, %s460_s26  ;;  %202 = vrot.lane.b32.xlu0 %v201_v35, %s460_s26  ;;  %4 = vst.msk [vmem:[%s905_s1] ss:$8 sm:$0x3] %vm3_vm1, %v2_v48   ;;  %349 = vst.msk [vmem:[%s905_s1 - $0xf] ss:$8 sm:$0xc] %vm3_vm1, %v2_v48  }
  0x19   :  { %350 = vst.msk [vmem:[%s905_s1 - $0x1e] ss:$8 sm:$0x30] %vm3_vm1, %v2_v48   ;;  %351 = vst.msk [vmem:[%s905_s1 - $0x2d] ss:$8 sm:$0xc0] %vm3_vm1, %v2_v48  }
  0x1a   :  { %353 = vst.msk [vmem:[%s905_s1 + $0x4] ss:$8 sm:$0x3] %vm3_vm1, %v352_v49   ;;  %354 = vst.msk [vmem:[%s905_s1 - $0xb] ss:$8 sm:$0xc] %vm3_vm1, %v352_v49  }
  0x1b   :  { %355 = vst.msk [vmem:[%s905_s1 - $0x1a] ss:$8 sm:$0x30] %vm3_vm1, %v352_v49   ;;  %356 = vst.msk [vmem:[%s905_s1 - $0x29] ss:$8 sm:$0xc0] %vm3_vm1, %v352_v49  }
  0x1c   :  { %235 = vrot.lane.b32.xlu1 %v234_v41, %s460_s26  ;;  %v377_v50 = vld [vmem:[%s904_s0 + $0xc0] ss:$4 sm:$0xff]   ;;  %224 = vrot.lane.b32.xlu0 %v223_v44, %s460_s26  ;;  %v433_v58 = vld [vmem:[%s904_s0 + $0x1] ss:$8 sm:$0xf]  }
  0x1d   :  { %v382_v51 = vld [vmem:[%s904_s0 + $0xe0] ss:$4 sm:$0xff]   ;;  %378 = vst.msk [vmem:[%s905_s1 + $0x30] ss:$8 sm:$0x3] %vm3_vm1, %v377_v50  }
  0x1e   :  { %v357_v52 = vld [vmem:[%s904_s0 + $0x40] ss:$4 sm:$0xff]   ;;  %379 = vst.msk [vmem:[%s905_s1 + $0x21] ss:$8 sm:$0xc] %vm3_vm1, %v377_v50  }
  0x1f   :  { %380 = vst.msk [vmem:[%s905_s1 + $0x12] ss:$8 sm:$0x30] %vm3_vm1, %v377_v50   ;;  %381 = vst.msk [vmem:[%s905_s1 + $0x3] ss:$8 sm:$0xc0] %vm3_vm1, %v377_v50  }
  0x20   :  { %383 = vst.msk [vmem:[%s905_s1 + $0x34] ss:$8 sm:$0x3] %vm3_vm1, %v382_v51   ;;  %384 = vst.msk [vmem:[%s905_s1 + $0x25] ss:$8 sm:$0xc] %vm3_vm1, %v382_v51   ;;  %257 = vrot.lane.b32.xlu1 %v256_v53, %s460_s26  ;;  %246 = vrot.lane.b32.xlu0 %v245_v55, %s460_s26 }
  0x21   :  { %385 = vst.msk [vmem:[%s905_s1 + $0x16] ss:$8 sm:$0x30] %vm3_vm1, %v382_v51   ;;  %386 = vst.msk [vmem:[%s905_s1 + $0x7] ss:$8 sm:$0xc0] %vm3_vm1, %v382_v51  }
  0x22   :  { %358 = vst.msk [vmem:[%s905_s1 + $0x10] ss:$8 sm:$0x3] %vm3_vm1, %v357_v52   ;;  %359 = vst.msk [vmem:[%s905_s1 + $0x1] ss:$8 sm:$0xc] %vm3_vm1, %v357_v52  }
  0x23   :  { %360 = vst.msk [vmem:[%s905_s1 - $0xe] ss:$8 sm:$0x30] %vm3_vm1, %v357_v52   ;;  %361 = vst.msk [vmem:[%s905_s1 - $0x1d] ss:$8 sm:$0xc0] %vm3_vm1, %v357_v52  }
  0x24   :  { %v362_v54 = vld [vmem:[%s904_s0 + $0x60] ss:$4 sm:$0xff]   ;;  %v434_v59 = vld [vmem:[%s904_s0 + $0x1] ss:$8 sm:$0xf0]   ;;  %278 = vrot.lane.b32.xlu1 %v277_v60, %s461_s25 }
  0x25   :  { %363 = vst.msk [vmem:[%s905_s1 + $0x14] ss:$8 sm:$0x3] %vm3_vm1, %v362_v54   ;;  %364 = vst.msk [vmem:[%s905_s1 + $0x5] ss:$8 sm:$0xc] %vm3_vm1, %v362_v54   ;;  %v267_v61 = vsel %vm92_vm0, %v434_v59, %v433_v58 }
  0x26   :  { %365 = vst.msk [vmem:[%s905_s1 - $0xa] ss:$8 sm:$0x30] %vm3_vm1, %v362_v54   ;;  %366 = vst.msk [vmem:[%s905_s1 - $0x19] ss:$8 sm:$0xc0] %vm3_vm1, %v362_v54   ;;  %268 = vrot.lane.b32.xlu0 %v267_v61, %s461_s25 }
  0x27   :  { %v441_v62 = vld [vmem:[%s904_s0 + $0x85] ss:$8 sm:$0xf]   ;;  %v447_v4 = vld [vmem:[%s904_s0 + $0xc1] ss:$8 sm:$0xf]  }
  0x28   :  { %v442_v63 = vld [vmem:[%s904_s0 + $0x85] ss:$8 sm:$0xf0]   ;;  %v448_v5 = vld [vmem:[%s904_s0 + $0xc1] ss:$8 sm:$0xf0]  }
  0x29   :  { %v438_v0 = vld [vmem:[%s904_s0 + $0x5] ss:$8 sm:$0xf]   ;;  %v299_v2 = vsel %vm92_vm0, %v442_v63, %v441_v62  ;;  %v444_v6 = vld [vmem:[%s904_s0 + $0x41] ss:$8 sm:$0xf]   ;;  %v321_v8 = vsel %vm92_vm0, %v448_v5, %v447_v4 }
  0x2a   :  { %v439_v1 = vld [vmem:[%s904_s0 + $0x5] ss:$8 sm:$0xf0]   ;;  %v445_v7 = vld [vmem:[%s904_s0 + $0x41] ss:$8 sm:$0xf0]   ;;  %300 = vrot.lane.b32.xlu1 %v299_v2, %s461_s25 }
  0x2b   :  { %v288_v3 = vsel %vm92_vm0, %v439_v1, %v438_v0  ;;  %v310_v9 = vsel %vm92_vm0, %v445_v7, %v444_v6  ;;  %v453_v10 = vld [vmem:[%s904_s0 + $0xc5] ss:$8 sm:$0xf]  }
  0x2c   :  { %289 = vrot.lane.b32.xlu0 %v288_v3, %s461_s25  ;;  %v454_v11 = vld [vmem:[%s904_s0 + $0xc5] ss:$8 sm:$0xf0]  }
  0x2d   :  { %v450_v12 = vld [vmem:[%s904_s0 + $0x45] ss:$8 sm:$0xf]   ;;  %v343_v14 = vsel %vm92_vm0, %v454_v11, %v453_v10 }
  0x2e   :  { %v451_v13 = vld [vmem:[%s904_s0 + $0x45] ss:$8 sm:$0xf0]   ;;  %322 = vrot.lane.b32.xlu1 %v321_v8, %s461_s25 }
  0x2f   :  { %v332_v15 = vsel %vm92_vm0, %v451_v13, %v450_v12 }
  0x30   :  { %311 = vrot.lane.b32.xlu0 %v310_v9, %s461_s25 }
  0x32   :  { %344 = vrot.lane.b32.xlu1 %v343_v14, %s461_s25 }
  0x34   :  { %333 = vrot.lane.b32.xlu0 %v332_v15, %s461_s25 }
  0x76   :  { %v116_v16 = vpop.permute.xlu1 %115   ;;  %v95_v17 = vpop.permute.xlu0 %94  }
  0x77   :  { %394 = vst.msk [vmem:[%s905_s1 + $0x8] sm:$0xff] %vm96_vm2, %v116_v16   ;;  %97 = vst.msk [vmem:[%s905_s1] sm:$0xff] %vm96_vm2, %v95_v17  }
  0x7a   :  { %v127_v18 = vpop.permute.xlu1 %126   ;;  %v105_v19 = vpop.permute.xlu0 %104  }
  0x7b   :  { %397 = vst.msk [vmem:[%s905_s1 + $0x28] sm:$0xff] %vm96_vm2, %v127_v18   ;;  %391 = vst.msk [vmem:[%s905_s1 + $0x20] sm:$0xff] %vm96_vm2, %v105_v19  }
  0x7e   :  { %v149_v20 = vpop.permute.xlu1 %148   ;;  %v138_v21 = vpop.permute.xlu0 %137  }
  0x7f   :  { %403 = vst.msk [vmem:[%s905_s1 + $0x30] sm:$0xff] %vm96_vm2, %v149_v20   ;;  %400 = vst.msk [vmem:[%s905_s1 + $0x10] sm:$0xff] %vm96_vm2, %v138_v21  }
  0x82   :  { %v171_v22 = vpop.permute.xlu1 %170   ;;  %v160_v23 = vpop.permute.xlu0 %159  }
  0x83   :  { %409 = vst.msk [vmem:[%s905_s1 + $0x38] sm:$0xff] %vm96_vm2, %v171_v22   ;;  %406 = vst.msk [vmem:[%s905_s1 + $0x18] sm:$0xff] %vm96_vm2, %v160_v23  }
  0x86   :  { %v192_v24 = vpop.permute.xlu1 %191   ;;  %v182_v25 = vpop.permute.xlu0 %181  }
  0x87   :  { %414 = vst.msk [vmem:[%s905_s1 + $0x20] sm:$0xff] %vm183_vm3, %v192_v24   ;;  %184 = vst.msk [vmem:[%s905_s1] sm:$0xff] %vm183_vm3, %v182_v25  }
  0x8a   :  { %v214_v26 = vpop.permute.xlu1 %213   ;;  %v203_v27 = vpop.permute.xlu0 %202  }
  0x8b   :  { %420 = vst.msk [vmem:[%s905_s1 + $0x28] sm:$0xff] %vm183_vm3, %v214_v26   ;;  %417 = vst.msk [vmem:[%s905_s1 + $0x8] sm:$0xff] %vm183_vm3, %v203_v27  }
  0x8e   :  { %v236_v28 = vpop.permute.xlu1 %235   ;;  %v225_v29 = vpop.permute.xlu0 %224  }
  0x8f   :  { %426 = vst.msk [vmem:[%s905_s1 + $0x30] sm:$0xff] %vm183_vm3, %v236_v28   ;;  %423 = vst.msk [vmem:[%s905_s1 + $0x10] sm:$0xff] %vm183_vm3, %v225_v29  }
  0x92   :  { %v258_v30 = vpop.permute.xlu1 %257   ;;  %v247_v31 = vpop.permute.xlu0 %246  }
  0x93   :  { %432 = vst.msk [vmem:[%s905_s1 + $0x38] sm:$0xff] %vm183_vm3, %v258_v30   ;;  %429 = vst.msk [vmem:[%s905_s1 + $0x18] sm:$0xff] %vm183_vm3, %v247_v31  }
  0x96   :  { %v279_v32 = vpop.permute.xlu1 %278  }
  0x97   :  { %437 = vst.msk [vmem:[%s905_s1 + $0x20] sm:$0xff] %vm270_vm4, %v279_v32  }
  0x98   :  { %v269_v33 = vpop.permute.xlu0 %268  }
  0x99   :  { %271 = vst.msk [vmem:[%s905_s1] sm:$0xff] %vm270_vm4, %v269_v33  }
  0x9c   :  { %v301_v34 = vpop.permute.xlu1 %300  }
  0x9d   :  { %443 = vst.msk [vmem:[%s905_s1 + $0x28] sm:$0xff] %vm270_vm4, %v301_v34  }
  0x9e   :  { %v290_v35 = vpop.permute.xlu0 %289  }
  0x9f   :  { %440 = vst.msk [vmem:[%s905_s1 + $0x8] sm:$0xff] %vm270_vm4, %v290_v35  }
  0xa0   :  { %v323_v36 = vpop.permute.xlu1 %322  }
  0xa1   :  { %449 = vst.msk [vmem:[%s905_s1 + $0x30] sm:$0xff] %vm270_vm4, %v323_v36  }
  0xa2   :  { %v312_v37 = vpop.permute.xlu0 %311  }
  0xa3   :  { %446 = vst.msk [vmem:[%s905_s1 + $0x10] sm:$0xff] %vm270_vm4, %v312_v37  }
  0xa4   :  { %v345_v38 = vpop.permute.xlu1 %344  }
  0xa5   :  { %455 = vst.msk [vmem:[%s905_s1 + $0x38] sm:$0xff] %vm270_vm4, %v345_v38  }
  0xa6   :  { %v334_v39 = vpop.permute.xlu0 %333  }
  0xa7   :  { %452 = vst.msk [vmem:[%s905_s1 + $0x18] sm:$0xff] %vm270_vm4, %v334_v39  }

// kernel: mad_explorer_forward.1
= control target key start
LH: loop header
LB: loop body
LE: loop exit
PB: predicated region body
PF: predicated region fallthrough
CT: control target
= control target key end

     0   :  { %s3661_s13 = smov 0   ;;  %s5009_s0 = inlined_call_operand.vmem [shape: f32[512,256], index: 0, kind: input, shape index: {}]   ;;  %s5010_s1 = inlined_call_operand.vmem [shape: f32[256,128], index: 1, kind: input, shape index: {}]   ;;  %s5011_s2 = inlined_call_operand.vmem [shape: f32[128,256], index: 2, kind: input, shape index: {}]   ;;  %s5012_s3 = inlined_call_operand.vmem [shape: f32[256,128], index: 3, kind: input, shape index: {}]   ;;  %s5013_s4 = inlined_call_operand.vmem [shape: f32[128,128], index: 4, kind: input, shape index: {}]   ;;  %s5014_s5 = inlined_call_operand.vmem [shape: f32[1,128], index: 5, kind: input, shape index: {}]   ;;  %s5015_s6 = inlined_call_operand.vmem [shape: f32[128,128], index: 6, kind: input, shape index: {}]   ;;  %s5016_s7 = inlined_call_operand.vmem [shape: f32[1,128], index: 7, kind: input, shape index: {}]   ;;  %s5017_s8 = inlined_call_operand.vmem [shape: f32[128,128], index: 8, kind: input, shape index: {}]   ;;  %s5018_s9 = inlined_call_operand.vmem [shape: f32[1,128], index: 9, kind: input, shape index: {}]   ;;  %s5019_s10 = inlined_call_operand.vmem [shape: f32[512,128], index: 10, kind: output, shape index: {}]  }
   0x1 LB: > { %s2770_s14 = sadd.s32 4294967295, %s3602_s13   ;;  %p2774_p0 = scmp.ge.s32.totalorder %s3602_s13, 1  ;;  %s3602_s13 = sphi %s3661_s13, %s20_s13  }
   0x2   : > { %p314_p1 = scmp.lt.s32.totalorder %s3602_s13, 3 }
   0x4   : > { %p315_p2 = pnand %p2774_p0, %p314_p1 }
   0x6   : > { %318 = sbr.rel (%p315_p2) target bundleno = 1642 (0x66a), region = 60 }
   0xd   : > { %v430_v0 = vld [vmem:[%s5010_s1] sm:$0xff]  ;;  %v431_v1 = vld [vmem:[%s5010_s1 + $0x8] sm:$0xff]  ;;  %v432_v2 = vld [vmem:[%s5010_s1 + $0x10] sm:$0xff]  ;;  %s2775_s21 = sshll.u32 %s2770_s14, 5  ;;  %v5020_v3 = vmov 0.0|0.0  }
   0xe   : > { %3170 = vmatprep.subr.bf16.mxu0 %v5020_v3  ;;  %v3679_v4 = vpack.c.bf16 %v431_v1, %v430_v0  ;;  %v433_v5 = vld [vmem:[%s5010_s1 + $0x18] sm:$0xff]  ;;  %p354_p3 = scmp.lt.s32.totalorder %s2775_s21, 63  ;;  %v434_v7 = vld [vmem:[%s5010_s1 + $0x20] sm:$0xff]  ;;  %v435_v8 = vld [vmem:[%s5010_s1 + $0x28] sm:$0xff] }
   0xf   : > { %v3685_v6 = vpack.c.bf16 %v433_v5, %v432_v2  ;;  %v3698_v9 = vpack.c.bf16 %v435_v8, %v434_v7  ;;  %v436_v10 = vld [vmem:[%s5010_s1 + $0x30] sm:$0xff]  ;;  %v437_v11 = vld [vmem:[%s5010_s1 + $0x38] sm:$0xff]  ;;  %v438_v14 = vld [vmem:[%s5010_s1 + $0x40] sm:$0xff] }
  0x10   : > { %3172 = vmatpush1.bf16.msra.mxu0 %v3679_v4  ;;  %s5099_s21 = smov (!%p354_p3, %s2775_s21), 63  ;;  %v3716_v13 = vpack.c.bf16 %v437_v11, %v436_v10  ;;  %v439_v15 = vld [vmem:[%s5010_s1 + $0x48] sm:$0xff]  ;;  %v440_v17 = vld [vmem:[%s5010_s1 + $0x50] sm:$0xff]  ;;  %v441_v18 = vld [vmem:[%s5010_s1 + $0x58] sm:$0xff] }
  0x11   : > { %3173 = vmatprep.subr.bf16.mxu0 %v5020_v3  ;;  %s2785_s28 = sshll.u32 %s5099_s21, 4  ;;  %v3727_v16 = vpack.c.bf16 %v439_v15, %v438_v14  ;;  %v3737_v19 = vpack.c.bf16 %v441_v18, %v440_v17  ;;  %v442_v20 = vld [vmem:[%s5010_s1 + $0x60] sm:$0xff]  ;;  %v443_v21 = vld [vmem:[%s5010_s1 + $0x68] sm:$0xff]  ;;  %v444_v23 = vld [vmem:[%s5010_s1 + $0x70] sm:$0xff] }
  0x12   : > { %s3703_s11 = scalar_lea.vmem %s5009_s0, %s2785_s28  ;;  %v3747_v22 = vpack.c.bf16 %v443_v21, %v442_v20  ;;  %v445_v24 = vld [vmem:[%s5010_s1 + $0x78] sm:$0xff]  ;;  %v446_v26 = vld [vmem:[%s5010_s1 + $0x80] sm:$0xff]  ;;  %v447_v27 = vld [vmem:[%s5010_s1 + $0x88] sm:$0xff] }
  0x13   : > { %v3713_v12 = vld [vmem:[%s3703_s11 + $0x8] sm:$0xff]  ;;  %v3757_v25 = vpack.c.bf16 %v445_v24, %v444_v23  ;;  %v3767_v28 = vpack.c.bf16 %v447_v27, %v446_v26  ;;  %v448_v29 = vld [vmem:[%s5010_s1 + $0x90] sm:$0xff]  ;;  %v449_v30 = vld [vmem:[%s5010_s1 + $0x98] sm:$0xff] }
  0x14   : > { %3175 = vmatpush1.bf16.msra.mxu0 %v3685_v6  ;;  %526 = vmatprep.mubr.f32.mxu0 %v3713_v12  ;;  %v3777_v31 = vpack.c.bf16 %v449_v30, %v448_v29  ;;  %v450_v32 = vld [vmem:[%s5010_s1 + $0xa0] sm:$0xff]  ;;  %v451_v33 = vld [vmem:[%s5010_s1 + $0xa8] sm:$0xff]  ;;  %v452_v35 = vld [vmem:[%s5010_s1 + $0xb0] sm:$0xff] }
  0x15   : > { %3176 = vmatprep.subr.bf16.mxu0 %v5020_v3  ;;  %v3787_v34 = vpack.c.bf16 %v451_v33, %v450_v32  ;;  %v453_v36 = vld [vmem:[%s5010_s1 + $0xb8] sm:$0xff]  ;;  %v454_v38 = vld [vmem:[%s5010_s1 + $0xc0] sm:$0xff]  ;;  %v455_v39 = vld [vmem:[%s5010_s1 + $0xc8] sm:$0xff] }
  0x16   : > { %v3797_v37 = vpack.c.bf16 %v453_v36, %v452_v35  ;;  %v3807_v40 = vpack.c.bf16 %v455_v39, %v454_v38  ;;  %v456_v41 = vld [vmem:[%s5010_s1 + $0xd0] sm:$0xff]  ;;  %v457_v42 = vld [vmem:[%s5010_s1 + $0xd8] sm:$0xff]  ;;  %v458_v44 = vld [vmem:[%s5010_s1 + $0xe0] sm:$0xff] }
  0x17   : > { %v3817_v43 = vpack.c.bf16 %v457_v42, %v456_v41  ;;  %v459_v45 = vld [vmem:[%s5010_s1 + $0xe8] sm:$0xff]  ;;  %v460_v47 = vld [vmem:[%s5010_s1 + $0xf0] sm:$0xff]  ;;  %v461_v48 = vld [vmem:[%s5010_s1 + $0xf8] sm:$0xff] }
  0x18   : > { %3178 = vmatpush1.bf16.msra.mxu0 %v3698_v9  ;;  %v3827_v46 = vpack.c.bf16 %v459_v45, %v458_v44  ;;  %v3837_v49 = vpack.c.bf16 %v461_v48, %v460_v47  ;;  %v3841_v50 = vld [vmem:[%s3703_s11] sm:$0xff]  ;;  %v3844_v51 = vld [vmem:[%s3703_s11 + $0x18] sm:$0xff]  ;;  %v688_v52 = vld [vmem:[%s5011_s2 + $0x8] sm:$0xff] }
  0x19   : > { %3179 = vmatprep.subr.bf16.mxu0 %v5020_v3  ;;  %v690_v53 = vld [vmem:[%s5011_s2 + $0x18] sm:$0xff]  ;;  %v687_v54 = vld [vmem:[%s5011_s2] sm:$0xff]  ;;  %v689_v56 = vld [vmem:[%s5011_s2 + $0x10] sm:$0xff] }
  0x1a   : > { %v3218_v55 = vpack.c.bf16 %v690_v53, %v688_v52  ;;  %v692_v57 = vld [vmem:[%s5011_s2 + $0x28] sm:$0xff]  ;;  %v694_v58 = vld [vmem:[%s5011_s2 + $0x38] sm:$0xff]  ;;  %v3220_v59 = vpack.c.bf16 %v689_v56, %v687_v54  ;;  %v691_v61 = vld [vmem:[%s5011_s2 + $0x20] sm:$0xff] }
  0x1b   : > { %v3222_v60 = vpack.c.bf16 %v694_v58, %v692_v57  ;;  %v693_v62 = vld [vmem:[%s5011_s2 + $0x30] sm:$0xff]  ;;  %v696_v63 = vld [vmem:[%s5011_s2 + $0x48] sm:$0xff]  ;;  %v698_v0 = vld [vmem:[%s5011_s2 + $0x58] sm:$0xff] }
  0x1c   : > { %3181 = vmatpush1.bf16.msra.mxu0 %v3716_v13  ;;  %3219 = vmatprep.subr.bf16.mxu1 %v3218_v55  ;;  %v3224_v1 = vpack.c.bf16 %v693_v62, %v691_v61  ;;  %v3880_v2 = vld [vmem:[%s3703_s11 + $0x10] sm:$0xff]  ;;  %v3226_v5 = vpack.c.bf16 %v698_v0, %v696_v63  ;;  %v695_v7 = vld [vmem:[%s5011_s2 + $0x40] sm:$0xff]  ;;  %v3889_v10 = vld [vmem:[%s3703_s11 + $0x28] sm:$0xff] }
  0x1d   : > { %3182 = vmatprep.subr.bf16.mxu0 %v5020_v3  ;;  %3221 = vmatpush1.bf16.msra.mxu1 %v3220_v59  ;;  %v697_v8 = vld [vmem:[%s5011_s2 + $0x50] sm:$0xff]  ;;  %v700_v11 = vld [vmem:[%s5011_s2 + $0x68] sm:$0xff]  ;;  %v702_v14 = vld [vmem:[%s5011_s2 + $0x78] sm:$0xff] }
  0x1e   : > { %3223 = vmatprep.subr.bf16.mxu1 %v3222_v60  ;;  %v3228_v15 = vpack.c.bf16 %v697_v8, %v695_v7  ;;  %v3900_v17 = vld [vmem:[%s3703_s11 + $0x20] sm:$0xff]  ;;  %v3230_v18 = vpack.c.bf16 %v702_v14, %v700_v11  ;;  %v701_v21 = vld [vmem:[%s5011_s2 + $0x70] sm:$0xff]  ;;  %v3909_v23 = vld [vmem:[%s3703_s11 + $0x38] sm:$0xff] }
  0x1f   : > { %v699_v20 = vld [vmem:[%s5011_s2 + $0x60] sm:$0xff]  ;;  %v704_v24 = vld [vmem:[%s5011_s2 + $0x88] sm:$0xff]  ;;  %v706_v26 = vld [vmem:[%s5011_s2 + $0x98] sm:$0xff] }
  0x20   : > { %3184 = vmatpush1.bf16.msra.mxu0 %v3727_v16  ;;  %v3232_v27 = vpack.c.bf16 %v701_v21, %v699_v20  ;;  %v3920_v29 = vld [vmem:[%s3703_s11 + $0x30] sm:$0xff]  ;;  %v3234_v30 = vpack.c.bf16 %v706_v26, %v704_v24  ;;  %v703_v32 = vld [vmem:[%s5011_s2 + $0x80] sm:$0xff]  ;;  %v3929_v35 = vld [vmem:[%s3703_s11 + $0x48] sm:$0xff] }
  0x21   : > { %3185 = vmatprep.subr.bf16.mxu0 %v5020_v3  ;;  %3225 = vmatpush1.bf16.msra.mxu1 %v3224_v1  ;;  %v705_v33 = vld [vmem:[%s5011_s2 + $0x90] sm:$0xff]  ;;  %v708_v36 = vld [vmem:[%s5011_s2 + $0xa8] sm:$0xff]  ;;  %v710_v38 = vld [vmem:[%s5011_s2 + $0xb8] sm:$0xff] }
  0x22   : > { %3227 = vmatprep.subr.bf16.mxu1 %v3226_v5  ;;  %v3236_v39 = vpack.c.bf16 %v705_v33, %v703_v32  ;;  %v3940_v41 = vld [vmem:[%s3703_s11 + $0x40] sm:$0xff]  ;;  %v3238_v42 = vpack.c.bf16 %v710_v38, %v708_v36  ;;  %v709_v45 = vld [vmem:[%s5011_s2 + $0xb0] sm:$0xff]  ;;  %v3949_v47 = vld [vmem:[%s3703_s11 + $0x58] sm:$0xff] }
  0x23   : > { %v707_v44 = vld [vmem:[%s5011_s2 + $0xa0] sm:$0xff]  ;;  %v712_v48 = vld [vmem:[%s5011_s2 + $0xc8] sm:$0xff]  ;;  %v714_v52 = vld [vmem:[%s5011_s2 + $0xd8] sm:$0xff] }
  0x24   : > { %3187 = vmatpush1.bf16.msra.mxu0 %v3737_v19  ;;  %v3240_v53 = vpack.c.bf16 %v709_v45, %v707_v44  ;;  %v3960_v54 = vld [vmem:[%s3703_s11 + $0x50] sm:$0xff]  ;;  %v3242_v55 = vpack.c.bf16 %v714_v52, %v712_v48  ;;  %v711_v56 = vld [vmem:[%s5011_s2 + $0xc0] sm:$0xff]  ;;  %v3969_v58 = vld [vmem:[%s3703_s11 + $0x68] sm:$0xff] }
  0x25   : > { %3188 = vmatprep.subr.bf16.mxu0 %v5020_v3  ;;  %3229 = vmatpush1.bf16.msra.mxu1 %v3228_v15  ;;  %v713_v57 = vld [vmem:[%s5011_s2 + $0xd0] sm:$0xff]  ;;  %v716_v59 = vld [vmem:[%s5011_s2 + $0xe8] sm:$0xff]  ;;  %v718_v60 = vld [vmem:[%s5011_s2 + $0xf8] sm:$0xff] }
  0x26   : > { %3231 = vmatprep.subr.bf16.mxu1 %v3230_v18  ;;  %v3244_v61 = vpack.c.bf16 %v713_v57, %v711_v56  ;;  %v3980_v62 = vld [vmem:[%s3703_s11 + $0x60] sm:$0xff]  ;;  %v3246_v63 = vpack.c.bf16 %v718_v60, %v716_v59  ;;  %v717_v1 = vld [vmem:[%s5011_s2 + $0xf0] sm:$0xff]  ;;  %v3989_v5 = vld [vmem:[%s3703_s11 + $0x78] sm:$0xff] }
  0x27   : > { %v715_v0 = vld [vmem:[%s5011_s2 + $0xe0] sm:$0xff]  ;;  %v3994_v8 = vld [vmem:[%s3703_s11 + $0x70] sm:$0xff]  ;;  %v3997_v11 = vld [vmem:[%s3703_s11 + $0x88] sm:$0xff] }
  0x28   : > { %3190 = vmatpush1.bf16.msra.mxu0 %v3747_v22  ;;  %v3248_v7 = vpack.c.bf16 %v717_v1, %v715_v0  ;;  %v4002_v14 = vld [vmem:[%s3703_s11 + $0x80] sm:$0xff]  ;;  %v4006_v15 = vld [vmem:[%s3703_s11 + $0x98] sm:$0xff]  ;;  %v4011_v18 = vld [vmem:[%s3703_s11 + $0x90] sm:$0xff]  ;;  %v5024_v1 = vmov 0.0  }
  0x29   : > { %3191 = vmatprep.subr.bf16.mxu0 %v5020_v3  ;;  %3233 = vmatpush1.bf16.msra.mxu1 %v3232_v27  ;;  %v4014_v20 = vld [vmem:[%s3703_s11 + $0xa8] sm:$0xff]  ;;  %v4019_v21 = vld [vmem:[%s3703_s11 + $0xa0] sm:$0xff]  ;;  %v4022_v24 = vld [vmem:[%s3703_s11 + $0xb8] sm:$0xff] }
  0x2a   : > { %3235 = vmatprep.subr.bf16.mxu1 %v3234_v30  ;;  %v4027_v26 = vld [vmem:[%s3703_s11 + $0xb0] sm:$0xff]  ;;  %v4030_v27 = vld [vmem:[%s3703_s11 + $0xc8] sm:$0xff]  ;;  %v4035_v30 = vld [vmem:[%s3703_s11 + $0xc0] sm:$0xff]  ;;  %783 = vmatprep.mubr.f32.mxu1 %v5024_v1 }
  0x2b   : > { %v4038_v32 = vld [vmem:[%s3703_s11 + $0xd8] sm:$0xff]  ;;  %v4043_v33 = vld [vmem:[%s3703_s11 + $0xd0] sm:$0xff]  ;;  %v4046_v36 = vld [vmem:[%s3703_s11 + $0xe8] sm:$0xff] }
  0x2c   : > { %3193 = vmatpush1.bf16.msra.mxu0 %v3757_v25  ;;  %v4051_v38 = vld [vmem:[%s3703_s11 + $0xe0] sm:$0xff]  ;;  %v4062_v44 = vld [vmem:[%s3703_s11 + $0x108] sm:$0xff]  ;;  %v4070_v48 = vld [vmem:[%s3703_s11 + $0x118] sm:$0xff] }
  0x2d   : > { %3194 = vmatprep.subr.bf16.mxu0 %v5020_v3  ;;  %3237 = vmatpush1.bf16.msra.mxu1 %v3236_v39  ;;  %v4054_v39 = vld [vmem:[%s3703_s11 + $0xf8] sm:$0xff]  ;;  %v4067_v45 = vld [vmem:[%s3703_s11 + $0x100] sm:$0xff]  ;;  %v4075_v52 = vld [vmem:[%s3703_s11 + $0x110] sm:$0xff] }
  0x2e   : > { %3239 = vmatprep.subr.bf16.mxu1 %v3238_v42  ;;  %v4059_v42 = vld [vmem:[%s3703_s11 + $0xf0] sm:$0xff]  ;;  %v4086_v56 = vld [vmem:[%s3703_s11 + $0x138] sm:$0xff]  ;;  %v4094_v59 = vld [vmem:[%s3703_s11 + $0x148] sm:$0xff] }
  0x2f   : > { %5048 = vst [vmem:[#allocation2_spill] sm:$0xff] %v4086_v56  ;;  %v4091_v57 = vld [vmem:[%s3703_s11 + $0x130] sm:$0xff]  ;;  %5049 = vst [vmem:[#allocation3_spill] sm:$0xff] %v4094_v59  ;;  %v4099_v60 = vld [vmem:[%s3703_s11 + $0x140] sm:$0xff] }
  0x30   : > { %3196 = vmatpush1.bf16.msra.mxu0 %v3767_v28  ;;  %5050 = vst [vmem:[#allocation4_spill] sm:$0xff] %v4099_v60  ;;  %v4110_v0 = vld [vmem:[%s3703_s11 + $0x168] sm:$0xff]  ;;  %v4132_v1 = vld [vmem:[%s3703_s11 + $0x180] sm:$0xff] }
  0x31   : > { %3197 = vmatprep.subr.bf16.mxu0 %v5020_v3  ;;  %3241 = vmatpush1.bf16.msra.mxu1 %v3240_v53  ;;  %v4078_v53 = vld [vmem:[%s3703_s11 + $0x128] sm:$0xff]  ;;  %5053 = vst [vmem:[#allocation7_spill] sm:$0xff] %v4110_v0  ;;  %5058 = vst [vmem:[#allocation12_spill] sm:$0xff] %v4132_v1 }
  0x32   : > { %3243 = vmatprep.subr.bf16.mxu1 %v3242_v55  ;;  %v4083_v55 = vld [vmem:[%s3703_s11 + $0x120] sm:$0xff] }
  0x34   : > { %3199 = vmatpush1.bf16.msra.mxu0 %v3777_v31 }
  0x35   : > { %3200 = vmatprep.subr.bf16.mxu0 %v5020_v3  ;;  %3245 = vmatpush1.bf16.msra.mxu1 %v3244_v61  ;;  %v4102_v61 = vld [vmem:[%s3703_s11 + $0x158] sm:$0xff] }
  0x36   : > { %3247 = vmatprep.subr.bf16.mxu1 %v3246_v63  ;;  %5051 = vst [vmem:[#allocation5_spill] sm:$0xff] %v4102_v61  ;;  %v4107_v63 = vld [vmem:[%s3703_s11 + $0x150] sm:$0xff] }
  0x37   : > { %5052 = vst [vmem:[#allocation6_spill] sm:$0xff] %v4107_v63 }
  0x38   : > { %3202 = vmatpush1.bf16.msra.mxu0 %v3787_v34 }
  0x39   : > { %3203 = vmatprep.subr.bf16.mxu0 %v5020_v3  ;;  %3249 = vmatpush1.bf16.msra.mxu1 %v3248_v7  ;;  %v4116_v7 = vld [vmem:[%s3703_s11 + $0x160] sm:$0xff] }
  0x3a   : > { %3250 = vmatprep.subr.bf16.mxu1 %v5020_v3  ;;  %5054 = vst [vmem:[#allocation8_spill] sm:$0xff] %v4116_v7 }
  0x3c   : > { %3205 = vmatpush1.bf16.msra.mxu0 %v3797_v37 }
  0x3d   : > { %3206 = vmatprep.subr.bf16.mxu0 %v5020_v3 }
  0x40   : > { %3208 = vmatpush1.bf16.msra.mxu0 %v3807_v40 }
  0x41   : > { %3209 = vmatprep.subr.bf16.mxu0 %v5020_v3 }
  0x44   : > { %3211 = vmatpush1.bf16.msra.mxu0 %v3817_v43 }
  0x45   : > { %3212 = vmatprep.subr.bf16.mxu0 %v5020_v3 }
  0x48   : > { %3214 = vmatpush1.bf16.msra.mxu0 %v3827_v46 }
  0x49   : > { %3215 = vmatprep.subr.bf16.mxu0 %v5020_v3  ;;  %v4119_v3 = vld [vmem:[%s3703_s11 + $0x178] sm:$0xff] }
  0x4a   : > { %5055 = vst [vmem:[#allocation9_spill] sm:$0xff] %v4119_v3 }
  0x4c   : > { %3217 = vmatpush1.bf16.msra.mxu0 %v3837_v49 }
  0x4f   : > { %527 = vmatmul.mubr.f32.vlgmr.msra.gmra.mrb[0].mxu0 %v3841_v50 }
  0x50   : > { %531 = vmatprep.mubr.f32.mxu0 %v3844_v51 }
  0x53   : > { %532 = vmatmul.mubr.f32.gmra.mrb[2].mxu0 %v3880_v2 }
  0x54   : > { %536 = vmatprep.mubr.f32.mxu0 %v3889_v10 }
  0x57   : > { %537 = vmatmul.mubr.f32.gmra.mrb[4].mxu0 %v3900_v17 }
  0x58   : > { %541 = vmatprep.mubr.f32.mxu0 %v3909_v23 }
  0x5b   : > { %542 = vmatmul.mubr.f32.gmra.mrb[6].mxu0 %v3920_v29 }
  0x5c   : > { %546 = vmatprep.mubr.f32.mxu0 %v3929_v35 }
  0x5f   : > { %547 = vmatmul.mubr.f32.gmra.mrb[8].mxu0 %v3940_v41 }
  0x60   : > { %551 = vmatprep.mubr.f32.mxu0 %v3949_v47 }
  0x63   : > { %552 = vmatmul.mubr.f32.gmra.mrb[10].mxu0 %v3960_v54 }
  0x64   : > { %556 = vmatprep.mubr.f32.mxu0 %v3969_v58 }
  0x67   : > { %557 = vmatmul.mubr.f32.gmra.mrb[12].mxu0 %v3980_v62 }
  0x68   : > { %561 = vmatprep.mubr.f32.mxu0 %v3989_v5 }
  0x6b   : > { %562 = vmatmul.mubr.f32.gmra.mrb[14].mxu0 %v3994_v8 }
  0x6c   : > { %566 = vmatprep.mubr.f32.mxu0 %v3997_v11 }
  0x6f   : > { %567 = vmatmul.mubr.f32.gmra.mrb[16].mxu0 %v4002_v14 }
  0x70   : > { %571 = vmatprep.mubr.f32.mxu0 %v4006_v15 }
  0x73   : > { %572 = vmatmul.mubr.f32.gmra.mrb[18].mxu0 %v4011_v18 }
  0x74   : > { %576 = vmatprep.mubr.f32.mxu0 %v4014_v20 }
  0x77   : > { %577 = vmatmul.mubr.f32.gmra.mrb[20].mxu0 %v4019_v21 }
  0x78   : > { %581 = vmatprep.mubr.f32.mxu0 %v4022_v24 }
  0x7b   : > { %582 = vmatmul.mubr.f32.gmra.mrb[22].mxu0 %v4027_v26 }
  0x7c   : > { %586 = vmatprep.mubr.f32.mxu0 %v4030_v27 }
  0x7f   : > { %587 = vmatmul.mubr.f32.gmra.mrb[24].mxu0 %v4035_v30 }
  0x80   : > { %591 = vmatprep.mubr.f32.mxu0 %v4038_v32 }
  0x83   : > { %592 = vmatmul.mubr.f32.gmra.mrb[26].mxu0 %v4043_v33 }
  0x84   : > { %596 = vmatprep.mubr.f32.mxu0 %v4046_v36 }
  0x87   : > { %597 = vmatmul.mubr.f32.gmra.mrb[28].mxu0 %v4051_v38 }
  0x88   : > { %601 = vmatprep.mubr.f32.mxu0 %v4054_v39 }
  0x8b   : > { %602 = vmatmul.mubr.f32.gmra.mrb[30].mxu0 %v4059_v42 }
  0x8c   : > { %606 = vmatprep.mubr.f32.mxu0 %v4062_v44 }
  0x8f   : > { %607 = vmatmul.mubr.f32.gmra.mrb[32].mxu0 %v4067_v45 }
  0x90   : > { %611 = vmatprep.mubr.f32.mxu0 %v4070_v48 }
  0x93   : > { %612 = vmatmul.mubr.f32.gmra.mrb[34].mxu0 %v4075_v52 }
  0x94   : > { %616 = vmatprep.mubr.f32.mxu0 %v4078_v53 }
  0x97   : > { %617 = vmatmul.mubr.f32.gmra.mrb[36].mxu0 %v4083_v55 }
  0x98   : > { %621 = vmatprep.mubr.f32.mxu0 %v4086_v56 }
  0x9b   : > { %622 = vmatmul.mubr.f32.gmra.mrb[38].mxu0 %v4091_v57 }
  0x9c   : > { %626 = vmatprep.mubr.f32.mxu0 %v4094_v59  ;;  %v4127_v59 = vld [vmem:[%s3703_s11 + $0x188] sm:$0xff] }
  0x9d   : > { %5057 = vst [vmem:[#allocation11_spill] sm:$0xff] %v4127_v59 }
  0x9f   : > { %627 = vmatmul.mubr.f32.gmra.mrb[40].mxu0 %v4099_v60  ;;  %v5072_v60 = vmov 0.0  }
  0xa0   : > { %631 = vmatprep.mubr.f32.mxu0 %v4102_v61  ;;  %v4124_v61 = vld [vmem:[%s3703_s11 + $0x170] sm:$0xff] }
  0xa1   : > { %5056 = vst [vmem:[#allocation10_spill] sm:$0xff] %v4124_v61 }
  0xa3   : > { %632 = vmatmul.mubr.f32.gmra.mrb[42].mxu0 %v4107_v63  ;;  %v4180_v63 = vld [vmem:[%s3703_s11 + $0x1e0] sm:$0xff] }
  0xa4   : > { %636 = vmatprep.mubr.f32.mxu0 %v4110_v0  ;;  %v4135_v0 = vld [vmem:[%s3703_s11 + $0x198] sm:$0xff] }
  0xa5   : > { %5059 = vst [vmem:[#allocation13_spill] sm:$0xff] %v4135_v0 }
  0xa7   : > { %637 = vmatmul.mubr.f32.gmra.mrb[44].mxu0 %v4116_v7  ;;  %v4143_v7 = vld [vmem:[%s3703_s11 + $0x1a8] sm:$0xff] }
  0xa8   : > { %641 = vmatprep.mubr.f32.mxu0 %v4119_v3  ;;  %v4140_v3 = vld [vmem:[%s3703_s11 + $0x190] sm:$0xff]  ;;  %5061 = vst [vmem:[#allocation15_spill] sm:$0xff] %v4143_v7 }
  0xa9   : > { %5060 = vst [vmem:[#allocation14_spill] sm:$0xff] %v4140_v3 }
  0xab   : > { %642 = vmatmul.mubr.f32.gmra.mrb[46].mxu0 %v4124_v61  ;;  %v4151_v61 = vld [vmem:[%s3703_s11 + $0x1b8] sm:$0xff] }
  0xac   : > { %646 = vmatprep.mubr.f32.mxu0 %v4127_v59  ;;  %v4148_v59 = vld [vmem:[%s3703_s11 + $0x1a0] sm:$0xff]  ;;  %5063 = vst [vmem:[#allocation17_spill] sm:$0xff] %v4151_v61 }
  0xad   : > { %5062 = vst [vmem:[#allocation16_spill] sm:$0xff] %v4148_v59 }
  0xaf   : > { %647 = vmatmul.mubr.f32.gmra.mrb[48].mxu0 %v4132_v1  ;;  %v4159_v1 = vld [vmem:[%s3703_s11 + $0x1c8] sm:$0xff] }
  0xb0   : > { %651 = vmatprep.mubr.f32.mxu0 %v4135_v0  ;;  %v4156_v0 = vld [vmem:[%s3703_s11 + $0x1b0] sm:$0xff]  ;;  %5065 = vst [vmem:[#allocation19_spill] sm:$0xff] %v4159_v1 }
  0xb1   : > { %5064 = vst [vmem:[#allocation18_spill] sm:$0xff] %v4156_v0 }
  0xb3   : > { %652 = vmatmul.mubr.f32.gmra.mrb[50].mxu0 %v4140_v3  ;;  %v4167_v3 = vld [vmem:[%s3703_s11 + $0x1d8] sm:$0xff] }
  0xb4   : > { %656 = vmatprep.mubr.f32.mxu0 %v4143_v7  ;;  %v4164_v7 = vld [vmem:[%s3703_s11 + $0x1c0] sm:$0xff]  ;;  %5067 = vst [vmem:[#allocation21_spill] sm:$0xff] %v4167_v3 }
  0xb5   : > { %5066 = vst [vmem:[#allocation20_spill] sm:$0xff] %v4164_v7 }
  0xb7   : > { %657 = vmatmul.mubr.f32.gmra.mrb[52].mxu0 %v4148_v59  ;;  %v4172_v59 = vld [vmem:[%s3703_s11 + $0x1d0] sm:$0xff] }
  0xb8   : > { %661 = vmatprep.mubr.f32.mxu0 %v4151_v61  ;;  %5068 = vst [vmem:[#allocation22_spill] sm:$0xff] %v4172_v59  ;;  %v4175_v61 = vld [vmem:[%s3703_s11 + $0x1e8] sm:$0xff] }
  0xb9   : > { %5069 = vst [vmem:[#allocation23_spill] sm:$0xff] %v4175_v61 }
  0xbb   : > { %662 = vmatmul.mubr.f32.gmra.mrb[54].mxu0 %v4156_v0  ;;  %v4183_v0 = vld [vmem:[%s3703_s11 + $0x1f8] sm:$0xff] }
  0xbc   : > { %666 = vmatprep.mubr.f32.mxu0 %v4159_v1  ;;  %5070 = vst [vmem:[#allocation24_spill] sm:$0xff] %v4183_v0  ;;  %v4188_v1 = vld [vmem:[%s3703_s11 + $0x1f0] sm:$0xff] }
  0xbd   : > { %5071 = vst [vmem:[#allocation25_spill] sm:$0xff] %v4188_v1 }
  0xbf   : > { %667 = vmatmul.mubr.f32.gmra.mrb[56].mxu0 %v4164_v7 }
  0xc0   : > { %671 = vmatprep.mubr.f32.mxu0 %v4167_v3 }
  0xc3   : > { %672 = vmatmul.mubr.f32.gmra.mrb[58].mxu0 %v4172_v59 }
  0xc4   : > { %676 = vmatprep.mubr.f32.mxu0 %v4175_v61  ;;  %v5073_v61 = vmov 0.0|0.0  }
  0xc7   : > { %677 = vmatmul.mubr.f32.gmra.mrb[60].mxu0 %v4180_v63 }
  0xc8   : > { %681 = vmatprep.mubr.f32.mxu0 %v4183_v0 }
  0xcb   : > { %682 = vmatmul.mubr.f32.gmra.mrb[62].mxu0 %v4188_v1 }
 0x122   : > { %v528_v3 = vpop.f32.mrb[0].mxu0 }
 0x123   : > { %v530_v7 = vpop.f32.mrb[1].mxu0  ;;  %784 = vmatmul.mubr.f32.vlgmr.msra.gmra.mrb[0].mxu1 %v528_v3 }
 0x124   : > { %789 = vmatprep.mubr.f32.mxu1 %v5072_v60  ;;  %3252 = vmatpush1.bf16.msra.mxu1 %v3679_v4 }
 0x125   : > { %3253 = vmatprep.subr.bf16.mxu1 %v5073_v61 }
 0x126   : > { %v533_v59 = vpop.f32.mrb[2].mxu0 }
 0x127   : > { %v535_v56 = vpop.f32.mrb[3].mxu0  ;;  %790 = vmatmul.mubr.f32.gmra.mrb[2].mxu1 %v533_v59 }
 0x128   : > { %795 = vmatprep.mubr.f32.mxu1 %v5072_v60  ;;  %3255 = vmatpush1.bf16.msra.mxu1 %v3685_v6 }
 0x129   : > { %3256 = vmatprep.subr.bf16.mxu1 %v5073_v61 }
 0x12a   : > { %v538_v0 = vpop.f32.mrb[4].mxu0 }
 0x12b   : > { %v540_v1 = vpop.f32.mrb[5].mxu0  ;;  %796 = vmatmul.mubr.f32.gmra.mrb[4].mxu1 %v538_v0 }
 0x12c   : > { %801 = vmatprep.mubr.f32.mxu1 %v5072_v60  ;;  %3258 = vmatpush1.bf16.msra.mxu1 %v3698_v9 }
 0x12d   : > { %3259 = vmatprep.subr.bf16.mxu1 %v5073_v61 }
 0x12e   : > { %v543_v3 = vpop.f32.mrb[6].mxu0 }
 0x12f   : > { %v545_v4 = vpop.f32.mrb[7].mxu0  ;;  %802 = vmatmul.mubr.f32.gmra.mrb[6].mxu1 %v543_v3 }
 0x130   : > { %807 = vmatprep.mubr.f32.mxu1 %v5072_v60  ;;  %3261 = vmatpush1.bf16.msra.mxu1 %v3716_v13 }
 0x131   : > { %3262 = vmatprep.subr.bf16.mxu1 %v5073_v61 }
 0x132   : > { %v548_v6 = vpop.f32.mrb[8].mxu0 }
 0x133   : > { %v550_v56 = vpop.f32.mrb[9].mxu0  ;;  %808 = vmatmul.mubr.f32.gmra.mrb[8].mxu1 %v548_v6 }
 0x134   : > { %813 = vmatprep.mubr.f32.mxu1 %v5072_v60  ;;  %3264 = vmatpush1.bf16.msra.mxu1 %v3727_v16 }
 0x135   : > { %3265 = vmatprep.subr.bf16.mxu1 %v5073_v61 }
 0x136   : > { %v553_v9 = vpop.f32.mrb[10].mxu0 }
 0x137   : > { %v555_v59 = vpop.f32.mrb[11].mxu0  ;;  %814 = vmatmul.mubr.f32.gmra.mrb[10].mxu1 %v553_v9 }
 0x138   : > { %819 = vmatprep.mubr.f32.mxu1 %v5072_v60  ;;  %3267 = vmatpush1.bf16.msra.mxu1 %v3737_v19 }
 0x139   : > { %3268 = vmatprep.subr.bf16.mxu1 %v5073_v61 }
 0x13a   : > { %v558_v13 = vpop.f32.mrb[12].mxu0 }
 0x13b   : > { %v560_v0 = vpop.f32.mrb[13].mxu0  ;;  %820 = vmatmul.mubr.f32.gmra.mrb[12].mxu1 %v558_v13 }
 0x13c   : > { %825 = vmatprep.mubr.f32.mxu1 %v5072_v60  ;;  %3270 = vmatpush1.bf16.msra.mxu1 %v3747_v22 }
 0x13d   : > { %3271 = vmatprep.subr.bf16.mxu1 %v5073_v61 }
 0x13e   : > { %v563_v16 = vpop.f32.mrb[14].mxu0 }
 0x13f   : > { %v565_v1 = vpop.f32.mrb[15].mxu0  ;;  %826 = vmatmul.mubr.f32.gmra.mrb[14].mxu1 %v563_v16 }
 0x140   : > { %831 = vmatprep.mubr.f32.mxu1 %v5072_v60  ;;  %3273 = vmatpush1.bf16.msra.mxu1 %v3757_v25 }
 0x141   : > { %3274 = vmatprep.subr.bf16.mxu1 %v5073_v61 }
 0x142   : > { %v568_v19 = vpop.f32.mrb[16].mxu0 }
 0x143   : > { %v570_v7 = vpop.f32.mrb[17].mxu0  ;;  %832 = vmatmul.mubr.f32.gmra.mrb[16].mxu1 %v568_v19 }
 0x144   : > { %837 = vmatprep.mubr.f32.mxu1 %v5072_v60  ;;  %3276 = vmatpush1.bf16.msra.mxu1 %v3767_v28 }
 0x145   : > { %3277 = vmatprep.subr.bf16.mxu1 %v5073_v61 }
 0x146   : > { %v573_v22 = vpop.f32.mrb[18].mxu0 }
 0x147   : > { %v575_v3 = vpop.f32.mrb[19].mxu0  ;;  %838 = vmatmul.mubr.f32.gmra.mrb[18].mxu1 %v573_v22 }
 0x148   : > { %843 = vmatprep.mubr.f32.mxu1 %v5072_v60  ;;  %3279 = vmatpush1.bf16.msra.mxu1 %v3777_v31 }
 0x149   : > { %3280 = vmatprep.subr.bf16.mxu1 %v5073_v61 }
 0x14a   : > { %v578_v25 = vpop.f32.mrb[20].mxu0 }
 0x14b   : > { %v580_v4 = vpop.f32.mrb[21].mxu0  ;;  %844 = vmatmul.mubr.f32.gmra.mrb[20].mxu1 %v578_v25 }
 0x14c   : > { %849 = vmatprep.mubr.f32.mxu1 %v5072_v60  ;;  %3282 = vmatpush1.bf16.msra.mxu1 %v3787_v34 }
 0x14d   : > { %3283 = vmatprep.subr.bf16.mxu1 %v5073_v61 }
 0x14e   : > { %v583_v28 = vpop.f32.mrb[22].mxu0 }
 0x14f   : > { %v585_v6 = vpop.f32.mrb[23].mxu0  ;;  %850 = vmatmul.mubr.f32.gmra.mrb[22].mxu1 %v583_v28 }
 0x150   : > { %855 = vmatprep.mubr.f32.mxu1 %v5072_v60  ;;  %3285 = vmatpush1.bf16.msra.mxu1 %v3797_v37 }
 0x151   : > { %3286 = vmatprep.subr.bf16.mxu1 %v5073_v61 }
 0x152   : > { %v588_v31 = vpop.f32.mrb[24].mxu0 }
 0x153   : > { %v590_v56 = vpop.f32.mrb[25].mxu0  ;;  %856 = vmatmul.mubr.f32.gmra.mrb[24].mxu1 %v588_v31 }
 0x154   : > { %861 = vmatprep.mubr.f32.mxu1 %v5072_v60  ;;  %3288 = vmatpush1.bf16.msra.mxu1 %v3807_v40 }
 0x155   : > { %3289 = vmatprep.subr.bf16.mxu1 %v5073_v61 }
 0x156   : > { %v593_v34 = vpop.f32.mrb[26].mxu0 }
 0x157   : > { %v595_v9 = vpop.f32.mrb[27].mxu0  ;;  %862 = vmatmul.mubr.f32.gmra.mrb[26].mxu1 %v593_v34 }
 0x158   : > { %867 = vmatprep.mubr.f32.mxu1 %v5072_v60  ;;  %3291 = vmatpush1.bf16.msra.mxu1 %v3817_v43 }
 0x159   : > { %3292 = vmatprep.subr.bf16.mxu1 %v5073_v61 }
 0x15a   : > { %v598_v37 = vpop.f32.mrb[28].mxu0 }
 0x15b   : > { %v600_v59 = vpop.f32.mrb[29].mxu0  ;;  %868 = vmatmul.mubr.f32.gmra.mrb[28].mxu1 %v598_v37 }
 0x15c   : > { %873 = vmatprep.mubr.f32.mxu1 %v5072_v60  ;;  %3294 = vmatpush1.bf16.msra.mxu1 %v3827_v46 }
 0x15d   : > { %3295 = vmatprep.subr.bf16.mxu1 %v5073_v61 }
 0x15e   : > { %v603_v40 = vpop.f32.mrb[30].mxu0 }
 0x15f   : > { %v605_v13 = vpop.f32.mrb[31].mxu0  ;;  %874 = vmatmul.mubr.f32.gmra.mrb[30].mxu1 %v603_v40 }
 0x160   : > { %879 = vmatprep.mubr.f32.mxu1 %v5072_v60  ;;  %3297 = vmatpush1.bf16.msra.mxu1 %v3837_v49 }
 0x162   : > { %v608_v0 = vpop.f32.mrb[32].mxu0 }
 0x163   : > { %v610_v43 = vpop.f32.mrb[33].mxu0  ;;  %880 = vmatmul.mubr.f32.gmra.mrb[32].mxu1 %v608_v0 }
 0x164   : > { %885 = vmatprep.mubr.f32.mxu1 %v5072_v60 }
 0x166   : > { %v613_v16 = vpop.f32.mrb[34].mxu0 }
 0x167   : > { %v615_v1 = vpop.f32.mrb[35].mxu0  ;;  %886 = vmatmul.mubr.f32.gmra.mrb[34].mxu1 %v613_v16 }
 0x168   : > { %891 = vmatprep.mubr.f32.mxu1 %v5072_v60 }
 0x16a   : > { %v618_v46 = vpop.f32.mrb[36].mxu0 }
 0x16b   : > { %v620_v19 = vpop.f32.mrb[37].mxu0  ;;  %892 = vmatmul.mubr.f32.gmra.mrb[36].mxu1 %v618_v46 }
 0x16c   : > { %897 = vmatprep.mubr.f32.mxu1 %v5072_v60 }
 0x16e   : > { %v623_v7 = vpop.f32.mrb[38].mxu0 }
 0x16f   : > { %v625_v22 = vpop.f32.mrb[39].mxu0  ;;  %898 = vmatmul.mubr.f32.gmra.mrb[38].mxu1 %v623_v7 }
 0x170   : > { %903 = vmatprep.mubr.f32.mxu1 %v5072_v60 }
 0x172   : > { %v628_v49 = vpop.f32.mrb[40].mxu0 }
 0x173   : > { %v630_v3 = vpop.f32.mrb[41].mxu0  ;;  %904 = vmatmul.mubr.f32.gmra.mrb[40].mxu1 %v628_v49 }
 0x174   : > { %909 = vmatprep.mubr.f32.mxu1 %v5072_v60 }
 0x176   : > { %v633_v25 = vpop.f32.mrb[42].mxu0 }
 0x177   : > { %v635_v4 = vpop.f32.mrb[43].mxu0  ;;  %910 = vmatmul.mubr.f32.gmra.mrb[42].mxu1 %v633_v25 }
 0x178   : > { %915 = vmatprep.mubr.f32.mxu1 %v5072_v60 }
 0x17a   : > { %v638_v28 = vpop.f32.mrb[44].mxu0 }
 0x17b   : > { %v640_v6 = vpop.f32.mrb[45].mxu0  ;;  %916 = vmatmul.mubr.f32.gmra.mrb[44].mxu1 %v638_v28 }
 0x17c   : > { %921 = vmatprep.mubr.f32.mxu1 %v5072_v60 }
 0x17e   : > { %v643_v31 = vpop.f32.mrb[46].mxu0 }
 0x17f   : > { %v645_v56 = vpop.f32.mrb[47].mxu0  ;;  %922 = vmatmul.mubr.f32.gmra.mrb[46].mxu1 %v643_v31  ;;  %v1617_v31 = vld [vmem:[%s5013_s4] sm:$0xff] }
 0x180   : > { %927 = vmatprep.mubr.f32.mxu1 %v5072_v60  ;;  %v1618_v56 = vld [vmem:[%s5013_s4 + $0x8] sm:$0xff] }
 0x182   : > { %v648_v34 = vpop.f32.mrb[48].mxu0 }
 0x183   : > { %v650_v9 = vpop.f32.mrb[49].mxu0  ;;  %928 = vmatmul.mubr.f32.gmra.mrb[48].mxu1 %v648_v34 }
 0x184   : > { %933 = vmatprep.mubr.f32.mxu1 %v5072_v60 }
 0x186   : > { %v653_v37 = vpop.f32.mrb[50].mxu0 }
 0x187   : > { %v655_v59 = vpop.f32.mrb[51].mxu0  ;;  %934 = vmatmul.mubr.f32.gmra.mrb[50].mxu1 %v653_v37  ;;  %v3298_v37 = vpack.c.bf16 %v1618_v56, %v1617_v31 }
 0x188   : > { %939 = vmatprep.mubr.f32.mxu1 %v5072_v60 }
 0x189   : > { %3299 = vmatprep.subr.bf16.mxu0 %v3298_v37 }
 0x18a   : > { %v658_v40 = vpop.f32.mrb[52].mxu0  ;;  %3301 = vmatpush3.bf16.msra.mxu0 %v3298_v37 }
 0x18b   : > { %v660_v13 = vpop.f32.mrb[53].mxu0  ;;  %940 = vmatmul.mubr.f32.gmra.mrb[52].mxu1 %v658_v40 }
 0x18c   : > { %945 = vmatprep.mubr.f32.mxu1 %v5072_v60 }
 0x18e   : > { %v663_v0 = vpop.f32.mrb[54].mxu0 }
 0x18f   : > { %v665_v43 = vpop.f32.mrb[55].mxu0  ;;  %946 = vmatmul.mubr.f32.gmra.mrb[54].mxu1 %v663_v0  ;;  %v1621_v0 = vld [vmem:[%s5013_s4 + $0x20] sm:$0xff] }
 0x190   : > { %951 = vmatprep.mubr.f32.mxu1 %v5072_v60  ;;  %v1622_v43 = vld [vmem:[%s5013_s4 + $0x28] sm:$0xff] }
 0x192   : > { %v668_v16 = vpop.f32.mrb[56].mxu0 }
 0x193   : > { %v670_v1 = vpop.f32.mrb[57].mxu0  ;;  %952 = vmatmul.mubr.f32.gmra.mrb[56].mxu1 %v668_v16 }
 0x194   : > { %957 = vmatprep.mubr.f32.mxu1 %v5072_v60 }
 0x196   : > { %v673_v46 = vpop.f32.mrb[58].mxu0 }
 0x197   : > { %v675_v19 = vpop.f32.mrb[59].mxu0  ;;  %958 = vmatmul.mubr.f32.gmra.mrb[58].mxu1 %v673_v46 }
 0x198   : > { %963 = vmatprep.mubr.f32.mxu1 %v5072_v60 }
 0x19a   : > { %v678_v7 = vpop.f32.mrb[60].mxu0 }
 0x19b   : > { %v680_v22 = vpop.f32.mrb[61].mxu0  ;;  %964 = vmatmul.mubr.f32.gmra.mrb[60].mxu1 %v678_v7 }
 0x19c   : > { %969 = vmatprep.mubr.f32.mxu1 %v5072_v60  ;;  %v1619_v60 = vld [vmem:[%s5013_s4 + $0x10] sm:$0xff] }
 0x19e   : > { %v683_v49 = vpop.f32.mrb[62].mxu0 }
 0x19f   : > { %v685_v3 = vpop.f32.mrb[63].mxu0  ;;  %970 = vmatmul.mubr.f32.gmra.mrb[62].mxu1 %v683_v49 }
 0x1f6   : > { %v785_v25 = vpop.f32.mrb[0].mxu1 }
 0x1f7   : > { %v976_v4 = vsub.f32 %v3841_v50, %v785_v25  ;;  %v787_v28 = vpop.f32.mrb[1].mxu1  ;;  %v1620_v50 = vld [vmem:[%s5013_s4 + $0x18] sm:$0xff] }
 0x1f8   : > { %v977_v6 = vsub.f32 %v3713_v12, %v787_v28  ;;  %v3302_v13 = vpack.c.bf16 %v1620_v50, %v1619_v60 }
 0x1f9   : > { %v1040_v12 = vmul.f32 %v976_v4, %v976_v4 }
 0x1fa   : > { %v1041_v34 = vmul.f32 %v977_v6, %v977_v6  ;;  %v791_v9 = vpop.f32.mrb[2].mxu1  ;;  %3303 = vmatprep.subr.bf16.mxu0 %v3302_v13 }
 0x1fb   : > { %v978_v59 = vsub.f32 %v3880_v2, %v791_v9  ;;  %v793_v40 = vpop.f32.mrb[3].mxu1  ;;  %v3306_v2 = vpack.c.bf16 %v1622_v43, %v1621_v0  ;;  %3305 = vmatpush3.bf16.msra.mxu0 %v3302_v13 }
 0x1fc   : > { %v979_v16 = vsub.f32 %v3844_v51, %v793_v40  ;;  %1168 = vmatprep.mubr.f32.mxu1 %v1041_v34 }
 0x1fd   : > { %1169 = vmatmul.mubr.f32.vlgmr.msra.gmra.mrb[64].mxu1 %v1040_v12  ;;  %v1042_v19 = vmul.f32 %v978_v59, %v978_v59  ;;  %3307 = vmatprep.subr.bf16.mxu0 %v3306_v2 }
 0x1fe   : > { %v1043_v1 = vmul.f32 %v979_v16, %v979_v16  ;;  %v797_v46 = vpop.f32.mrb[4].mxu1 }
 0x1ff   : > { %v980_v7 = vsub.f32 %v3900_v17, %v797_v46  ;;  %v799_v22 = vpop.f32.mrb[5].mxu1  ;;  %3309 = vmatpush3.bf16.msra.mxu0 %v3306_v2 }
 0x200   : > { %v981_v49 = vsub.f32 %v3889_v10, %v799_v22  ;;  %1173 = vmatprep.mubr.f32.mxu1 %v1043_v1 }
 0x201   : > { %1174 = vmatmul.mubr.f32.gmra.mrb[66].mxu1 %v1042_v19  ;;  %v1044_v51 = vmul.f32 %v980_v7, %v980_v7 }
 0x202   : > { %v1045_v3 = vmul.f32 %v981_v49, %v981_v49  ;;  %v803_v25 = vpop.f32.mrb[6].mxu1 }
 0x203   : > { %v982_v4 = vsub.f32 %v3920_v29, %v803_v25  ;;  %v805_v28 = vpop.f32.mrb[7].mxu1 }
 0x204   : > { %v983_v6 = vsub.f32 %v3909_v23, %v805_v28  ;;  %1178 = vmatprep.mubr.f32.mxu1 %v1045_v3 }
 0x205   : > { %1179 = vmatmul.mubr.f32.gmra.mrb[68].mxu1 %v1044_v51  ;;  %v1046_v56 = vmul.f32 %v982_v4, %v982_v4 }
 0x206   : > { %v1047_v31 = vmul.f32 %v983_v6, %v983_v6  ;;  %v809_v17 = vpop.f32.mrb[8].mxu1 }
 0x207   : > { %v984_v10 = vsub.f32 %v3940_v41, %v809_v17  ;;  %v811_v60 = vpop.f32.mrb[9].mxu1 }
 0x208   : > { %v985_v34 = vsub.f32 %v3929_v35, %v811_v60  ;;  %1183 = vmatprep.mubr.f32.mxu1 %v1047_v31 }
 0x209   : > { %1184 = vmatmul.mubr.f32.gmra.mrb[70].mxu1 %v1046_v56  ;;  %v1048_v50 = vmul.f32 %v984_v10, %v984_v10 }
 0x20a   : > { %v1049_v9 = vmul.f32 %v985_v34, %v985_v34  ;;  %v815_v37 = vpop.f32.mrb[10].mxu1 }
 0x20b   : > { %v986_v29 = vsub.f32 %v3960_v54, %v815_v37  ;;  %v817_v12 = vpop.f32.mrb[11].mxu1 }
 0x20c   : > { %v987_v23 = vsub.f32 %v3949_v47, %v817_v12  ;;  %1188 = vmatprep.mubr.f32.mxu1 %v1049_v9 }
 0x20d   : > { %1189 = vmatmul.mubr.f32.gmra.mrb[72].mxu1 %v1048_v50  ;;  %v1050_v13 = vmul.f32 %v986_v29, %v986_v29 }
 0x20e   : > { %v1051_v59 = vmul.f32 %v987_v23, %v987_v23  ;;  %v821_v40 = vpop.f32.mrb[12].mxu1 }
 0x20f   : > { %v988_v41 = vsub.f32 %v3980_v62, %v821_v40  ;;  %v823_v0 = vpop.f32.mrb[13].mxu1 }
 0x210   : > { %v989_v35 = vsub.f32 %v3969_v58, %v823_v0  ;;  %1193 = vmatprep.mubr.f32.mxu1 %v1051_v59 }
 0x211   : > { %1194 = vmatmul.mubr.f32.gmra.mrb[74].mxu1 %v1050_v13  ;;  %v1052_v1 = vmul.f32 %v988_v41, %v988_v41 }
 0x212   : > { %v1053_v43 = vmul.f32 %v989_v35, %v989_v35  ;;  %v827_v16 = vpop.f32.mrb[14].mxu1 }
 0x213   : > { %v990_v54 = vsub.f32 %v3994_v8, %v827_v16  ;;  %v829_v46 = vpop.f32.mrb[15].mxu1 }
 0x214   : > { %v991_v47 = vsub.f32 %v3989_v5, %v829_v46  ;;  %1198 = vmatprep.mubr.f32.mxu1 %v1053_v43 }
 0x215   : > { %1199 = vmatmul.mubr.f32.gmra.mrb[76].mxu1 %v1052_v1  ;;  %v1054_v7 = vmul.f32 %v990_v54, %v990_v54 }
 0x216   : > { %v1055_v2 = vmul.f32 %v991_v47, %v991_v47  ;;  %v833_v19 = vpop.f32.mrb[16].mxu1 }
 0x217   : > { %v992_v62 = vsub.f32 %v4002_v14, %v833_v19  ;;  %v835_v22 = vpop.f32.mrb[17].mxu1 }
 0x218   : > { %v993_v58 = vsub.f32 %v3997_v11, %v835_v22  ;;  %1203 = vmatprep.mubr.f32.mxu1 %v1055_v2 }
 0x219   : > { %1204 = vmatmul.mubr.f32.gmra.mrb[78].mxu1 %v1054_v7  ;;  %v1056_v25 = vmul.f32 %v992_v62, %v992_v62 }
 0x21a   : > { %v1057_v49 = vmul.f32 %v993_v58, %v993_v58  ;;  %v839_v3 = vpop.f32.mrb[18].mxu1 }
 0x21b   : > { %v994_v8 = vsub.f32 %v4011_v18, %v839_v3  ;;  %v841_v51 = vpop.f32.mrb[19].mxu1 }
 0x21c   : > { %v995_v5 = vsub.f32 %v4006_v15, %v841_v51  ;;  %1208 = vmatprep.mubr.f32.mxu1 %v1057_v49 }
 0x21d   : > { %1209 = vmatmul.mubr.f32.gmra.mrb[80].mxu1 %v1056_v25  ;;  %v1058_v6 = vmul.f32 %v994_v8, %v994_v8 }
 0x21e   : > { %v1059_v4 = vmul.f32 %v995_v5, %v995_v5  ;;  %v845_v28 = vpop.f32.mrb[20].mxu1 }
 0x21f   : > { %v996_v14 = vsub.f32 %v4019_v21, %v845_v28  ;;  %v847_v31 = vpop.f32.mrb[21].mxu1  ;;  %v5074_v28 = vld [vmem:[#allocation2_spill] sm:$0xff] }
 0x220   : > { %v997_v11 = vsub.f32 %v4014_v20, %v847_v31  ;;  %1213 = vmatprep.mubr.f32.mxu1 %v1059_v4 }
 0x221   : > { %1214 = vmatmul.mubr.f32.gmra.mrb[82].mxu1 %v1058_v6  ;;  %v1060_v10 = vmul.f32 %v996_v14, %v996_v14 }
 0x222   : > { %v1061_v17 = vmul.f32 %v997_v11, %v997_v11  ;;  %v851_v56 = vpop.f32.mrb[22].mxu1  ;;  %v5075_v11 = vld [vmem:[#allocation4_spill] sm:$0xff] }
 0x223   : > { %v998_v18 = vsub.f32 %v4027_v26, %v851_v56  ;;  %v853_v60 = vpop.f32.mrb[23].mxu1  ;;  %v5076_v56 = vld [vmem:[#allocation3_spill] sm:$0xff] }
 0x224   : > { %v999_v15 = vsub.f32 %v4022_v24, %v853_v60  ;;  %1218 = vmatprep.mubr.f32.mxu1 %v1061_v17 }
 0x225   : > { %1219 = vmatmul.mubr.f32.gmra.mrb[84].mxu1 %v1060_v10  ;;  %v1062_v37 = vmul.f32 %v998_v18, %v998_v18 }
 0x226   : > { %v1063_v34 = vmul.f32 %v999_v15, %v999_v15  ;;  %v857_v9 = vpop.f32.mrb[24].mxu1  ;;  %v5077_v15 = vld [vmem:[#allocation6_spill] sm:$0xff] }
 0x227   : > { %v1000_v21 = vsub.f32 %v4035_v30, %v857_v9  ;;  %v859_v50 = vpop.f32.mrb[25].mxu1  ;;  %v5078_v9 = vld [vmem:[#allocation5_spill] sm:$0xff] }
 0x228   : > { %v1001_v20 = vsub.f32 %v4030_v27, %v859_v50  ;;  %1223 = vmatprep.mubr.f32.mxu1 %v1063_v34 }
 0x229   : > { %1224 = vmatmul.mubr.f32.gmra.mrb[86].mxu1 %v1062_v37  ;;  %v1064_v23 = vmul.f32 %v1000_v21, %v1000_v21 }
 0x22a   : > { %v1065_v29 = vmul.f32 %v1001_v20, %v1001_v20  ;;  %v863_v12 = vpop.f32.mrb[26].mxu1 }
 0x22b   : > { %v1002_v26 = vsub.f32 %v4043_v33, %v863_v12  ;;  %v865_v59 = vpop.f32.mrb[27].mxu1 }
 0x22c   : > { %v1003_v24 = vsub.f32 %v4038_v32, %v865_v59  ;;  %1228 = vmatprep.mubr.f32.mxu1 %v1065_v29  ;;  %v5079_v29 = vld [vmem:[#allocation8_spill] sm:$0xff]  ;;  %v1624_v59 = vld [vmem:[%s5013_s4 + $0x38] sm:$0xff] }
 0x22d   : > { %1229 = vmatmul.mubr.f32.gmra.mrb[88].mxu1 %v1064_v23  ;;  %v1066_v41 = vmul.f32 %v1002_v26, %v1002_v26  ;;  %v1623_v26 = vld [vmem:[%s5013_s4 + $0x30] sm:$0xff] }
 0x22e   : > { %v1067_v40 = vmul.f32 %v1003_v24, %v1003_v24  ;;  %v869_v13 = vpop.f32.mrb[28].mxu1  ;;  %v5080_v24 = vld [vmem:[#allocation7_spill] sm:$0xff] }
 0x22f   : > { %v1004_v30 = vsub.f32 %v4051_v38, %v869_v13  ;;  %v871_v0 = vpop.f32.mrb[29].mxu1  ;;  %v3310_v13 = vpack.c.bf16 %v1624_v59, %v1623_v26  ;;  %v5092_v59 = vld [vmem:[#allocation19_spill] sm:$0xff] }
 0x230   : > { %v1005_v27 = vsub.f32 %v4046_v36, %v871_v0  ;;  %1233 = vmatprep.mubr.f32.mxu1 %v1067_v40 }
 0x231   : > { %1234 = vmatmul.mubr.f32.gmra.mrb[90].mxu1 %v1066_v41  ;;  %v1068_v16 = vmul.f32 %v1004_v30, %v1004_v30  ;;  %3311 = vmatprep.subr.bf16.mxu0 %v3310_v13 }
 0x232   : > { %v1069_v35 = vmul.f32 %v1005_v27, %v1005_v27  ;;  %v875_v43 = vpop.f32.mrb[30].mxu1  ;;  %v5081_v27 = vld [vmem:[#allocation10_spill] sm:$0xff]  ;;  %3313 = vmatpush3.bf16.msra.mxu0 %v3310_v13 }
 0x233   : > { %v1006_v33 = vsub.f32 %v4059_v42, %v875_v43  ;;  %v877_v1 = vpop.f32.mrb[31].mxu1 }
 0x234   : > { %v1007_v32 = vsub.f32 %v4054_v39, %v877_v1  ;;  %1238 = vmatprep.mubr.f32.mxu1 %v1069_v35  ;;  %v5082_v1 = vld [vmem:[#allocation9_spill] sm:$0xff] }
 0x235   : > { %1239 = vmatmul.mubr.f32.gmra.mrb[92].mxu1 %v1068_v16  ;;  %v1070_v47 = vmul.f32 %v1006_v33, %v1006_v33  ;;  %v1625_v16 = vld [vmem:[%s5013_s4 + $0x40] sm:$0xff]  ;;  %v1626_v33 = vld [vmem:[%s5013_s4 + $0x48] sm:$0xff] }
 0x236   : > { %v1071_v54 = vmul.f32 %v1007_v32, %v1007_v32  ;;  %v881_v46 = vpop.f32.mrb[32].mxu1 }
 0x237   : > { %v1008_v38 = vsub.f32 %v4067_v45, %v881_v46  ;;  %v883_v2 = vpop.f32.mrb[33].mxu1 }
 0x238   : > { %v1009_v36 = vsub.f32 %v4062_v44, %v883_v2  ;;  %1243 = vmatprep.mubr.f32.mxu1 %v1071_v54  ;;  %v3314_v54 = vpack.c.bf16 %v1626_v33, %v1625_v16  ;;  %v5083_v2 = vld [vmem:[#allocation12_spill] sm:$0xff] }
 0x239   : > { %1244 = vmatmul.mubr.f32.gmra.mrb[94].mxu1 %v1070_v47  ;;  %v1072_v62 = vmul.f32 %v1008_v38, %v1008_v38 }
 0x23a   : > { %v1073_v19 = vmul.f32 %v1009_v36, %v1009_v36  ;;  %v887_v7 = vpop.f32.mrb[34].mxu1  ;;  %3315 = vmatprep.subr.bf16.mxu0 %v3314_v54 }
 0x23b   : > { %v1010_v42 = vsub.f32 %v4075_v52, %v887_v7  ;;  %v889_v22 = vpop.f32.mrb[35].mxu1  ;;  %3317 = vmatpush3.bf16.msra.mxu0 %v3314_v54  ;;  %v1627_v7 = vld [vmem:[%s5013_s4 + $0x50] sm:$0xff] }
 0x23c   : > { %v1011_v39 = vsub.f32 %v4070_v48, %v889_v22  ;;  %1248 = vmatprep.mubr.f32.mxu1 %v1073_v19 }
 0x23d   : > { %1249 = vmatmul.mubr.f32.gmra.mrb[96].mxu1 %v1072_v62  ;;  %v1074_v3 = vmul.f32 %v1010_v42, %v1010_v42  ;;  %v1628_v62 = vld [vmem:[%s5013_s4 + $0x58] sm:$0xff]  ;;  %v5084_v42 = vld [vmem:[#allocation11_spill] sm:$0xff] }
 0x23e   : > { %v1075_v58 = vmul.f32 %v1011_v39, %v1011_v39  ;;  %v893_v49 = vpop.f32.mrb[36].mxu1  ;;  %v3318_v39 = vpack.c.bf16 %v1628_v62, %v1627_v7 }
 0x23f   : > { %v1012_v45 = vsub.f32 %v4083_v55, %v893_v49  ;;  %v895_v25 = vpop.f32.mrb[37].mxu1 }
 0x240   : > { %v1013_v44 = vsub.f32 %v4078_v53, %v895_v25  ;;  %1253 = vmatprep.mubr.f32.mxu1 %v1075_v58  ;;  %3319 = vmatprep.subr.bf16.mxu0 %v3318_v39 }
 0x241   : > { %1254 = vmatmul.mubr.f32.gmra.mrb[98].mxu1 %v1074_v3  ;;  %v1076_v5 = vmul.f32 %v1012_v45, %v1012_v45  ;;  %v5085_v45 = vld [vmem:[#allocation14_spill] sm:$0xff]  ;;  %3321 = vmatpush3.bf16.msra.mxu0 %v3318_v39 }
 0x242   : > { %v1077_v8 = vmul.f32 %v1013_v44, %v1013_v44  ;;  %v899_v51 = vpop.f32.mrb[38].mxu1 }
 0x243   : > { %v1014_v52 = vsub.f32 %v4091_v57, %v899_v51  ;;  %v901_v4 = vpop.f32.mrb[39].mxu1  ;;  %v1630_v51 = vld [vmem:[%s5013_s4 + $0x68] sm:$0xff] }
 0x244   : > { %v1015_v48 = vsub.f32 %v5074_v28, %v901_v4  ;;  %1258 = vmatprep.mubr.f32.mxu1 %v1077_v8  ;;  %v1629_v8 = vld [vmem:[%s5013_s4 + $0x60] sm:$0xff] }
 0x245   : > { %1259 = vmatmul.mubr.f32.gmra.mrb[100].mxu1 %v1076_v5  ;;  %v1078_v31 = vmul.f32 %v1014_v52, %v1014_v52  ;;  %v5086_v5 = vld [vmem:[#allocation13_spill] sm:$0xff]  ;;  %v3322_v4 = vpack.c.bf16 %v1630_v51, %v1629_v8 }
 0x246   : > { %v1079_v6 = vmul.f32 %v1015_v48, %v1015_v48  ;;  %v905_v14 = vpop.f32.mrb[40].mxu1 }
 0x247   : > { %v1016_v55 = vsub.f32 %v5075_v11, %v905_v14  ;;  %v907_v17 = vpop.f32.mrb[41].mxu1  ;;  %3323 = vmatprep.subr.bf16.mxu0 %v3322_v4  ;;  %v5087_v14 = vld [vmem:[#allocation16_spill] sm:$0xff] }
 0x248   : > { %v1017_v53 = vsub.f32 %v5076_v56, %v907_v17  ;;  %1263 = vmatprep.mubr.f32.mxu1 %v1079_v6  ;;  %3325 = vmatpush3.bf16.msra.mxu0 %v3322_v4  ;;  %v1632_v17 = vld [vmem:[%s5013_s4 + $0x78] sm:$0xff]  ;;  %v5088_v56 = vld [vmem:[#allocation15_spill] sm:$0xff] }
 0x249   : > { %1264 = vmatmul.mubr.f32.gmra.mrb[102].mxu1 %v1078_v31  ;;  %v1080_v60 = vmul.f32 %v1016_v55, %v1016_v55  ;;  %v1631_v55 = vld [vmem:[%s5013_s4 + $0x70] sm:$0xff] }
 0x24a   : > { %v1081_v10 = vmul.f32 %v1017_v53, %v1017_v53  ;;  %v911_v18 = vpop.f32.mrb[42].mxu1 }
 0x24b   : > { %v1018_v57 = vsub.f32 %v5077_v15, %v911_v18  ;;  %v913_v34 = vpop.f32.mrb[43].mxu1 }
 0x24c   : > { %v1019_v37 = vsub.f32 %v5078_v9, %v913_v34  ;;  %1268 = vmatprep.mubr.f32.mxu1 %v1081_v10  ;;  %v3326_v10 = vpack.c.bf16 %v1632_v17, %v1631_v55  ;;  %v1585_v55 = vld [vmem:[%s5012_s3] sm:$0xff]  ;;  %v1586_v17 = vld [vmem:[%s5012_s3 + $0x8] sm:$0xff] }
 0x24d   : > { %1269 = vmatmul.mubr.f32.gmra.mrb[104].mxu1 %v1080_v60  ;;  %v1082_v20 = vmul.f32 %v1018_v57, %v1018_v57  ;;  %v5089_v57 = vld [vmem:[#allocation18_spill] sm:$0xff] }
 0x24e   : > { %v1083_v21 = vmul.f32 %v1019_v37, %v1019_v37  ;;  %v917_v50 = vpop.f32.mrb[44].mxu1  ;;  %3327 = vmatprep.subr.bf16.mxu0 %v3326_v10  ;;  %v5090_v37 = vld [vmem:[#allocation17_spill] sm:$0xff] }
 0x24f   : > { %v1020_v12 = vsub.f32 %v5079_v29, %v917_v50  ;;  %v919_v23 = vpop.f32.mrb[45].mxu1  ;;  %3329 = vmatpush3.bf16.msra.mxu0 %v3326_v10 }
 0x250   : > { %v1021_v40 = vsub.f32 %v5080_v24, %v919_v23  ;;  %1273 = vmatprep.mubr.f32.mxu1 %v1083_v21  ;;  %3330 = vmatprep.subr.bf16.mxu0 %v5073_v61 }
 0x251   : > { %1274 = vmatmul.mubr.f32.gmra.mrb[106].mxu1 %v1082_v20  ;;  %v1084_v0 = vmul.f32 %v1020_v12, %v1020_v12  ;;  %v5091_v12 = vld [vmem:[#allocation20_spill] sm:$0xff] }
 0x252   : > { %v1085_v41 = vmul.f32 %v1021_v40, %v1021_v40  ;;  %v923_v30 = vpop.f32.mrb[46].mxu1 }
 0x253   : > { %v1022_v35 = vsub.f32 %v5081_v27, %v923_v30  ;;  %v925_v43 = vpop.f32.mrb[47].mxu1  ;;  %v5093_v30 = vld [vmem:[#allocation22_spill] sm:$0xff] }
 0x254   : > { %v1023_v32 = vsub.f32 %v5082_v1, %v925_v43  ;;  %1278 = vmatprep.mubr.f32.mxu1 %v1085_v41 }
 0x255   : > { %1279 = vmatmul.mubr.f32.gmra.mrb[108].mxu1 %v1084_v0  ;;  %v1086_v38 = vmul.f32 %v1022_v35, %v1022_v35  ;;  %v5094_v35 = vld [vmem:[#allocation21_spill] sm:$0xff] }
 0x256   : > { %v1087_v46 = vmul.f32 %v1023_v32, %v1023_v32  ;;  %v929_v47 = vpop.f32.mrb[48].mxu1 }
 0x257   : > { %v1024_v36 = vsub.f32 %v5083_v2, %v929_v47  ;;  %v931_v19 = vpop.f32.mrb[49].mxu1 }
 0x258   : > { %v1025_v22 = vsub.f32 %v5084_v42, %v931_v19  ;;  %1283 = vmatprep.mubr.f32.mxu1 %v1087_v46  ;;  %v5095_v46 = vld [vmem:[#allocation23_spill] sm:$0xff]  ;;  %v5096_v19 = vld [vmem:[#allocation25_spill] sm:$0xff]  ;;  %v5097_v42 = vld [vmem:[#allocation24_spill] sm:$0xff] }
 0x259   : > { %1284 = vmatmul.mubr.f32.gmra.mrb[110].mxu1 %v1086_v38  ;;  %v1088_v3 = vmul.f32 %v1024_v36, %v1024_v36 }
 0x25a   : > { %v1089_v58 = vmul.f32 %v1025_v22, %v1025_v22  ;;  %v935_v49 = vpop.f32.mrb[50].mxu1 }
 0x25b   : > { %v1026_v25 = vsub.f32 %v5085_v45, %v935_v49  ;;  %v937_v44 = vpop.f32.mrb[51].mxu1 }
 0x25c   : > { %v1027_v52 = vsub.f32 %v5086_v5, %v937_v44  ;;  %1288 = vmatprep.mubr.f32.mxu1 %v1089_v58 }
 0x25d   : > { %1289 = vmatmul.mubr.f32.gmra.mrb[112].mxu1 %v1088_v3  ;;  %v1090_v6 = vmul.f32 %v1026_v25, %v1026_v25 }
 0x25e   : > { %v1091_v28 = vmul.f32 %v1027_v52, %v1027_v52  ;;  %v941_v48 = vpop.f32.mrb[52].mxu1 }
 0x25f   : > { %v1028_v31 = vsub.f32 %v5087_v14, %v941_v48  ;;  %v943_v11 = vpop.f32.mrb[53].mxu1 }
 0x260   : > { %v1029_v53 = vsub.f32 %v5088_v56, %v943_v11  ;;  %1293 = vmatprep.mubr.f32.mxu1 %v1091_v28 }
 0x261   : > { %1294 = vmatmul.mubr.f32.gmra.mrb[114].mxu1 %v1090_v6  ;;  %v1092_v15 = vmul.f32 %v1028_v31, %v1028_v31 }
 0x262   : > { %v1093_v18 = vmul.f32 %v1029_v53, %v1029_v53  ;;  %v947_v60 = vpop.f32.mrb[54].mxu1 }
 0x263   : > { %v1030_v34 = vsub.f32 %v5089_v57, %v947_v60  ;;  %v949_v9 = vpop.f32.mrb[55].mxu1  ;;  %v3331_v57 = vpack.c.bf16 %v1586_v17, %v1585_v55 }
 0x264   : > { %v1031_v21 = vsub.f32 %v5090_v37, %v949_v9  ;;  %1298 = vmatprep.mubr.f32.mxu1 %v1093_v18  ;;  %v1587_v37 = vld [vmem:[%s5012_s3 + $0x10] sm:$0xff] }
 0x265   : > { %1299 = vmatmul.mubr.f32.gmra.mrb[116].mxu1 %v1092_v15  ;;  %v1094_v29 = vmul.f32 %v1030_v34, %v1030_v34 }
 0x266   : > { %v1095_v50 = vmul.f32 %v1031_v21, %v1031_v21  ;;  %v953_v20 = vpop.f32.mrb[56].mxu1  ;;  %v1588_v21 = vld [vmem:[%s5012_s3 + $0x18] sm:$0xff] }
 0x267   : > { %v1032_v23 = vsub.f32 %v5091_v12, %v953_v20  ;;  %v955_v26 = vpop.f32.mrb[57].mxu1 }
 0x268   : > { %v1033_v24 = vsub.f32 %v5092_v59, %v955_v26  ;;  %1303 = vmatprep.mubr.f32.mxu1 %v1095_v50  ;;  %v3334_v59 = vpack.c.bf16 %v1588_v21, %v1587_v37 }
 0x269   : > { %1304 = vmatmul.mubr.f32.gmra.mrb[118].mxu1 %v1094_v29  ;;  %v1096_v41 = vmul.f32 %v1032_v23, %v1032_v23 }
 0x26a   : > { %v1097_v40 = vmul.f32 %v1033_v24, %v1033_v24  ;;  %v959_v13 = vpop.f32.mrb[58].mxu1 }
 0x26b   : > { %v1034_v0 = vsub.f32 %v5093_v30, %v959_v13  ;;  %v961_v27 = vpop.f32.mrb[59].mxu1  ;;  %v1589_v13 = vld [vmem:[%s5012_s3 + $0x20] sm:$0xff] }
 0x26c   : > { %v1035_v43 = vsub.f32 %v5094_v35, %v961_v27  ;;  %1308 = vmatprep.mubr.f32.mxu1 %v1097_v40 }
 0x26d   : > { %1309 = vmatmul.mubr.f32.gmra.mrb[120].mxu1 %v1096_v41  ;;  %v1098_v1 = vmul.f32 %v1034_v0, %v1034_v0  ;;  %v1590_v41 = vld [vmem:[%s5012_s3 + $0x28] sm:$0xff] }
 0x26e   : > { %v1099_v16 = vmul.f32 %v1035_v43, %v1035_v43  ;;  %v965_v33 = vpop.f32.mrb[60].mxu1 }
 0x26f   : > { %v1036_v32 = vsub.f32 %v4180_v63, %v965_v33  ;;  %v967_v54 = vpop.f32.mrb[61].mxu1  ;;  %v3337_v33 = vpack.c.bf16 %v1590_v41, %v1589_v13 }
 0x270   : > { %v1037_v47 = vsub.f32 %v5095_v46, %v967_v54  ;;  %1313 = vmatprep.mubr.f32.mxu1 %v1099_v16  ;;  %v1591_v54 = vld [vmem:[%s5012_s3 + $0x30] sm:$0xff]  ;;  %v1592_v46 = vld [vmem:[%s5012_s3 + $0x38] sm:$0xff] }
 0x271   : > { %1314 = vmatmul.mubr.f32.gmra.mrb[122].mxu1 %v1098_v1  ;;  %v1100_v36 = vmul.f32 %v1036_v32, %v1036_v32 }
 0x272   : > { %v1101_v38 = vmul.f32 %v1037_v47, %v1037_v47  ;;  %v971_v2 = vpop.f32.mrb[62].mxu1 }
 0x273   : > { %v1038_v7 = vsub.f32 %v5096_v19, %v971_v2  ;;  %v973_v62 = vpop.f32.mrb[63].mxu1 }
 0x274   : > { %v1039_v22 = vsub.f32 %v5097_v42, %v973_v62  ;;  %1318 = vmatprep.mubr.f32.mxu1 %v1101_v38  ;;  %v3340_v62 = vpack.c.bf16 %v1592_v46, %v1591_v54 }
 0x275   : > { %1319 = vmatmul.mubr.f32.gmra.mrb[124].mxu1 %v1100_v36  ;;  %v1102_v58 = vmul.f32 %v1038_v7, %v1038_v7 }
 0x276   : > { %v1103_v39 = vmul.f32 %v1039_v22, %v1039_v22 }
 0x278   : > { %1323 = vmatprep.mubr.f32.mxu1 %v1103_v39  ;;  %v1593_v39 = vld [vmem:[%s5012_s3 + $0x40] sm:$0xff] }
 0x279   : > { %1324 = vmatmul.mubr.f32.gmra.mrb[126].mxu1 %v1102_v58  ;;  %v1594_v58 = vld [vmem:[%s5012_s3 + $0x48] sm:$0xff] }
 0x2d0   : > { %v1170_v63 = vpop.f32.mrb[64].mxu1 }
 0x2d1   : > { %v1329_v49 = vmax.f32 %v1170_v63, 0.0  ;;  %v1172_v3 = vpop.f32.mrb[65].mxu1 }
 0x2d3   : > { %3468 = vrsqrt.f32 %v1329_v49  ;;  %vm1363_vm0 = vcmp.eq.f32.partialorder %v1329_v49, inf  ;;  %v1366_v14 = vand.u32 2147483648, %v1329_v49  ;;  %vm1365_vm1 = vcmp.eq.f32.partialorder %v1329_v49, 0.0 }
 0x2d4   : > { %v1175_v45 = vpop.f32.mrb[66].mxu1 }
 0x2d5   : > { %v1330_v25 = vmax.f32 %v1175_v45, 0.0  ;;  %v1177_v44 = vpop.f32.mrb[67].mxu1 }
 0x2d7   : > { %3470 = vrsqrt.f32 %v1330_v25  ;;  %vm1370_vm2 = vcmp.eq.f32.partialorder %v1330_v25, inf  ;;  %v1373_v15 = vand.u32 2147483648, %v1330_v25  ;;  %vm1372_vm3 = vcmp.eq.f32.partialorder %v1330_v25, 0.0 }
 0x2d8   : > { %v1180_v8 = vpop.f32.mrb[68].mxu1 }
 0x2d9   : > { %v1331_v51 = vmax.f32 %v1180_v8, 0.0  ;;  %v1182_v5 = vpop.f32.mrb[69].mxu1  ;;  %v3343_v8 = vpack.c.bf16 %v1594_v58, %v1593_v39 }
 0x2db   : > { %3472 = vrsqrt.f32 %v1331_v51  ;;  %vm1377_vm4 = vcmp.eq.f32.partialorder %v1331_v51, inf  ;;  %v1380_v26 = vand.u32 2147483648, %v1331_v51  ;;  %vm1379_vm5 = vcmp.eq.f32.partialorder %v1331_v51, 0.0 }
 0x2dc   : > { %v1185_v52 = vpop.f32.mrb[70].mxu1 }
 0x2dd   : > { %v3469_v4 = vpop.eup %3468  ;;  %v4366_v28 = vmax.f32 %v1185_v52, 0.0  ;;  %v1187_v48 = vpop.f32.mrb[71].mxu1  ;;  %v1595_v52 = vld [vmem:[%s5012_s3 + $0x50] sm:$0xff] }
 0x2de   : > { %v1362_v6 = vmul.f32 %v3469_v4, %v1329_v49  ;;  %v1596_v4 = vld [vmem:[%s5012_s3 + $0x58] sm:$0xff] }
 0x2df   : > { %3474 = vrsqrt.f32 %v4366_v28  ;;  %vm1384_vm6 = vcmp.eq.f32.partialorder %v4366_v28, inf  ;;  %v1387_v16 = vand.u32 2147483648, %v4366_v28  ;;  %vm1386_vm7 = vcmp.eq.f32.partialorder %v4366_v28, 0.0 }
 0x2e0   : > { %v1190_v31 = vpop.f32.mrb[72].mxu1  ;;  %v1364_v11 = vsel %vm1363_vm0, %v1329_v49, %v1362_v6  ;;  %v3346_v55 = vpack.c.bf16 %v1596_v4, %v1595_v52 }
 0x2e1   : > { %v3471_v56 = vpop.eup %3470  ;;  %v4375_v53 = vmax.f32 %v1190_v31, 0.0  ;;  %v1192_v10 = vpop.f32.mrb[73].mxu1  ;;  %v1367_v18 = vsel %vm1365_vm1, %v1366_v14, %v1364_v11 }
 0x2e2   : > { %2962 = vmatprep.mubr.f32.mxu0 %v1367_v18  ;;  %v1369_v60 = vmul.f32 %v3471_v56, %v1330_v25  ;;  %v1598_v10 = vld [vmem:[%s5012_s3 + $0x68] sm:$0xff] }
 0x2e3   : > { %3476 = vrsqrt.f32 %v4375_v53  ;;  %vm1391_vm8 = vcmp.eq.f32.partialorder %v4375_v53, inf  ;;  %v1394_v7 = vand.u32 2147483648, %v4375_v53  ;;  %vm1393_vm9 = vcmp.eq.f32.partialorder %v4375_v53, 0.0 }
 0x2e4   : > { %v1195_v34 = vpop.f32.mrb[74].mxu1  ;;  %v1371_v9 = vsel %vm1370_vm2, %v1330_v25, %v1369_v60 }
 0x2e5   : > { %v3473_v50 = vpop.eup %3472  ;;  %v4384_v20 = vmax.f32 %v1195_v34, 0.0  ;;  %v1197_v29 = vpop.f32.mrb[75].mxu1  ;;  %v1374_v12 = vsel %vm1372_vm3, %v1373_v15, %v1371_v9 }
 0x2e6   : > { %2963 = vmatmul.mubr.f32.vlgmr.msra.gmra.mrb[64].mxu0 %v1374_v12  ;;  %v1376_v23 = vmul.f32 %v3473_v50, %v1331_v51  ;;  %v1600_v29 = vld [vmem:[%s5012_s3 + $0x78] sm:$0xff] }
 0x2e7   : > { %3478 = vrsqrt.f32 %v4384_v20  ;;  %3332 = vmatpush1.bf16.msra.mxu0 %v3331_v57  ;;  %vm1398_vm10 = vcmp.eq.f32.partialorder %v4384_v20, inf  ;;  %v1401_v44 = vand.u32 2147483648, %v4384_v20  ;;  %vm1400_vm11 = vcmp.eq.f32.partialorder %v4384_v20, 0.0 }
 0x2e8   : > { %v1200_v24 = vpop.f32.mrb[76].mxu1  ;;  %v1378_v40 = vsel %vm1377_vm4, %v1331_v51, %v1376_v23  ;;  %3333 = vmatprep.subr.bf16.mxu0 %v5073_v61 }
 0x2e9   : > { %v3475_v30 = vpop.eup %3474  ;;  %v4394_v0 = vmax.f32 %v1200_v24, 0.0  ;;  %v1202_v27 = vpop.f32.mrb[77].mxu1  ;;  %v1381_v35 = vsel %vm1379_vm5, %v1380_v26, %v1378_v40 }
 0x2ea   : > { %2965 = vmatprep.mubr.f32.mxu0 %v1381_v35  ;;  %v1383_v43 = vmul.f32 %v3475_v30, %v4366_v28  ;;  %v1602_v27 = vld [vmem:[%s5012_s3 + $0x88] sm:$0xff] }
 0x2eb   : > { %3480 = vrsqrt.f32 %v4394_v0  ;;  %3335 = vmatpush1.bf16.msra.mxu0 %v3334_v59  ;;  %vm1405_vm12 = vcmp.eq.f32.partialorder %v4394_v0, inf  ;;  %v1408_v11 = vand.u32 2147483648, %v4394_v0  ;;  %vm1407_vm13 = vcmp.eq.f32.partialorder %v4394_v0, 0.0 }
 0x2ec   : > { %v1205_v1 = vpop.f32.mrb[78].mxu1  ;;  %v1385_v32 = vsel %vm1384_vm6, %v4366_v28, %v1383_v43  ;;  %3336 = vmatprep.subr.bf16.mxu0 %v5073_v61 }
 0x2ed   : > { %v3477_v47 = vpop.eup %3476  ;;  %v4409_v38 = vmax.f32 %v1205_v1, 0.0  ;;  %v1207_v2 = vpop.f32.mrb[79].mxu1  ;;  %v1388_v36 = vsel %vm1386_vm7, %v1387_v16, %v1385_v32 }
 0x2ee   : > { %2966 = vmatmul.mubr.f32.gmra.mrb[66].mxu0 %v1388_v36  ;;  %v1390_v19 = vmul.f32 %v3477_v47, %v4375_v53  ;;  %v1604_v2 = vld [vmem:[%s5012_s3 + $0x98] sm:$0xff] }
 0x2ef   : > { %3482 = vrsqrt.f32 %v4409_v38  ;;  %3338 = vmatpush1.bf16.msra.mxu0 %v3337_v33  ;;  %vm1412_vm14 = vcmp.eq.f32.partialorder %v4409_v38, inf  ;;  %v1415_v9 = vand.u32 2147483648, %v4409_v38  ;;  %vm1414_vm15 = vcmp.eq.f32.partialorder %v4409_v38, 0.0 }
 0x2f0   : > { %v1210_v42 = vpop.f32.mrb[80].mxu1  ;;  %v1392_v22 = vsel %vm1391_vm8, %v4375_v53, %v1390_v19  ;;  %3339 = vmatprep.subr.bf16.mxu0 %v5073_v61  ;;  %v1597_v53 = vld [vmem:[%s5012_s3 + $0x60] sm:$0xff] }
 0x2f1   : > { %v3479_v63 = vpop.eup %3478  ;;  %v4424_v49 = vmax.f32 %v1210_v42, 0.0  ;;  %v1212_v3 = vpop.f32.mrb[81].mxu1  ;;  %v1395_v45 = vsel %vm1393_vm9, %v1394_v7, %v1392_v22  ;;  %v3349_v37 = vpack.c.bf16 %v1598_v10, %v1597_v53 }
 0x2f2   : > { %2968 = vmatprep.mubr.f32.mxu0 %v1395_v45  ;;  %v1397_v25 = vmul.f32 %v3479_v63, %v4384_v20  ;;  %v1606_v3 = vld [vmem:[%s5012_s3 + $0xa8] sm:$0xff] }
 0x2f3   : > { %3484 = vrsqrt.f32 %v4424_v49  ;;  %3341 = vmatpush1.bf16.msra.mxu0 %v3340_v62  ;;  %vm1419_vm0 = vcmp.eq.f32.partialorder %v4424_v49, inf  ;;  %v1422_v40 = vand.u32 2147483648, %v4424_v49  ;;  %vm1421_vm1 = vcmp.eq.f32.partialorder %v4424_v49, 0.0 }
 0x2f4   : > { %v1215_v51 = vpop.f32.mrb[82].mxu1  ;;  %v1399_v5 = vsel %vm1398_vm10, %v4384_v20, %v1397_v25  ;;  %3342 = vmatprep.subr.bf16.mxu0 %v5073_v61  ;;  %v1599_v20 = vld [vmem:[%s5012_s3 + $0x70] sm:$0xff] }
 0x2f5   : > { %v3481_v28 = vpop.eup %3480  ;;  %v4439_v48 = vmax.f32 %v1215_v51, 0.0  ;;  %v1217_v6 = vpop.f32.mrb[83].mxu1  ;;  %v1402_v14 = vsel %vm1400_vm11, %v1401_v44, %v1399_v5  ;;  %v3352_v13 = vpack.c.bf16 %v1600_v29, %v1599_v20 }
 0x2f6   : > { %2969 = vmatmul.mubr.f32.gmra.mrb[68].mxu0 %v1402_v14  ;;  %v1404_v31 = vmul.f32 %v3481_v28, %v4394_v0  ;;  %v1608_v6 = vld [vmem:[%s5012_s3 + $0xb8] sm:$0xff] }
 0x2f7   : > { %3486 = vrsqrt.f32 %v4439_v48  ;;  %3344 = vmatpush1.bf16.msra.mxu0 %v3343_v8  ;;  %vm1426_vm2 = vcmp.eq.f32.partialorder %v4439_v48, inf  ;;  %v1429_v32 = vand.u32 2147483648, %v4439_v48  ;;  %vm1428_vm3 = vcmp.eq.f32.partialorder %v4439_v48, 0.0 }
 0x2f8   : > { %v1220_v17 = vpop.f32.mrb[84].mxu1  ;;  %v1406_v56 = vsel %vm1405_vm12, %v4394_v0, %v1404_v31  ;;  %3345 = vmatprep.subr.bf16.mxu0 %v5073_v61  ;;  %v1601_v0 = vld [vmem:[%s5012_s3 + $0x80] sm:$0xff] }
 0x2f9   : > { %v3483_v18 = vpop.eup %3482  ;;  %v4454_v60 = vmax.f32 %v1220_v17, 0.0  ;;  %v1222_v15 = vpop.f32.mrb[85].mxu1  ;;  %v1409_v57 = vsel %vm1407_vm13, %v1408_v11, %v1406_v56  ;;  %v3355_v54 = vpack.c.bf16 %v1602_v27, %v1601_v0 }
 0x2fa   : > { %2971 = vmatprep.mubr.f32.mxu0 %v1409_v57  ;;  %v1411_v34 = vmul.f32 %v3483_v18, %v4409_v38  ;;  %v1610_v15 = vld [vmem:[%s5012_s3 + $0xc8] sm:$0xff] }
 0x2fb   : > { %3488 = vrsqrt.f32 %v4454_v60  ;;  %3347 = vmatpush1.bf16.msra.mxu0 %v3346_v55  ;;  %vm1433_vm4 = vcmp.eq.f32.partialorder %v4454_v60, inf  ;;  %v1436_v22 = vand.u32 2147483648, %v4454_v60  ;;  %vm1435_vm5 = vcmp.eq.f32.partialorder %v4454_v60, 0.0 }
 0x2fc   : > { %v1225_v21 = vpop.f32.mrb[86].mxu1  ;;  %v1413_v50 = vsel %vm1412_vm14, %v4409_v38, %v1411_v34  ;;  %3348 = vmatprep.subr.bf16.mxu0 %v5073_v61  ;;  %v1603_v38 = vld [vmem:[%s5012_s3 + $0x90] sm:$0xff] }
 0x2fd   : > { %v3485_v12 = vpop.eup %3484  ;;  %v4469_v23 = vmax.f32 %v1225_v21, 0.0  ;;  %v1227_v26 = vpop.f32.mrb[87].mxu1  ;;  %v1416_v59 = vsel %vm1414_vm15, %v1415_v9, %v1413_v50  ;;  %v3358_v39 = vpack.c.bf16 %v1604_v2, %v1603_v38 }
 0x2fe   : > { %2972 = vmatmul.mubr.f32.gmra.mrb[70].mxu0 %v1416_v59  ;;  %v1418_v24 = vmul.f32 %v3485_v12, %v4424_v49  ;;  %v1612_v26 = vld [vmem:[%s5012_s3 + $0xd8] sm:$0xff] }
 0x2ff   : > { %3490 = vrsqrt.f32 %v4469_v23  ;;  %3350 = vmatpush1.bf16.msra.mxu0 %v3349_v37  ;;  %vm1440_vm6 = vcmp.eq.f32.partialorder %v4469_v23, inf  ;;  %v1443_v5 = vand.u32 2147483648, %v4469_v23  ;;  %vm1442_vm7 = vcmp.eq.f32.partialorder %v4469_v23, 0.0 }
 0x300   : > { %v1230_v41 = vpop.f32.mrb[88].mxu1  ;;  %v1420_v30 = vsel %vm1419_vm0, %v4424_v49, %v1418_v24  ;;  %3351 = vmatprep.subr.bf16.mxu0 %v5073_v61  ;;  %v1605_v49 = vld [vmem:[%s5012_s3 + $0xa0] sm:$0xff] }
 0x301   : > { %v3487_v35 = vpop.eup %3486  ;;  %v4484_v43 = vmax.f32 %v1230_v41, 0.0  ;;  %v1232_v16 = vpop.f32.mrb[89].mxu1  ;;  %v1423_v33 = vsel %vm1421_vm1, %v1422_v40, %v1420_v30  ;;  %v3361_v52 = vpack.c.bf16 %v1606_v3, %v1605_v49 }
 0x302   : > { %2974 = vmatprep.mubr.f32.mxu0 %v1423_v33  ;;  %v1425_v1 = vmul.f32 %v3487_v35, %v4439_v48  ;;  %v1614_v16 = vld [vmem:[%s5012_s3 + $0xe8] sm:$0xff] }
 0x303   : > { %3492 = vrsqrt.f32 %v4484_v43  ;;  %3353 = vmatpush1.bf16.msra.mxu0 %v3352_v13  ;;  %vm1447_vm8 = vcmp.eq.f32.partialorder %v4484_v43, inf  ;;  %v1450_v56 = vand.u32 2147483648, %v4484_v43  ;;  %vm1449_vm9 = vcmp.eq.f32.partialorder %v4484_v43, 0.0 }
 0x304   : > { %v1235_v46 = vpop.f32.mrb[90].mxu1  ;;  %v1427_v47 = vsel %vm1426_vm2, %v4439_v48, %v1425_v1  ;;  %3354 = vmatprep.subr.bf16.mxu0 %v5073_v61  ;;  %v1607_v48 = vld [vmem:[%s5012_s3 + $0xb0] sm:$0xff] }
 0x305   : > { %v3489_v36 = vpop.eup %3488  ;;  %v4499_v19 = vmax.f32 %v1235_v46, 0.0  ;;  %v1237_v7 = vpop.f32.mrb[91].mxu1  ;;  %v1430_v62 = vsel %vm1428_vm3, %v1429_v32, %v1427_v47  ;;  %v3364_v53 = vpack.c.bf16 %v1608_v6, %v1607_v48 }
 0x306   : > { %2975 = vmatmul.mubr.f32.gmra.mrb[72].mxu0 %v1430_v62  ;;  %v1432_v42 = vmul.f32 %v3489_v36, %v4454_v60  ;;  %v1616_v7 = vld [vmem:[%s5012_s3 + $0xf8] sm:$0xff] }
 0x307   : > { %3494 = vrsqrt.f32 %v4499_v19  ;;  %3356 = vmatpush1.bf16.msra.mxu0 %v3355_v54  ;;  %vm1454_vm10 = vcmp.eq.f32.partialorder %v4499_v19, inf  ;;  %v1457_v50 = vand.u32 2147483648, %v4499_v19  ;;  %vm1456_vm11 = vcmp.eq.f32.partialorder %v4499_v19, 0.0 }
 0x308   : > { %v1240_v58 = vpop.f32.mrb[92].mxu1  ;;  %v1434_v63 = vsel %vm1433_vm4, %v4454_v60, %v1432_v42  ;;  %3357 = vmatprep.subr.bf16.mxu0 %v5073_v61  ;;  %v1609_v60 = vld [vmem:[%s5012_s3 + $0xc0] sm:$0xff] }
 0x309   : > { %v3491_v45 = vpop.eup %3490  ;;  %v4514_v25 = vmax.f32 %v1240_v58, 0.0  ;;  %v1242_v44 = vpop.f32.mrb[93].mxu1  ;;  %v1437_v8 = vsel %vm1435_vm5, %v1436_v22, %v1434_v63  ;;  %v3367_v20 = vpack.c.bf16 %v1610_v15, %v1609_v60 }
 0x30a   : > { %2977 = vmatprep.mubr.f32.mxu0 %v1437_v8  ;;  %v1439_v51 = vmul.f32 %v3491_v45, %v4469_v23 }
 0x30b   : > { %3496 = vrsqrt.f32 %v4514_v25  ;;  %3359 = vmatpush1.bf16.msra.mxu0 %v3358_v39  ;;  %vm1461_vm12 = vcmp.eq.f32.partialorder %v4514_v25, inf  ;;  %v1464_v30 = vand.u32 2147483648, %v4514_v25  ;;  %vm1463_vm13 = vcmp.eq.f32.partialorder %v4514_v25, 0.0 }
 0x30c   : > { %v1245_v4 = vpop.f32.mrb[94].mxu1  ;;  %v1441_v28 = vsel %vm1440_vm6, %v4469_v23, %v1439_v51  ;;  %3360 = vmatprep.subr.bf16.mxu0 %v5073_v61  ;;  %v1611_v23 = vld [vmem:[%s5012_s3 + $0xd0] sm:$0xff] }
 0x30d   : > { %v3493_v14 = vpop.eup %3492  ;;  %v4529_v31 = vmax.f32 %v1245_v4, 0.0  ;;  %v1247_v11 = vpop.f32.mrb[95].mxu1  ;;  %v1444_v55 = vsel %vm1442_vm7, %v1443_v5, %v1441_v28  ;;  %v3370_v0 = vpack.c.bf16 %v1612_v26, %v1611_v23 }
 0x30e   : > { %2978 = vmatmul.mubr.f32.gmra.mrb[74].mxu0 %v1444_v55  ;;  %v1446_v17 = vmul.f32 %v3493_v14, %v4484_v43 }
 0x30f   : > { %3498 = vrsqrt.f32 %v4529_v31  ;;  %3362 = vmatpush1.bf16.msra.mxu0 %v3361_v52  ;;  %vm1468_vm14 = vcmp.eq.f32.partialorder %v4529_v31, inf  ;;  %v1471_v47 = vand.u32 2147483648, %v4529_v31  ;;  %vm1470_vm15 = vcmp.eq.f32.partialorder %v4529_v31, 0.0 }
 0x310   : > { %v1250_v10 = vpop.f32.mrb[96].mxu1  ;;  %v1448_v18 = vsel %vm1447_vm8, %v4484_v43, %v1446_v17  ;;  %3363 = vmatprep.subr.bf16.mxu0 %v5073_v61  ;;  %v1613_v43 = vld [vmem:[%s5012_s3 + $0xe0] sm:$0xff] }
 0x311   : > { %v3495_v57 = vpop.eup %3494  ;;  %v4544_v34 = vmax.f32 %v1250_v10, 0.0  ;;  %v1252_v9 = vpop.f32.mrb[97].mxu1  ;;  %v1451_v37 = vsel %vm1449_vm9, %v1450_v56, %v1448_v18  ;;  %v3373_v38 = vpack.c.bf16 %v1614_v16, %v1613_v43 }
 0x312   : > { %2980 = vmatprep.mubr.f32.mxu0 %v1451_v37  ;;  %v1453_v21 = vmul.f32 %v3495_v57, %v4499_v19 }
 0x313   : > { %3500 = vrsqrt.f32 %v4544_v34  ;;  %3365 = vmatpush1.bf16.msra.mxu0 %v3364_v53  ;;  %vm1475_vm0 = vcmp.eq.f32.partialorder %v4544_v34, inf  ;;  %v1478_v63 = vand.u32 2147483648, %v4544_v34  ;;  %vm1477_vm1 = vcmp.eq.f32.partialorder %v4544_v34, 0.0 }
 0x314   : > { %v1255_v29 = vpop.f32.mrb[98].mxu1  ;;  %v1455_v12 = vsel %vm1454_vm10, %v4499_v19, %v1453_v21  ;;  %3366 = vmatprep.subr.bf16.mxu0 %v5073_v61  ;;  %v1615_v19 = vld [vmem:[%s5012_s3 + $0xf0] sm:$0xff] }
 0x315   : > { %v3497_v59 = vpop.eup %3496  ;;  %v4559_v24 = vmax.f32 %v1255_v29, 0.0  ;;  %v1257_v40 = vpop.f32.mrb[99].mxu1  ;;  %v1458_v13 = vsel %vm1456_vm11, %v1457_v50, %v1455_v12  ;;  %v3376_v49 = vpack.c.bf16 %v1616_v7, %v1615_v19 }
 0x316   : > { %2981 = vmatmul.mubr.f32.gmra.mrb[76].mxu0 %v1458_v13  ;;  %v1460_v41 = vmul.f32 %v3497_v59, %v4514_v25 }
 0x317   : > { %3502 = vrsqrt.f32 %v4559_v24  ;;  %3368 = vmatpush1.bf16.msra.mxu0 %v3367_v20  ;;  %vm1482_vm2 = vcmp.eq.f32.partialorder %v4559_v24, inf  ;;  %v1485_v52 = vand.u32 2147483648, %v4559_v24  ;;  %vm1484_vm3 = vcmp.eq.f32.partialorder %v4559_v24, 0.0 }
 0x318   : > { %v1260_v27 = vpop.f32.mrb[100].mxu1  ;;  %v1462_v35 = vsel %vm1461_vm12, %v4514_v25, %v1460_v41  ;;  %3369 = vmatprep.subr.bf16.mxu0 %v5073_v61 }
 0x319   : > { %v3499_v33 = vpop.eup %3498  ;;  %v1347_v1 = vmax.f32 %v1260_v27, 0.0  ;;  %v1262_v32 = vpop.f32.mrb[101].mxu1  ;;  %v1465_v54 = vsel %vm1463_vm13, %v1464_v30, %v1462_v35 }
 0x31a   : > { %2983 = vmatprep.mubr.f32.mxu0 %v1465_v54  ;;  %v1467_v46 = vmul.f32 %v3499_v33, %v4529_v31 }
 0x31b   : > { %3504 = vrsqrt.f32 %v1347_v1  ;;  %3371 = vmatpush1.bf16.msra.mxu0 %v3370_v0  ;;  %vm1489_vm4 = vcmp.eq.f32.partialorder %v1347_v1, inf  ;;  %v1492_v11 = vand.u32 2147483648, %v1347_v1  ;;  %vm1491_vm5 = vcmp.eq.f32.partialorder %v1347_v1, 0.0 }
 0x31c   : > { %v1265_v2 = vpop.f32.mrb[102].mxu1  ;;  %v1469_v36 = vsel %vm1468_vm14, %v4529_v31, %v1467_v46  ;;  %3372 = vmatprep.subr.bf16.mxu0 %v5073_v61 }
 0x31d   : > { %v3501_v62 = vpop.eup %3500  ;;  %v1348_v42 = vmax.f32 %v1265_v2, 0.0  ;;  %v1267_v22 = vpop.f32.mrb[103].mxu1  ;;  %v1472_v39 = vsel %vm1470_vm15, %v1471_v47, %v1469_v36 }
 0x31e   : > { %2984 = vmatmul.mubr.f32.gmra.mrb[78].mxu0 %v1472_v39  ;;  %v1474_v58 = vmul.f32 %v3501_v62, %v4544_v34 }
 0x31f   : > { %3506 = vrsqrt.f32 %v1348_v42  ;;  %3374 = vmatpush1.bf16.msra.mxu0 %v3373_v38  ;;  %vm1496_vm6 = vcmp.eq.f32.partialorder %v1348_v42, inf  ;;  %v1499_v15 = vand.u32 2147483648, %v1348_v42  ;;  %vm1498_vm7 = vcmp.eq.f32.partialorder %v1348_v42, 0.0 }
 0x320   : > { %v1270_v3 = vpop.f32.mrb[104].mxu1  ;;  %v1476_v45 = vsel %vm1475_vm0, %v4544_v34, %v1474_v58  ;;  %3375 = vmatprep.subr.bf16.mxu0 %v5073_v61 }
 0x321   : > { %v3503_v25 = vpop.eup %3502  ;;  %v1349_v44 = vmax.f32 %v1270_v3, 0.0  ;;  %v1272_v8 = vpop.f32.mrb[105].mxu1  ;;  %v1479_v51 = vsel %vm1477_vm1, %v1478_v63, %v1476_v45 }
 0x322   : > { %2986 = vmatprep.mubr.f32.mxu0 %v1479_v51  ;;  %v1481_v5 = vmul.f32 %v3503_v25, %v4559_v24 }
 0x323   : > { %3508 = vrsqrt.f32 %v1349_v44  ;;  %3377 = vmatpush1.bf16.msra.mxu0 %v3376_v49  ;;  %vm1503_vm8 = vcmp.eq.f32.partialorder %v1349_v44, inf  ;;  %v1506_v29 = vand.u32 2147483648, %v1349_v44  ;;  %vm1505_vm9 = vcmp.eq.f32.partialorder %v1349_v44, 0.0 }
 0x324   : > { %v1275_v4 = vpop.f32.mrb[106].mxu1  ;;  %v1483_v28 = vsel %vm1482_vm2, %v4559_v24, %v1481_v5 }
 0x325   : > { %v3505_v48 = vpop.eup %3504  ;;  %v1350_v61 = vmax.f32 %v1275_v4, 0.0  ;;  %v1277_v6 = vpop.f32.mrb[107].mxu1  ;;  %v1486_v14 = vsel %vm1484_vm3, %v1485_v52, %v1483_v28 }
 0x326   : > { %2987 = vmatmul.mubr.f32.gmra.mrb[80].mxu0 %v1486_v14  ;;  %v1488_v31 = vmul.f32 %v3505_v48, %v1347_v1 }
 0x327   : > { %3510 = vrsqrt.f32 %v1350_v61  ;;  %vm1510_vm10 = vcmp.eq.f32.partialorder %v1350_v61, inf  ;;  %v1513_v41 = vand.u32 2147483648, %v1350_v61  ;;  %vm1512_vm11 = vcmp.eq.f32.partialorder %v1350_v61, 0.0 }
 0x328   : > { %v1280_v55 = vpop.f32.mrb[108].mxu1  ;;  %v1490_v17 = vsel %vm1489_vm4, %v1347_v1, %v1488_v31 }
 0x329   : > { %v3507_v56 = vpop.eup %3506  ;;  %v1351_v53 = vmax.f32 %v1280_v55, 0.0  ;;  %v1282_v10 = vpop.f32.mrb[109].mxu1  ;;  %v1493_v18 = vsel %vm1491_vm5, %v1492_v11, %v1490_v17 }
 0x32a   : > { %2989 = vmatprep.mubr.f32.mxu0 %v1493_v18  ;;  %v1495_v60 = vmul.f32 %v3507_v56, %v1348_v42 }
 0x32b   : > { %3512 = vrsqrt.f32 %v1351_v53  ;;  %vm1517_vm12 = vcmp.eq.f32.partialorder %v1351_v53, inf  ;;  %v1520_v1 = vand.u32 2147483648, %v1351_v53  ;;  %vm1519_vm13 = vcmp.eq.f32.partialorder %v1351_v53, 0.0 }
 0x32c   : > { %v1285_v57 = vpop.f32.mrb[110].mxu1  ;;  %v1497_v34 = vsel %vm1496_vm6, %v1348_v42, %v1495_v60 }
 0x32d   : > { %v3509_v9 = vpop.eup %3508  ;;  %v1352_v37 = vmax.f32 %v1285_v57, 0.0  ;;  %v1287_v21 = vpop.f32.mrb[111].mxu1  ;;  %v1500_v50 = vsel %vm1498_vm7, %v1499_v15, %v1497_v34 }
 0x32e   : > { %2990 = vmatmul.mubr.f32.gmra.mrb[82].mxu0 %v1500_v50  ;;  %v1502_v20 = vmul.f32 %v3509_v9, %v1349_v44 }
 0x32f   : > { %3514 = vrsqrt.f32 %v1352_v37  ;;  %vm1524_vm14 = vcmp.eq.f32.partialorder %v1352_v37, inf  ;;  %v1527_v19 = vand.u32 2147483648, %v1352_v37  ;;  %vm1526_vm15 = vcmp.eq.f32.partialorder %v1352_v37, 0.0 }
 0x330   : > { %v1290_v12 = vpop.f32.mrb[112].mxu1  ;;  %v1504_v23 = vsel %vm1503_vm8, %v1349_v44, %v1502_v20 }
 0x331   : > { %v3511_v26 = vpop.eup %3510  ;;  %v1353_v59 = vmax.f32 %v1290_v12, 0.0  ;;  %v1292_v24 = vpop.f32.mrb[113].mxu1  ;;  %v1507_v40 = vsel %vm1505_vm9, %v1506_v29, %v1504_v23 }
 0x332   : > { %2992 = vmatprep.mubr.f32.mxu0 %v1507_v40  ;;  %v1509_v13 = vmul.f32 %v3511_v26, %v1350_v61 }
 0x333   : > { %3516 = vrsqrt.f32 %v1353_v59  ;;  %vm1531_vm0 = vcmp.eq.f32.partialorder %v1353_v59, inf  ;;  %v1534_v49 = vand.u32 2147483648, %v1353_v59  ;;  %vm1533_vm1 = vcmp.eq.f32.partialorder %v1353_v59, 0.0 }
 0x334   : > { %v1295_v30 = vpop.f32.mrb[114].mxu1  ;;  %v1511_v0 = vsel %vm1510_vm10, %v1350_v61, %v1509_v13 }
 0x335   : > { %v3513_v27 = vpop.eup %3512  ;;  %v1354_v35 = vmax.f32 %v1295_v30, 0.0  ;;  %v1297_v43 = vpop.f32.mrb[115].mxu1  ;;  %v1514_v16 = vsel %vm1512_vm11, %v1513_v41, %v1511_v0 }
 0x336   : > { %2993 = vmatmul.mubr.f32.gmra.mrb[84].mxu0 %v1514_v16  ;;  %v1516_v33 = vmul.f32 %v3513_v27, %v1351_v53 }
 0x337   : > { %3518 = vrsqrt.f32 %v1354_v35  ;;  %vm1538_vm2 = vcmp.eq.f32.partialorder %v1354_v35, inf  ;;  %v1541_v52 = vand.u32 2147483648, %v1354_v35  ;;  %vm1540_vm3 = vcmp.eq.f32.partialorder %v1354_v35, 0.0 }
 0x338   : > { %v1300_v32 = vpop.f32.mrb[116].mxu1  ;;  %v1518_v54 = vsel %vm1517_vm12, %v1351_v53, %v1516_v33 }
 0x339   : > { %v3515_v46 = vpop.eup %3514  ;;  %v1355_v47 = vmax.f32 %v1300_v32, 0.0  ;;  %v1302_v38 = vpop.f32.mrb[117].mxu1  ;;  %v1521_v2 = vsel %vm1519_vm13, %v1520_v1, %v1518_v54  ;;  %v3532_v54 = vld [vmem:[%s3703_s11 + $0x8] sm:$0xff] }
 0x33a   : > { %2995 = vmatprep.mubr.f32.mxu0 %v1521_v2  ;;  %v1523_v36 = vmul.f32 %v3515_v46, %v1352_v37  ;;  %v3533_v46 = vld [vmem:[%s3703_s11] sm:$0xff]  ;;  %v3535_v38 = vld [vmem:[%s3703_s11 + $0x10] sm:$0xff]  ;;  %v3536_v2 = vld [vmem:[%s3703_s11 + $0x28] sm:$0xff] }
 0x33b   : > { %3520 = vrsqrt.f32 %v1355_v47  ;;  %vm1545_vm4 = vcmp.eq.f32.partialorder %v1355_v47, inf  ;;  %v1548_v11 = vand.u32 2147483648, %v1355_v47  ;;  %vm1547_vm5 = vcmp.eq.f32.partialorder %v1355_v47, 0.0 }
 0x33c   : > { %v1305_v7 = vpop.f32.mrb[118].mxu1  ;;  %v1525_v62 = vsel %vm1524_vm14, %v1352_v37, %v1523_v36  ;;  %v3537_v36 = vld [vmem:[%s3703_s11 + $0x20] sm:$0xff] }
 0x33d   : > { %v3517_v42 = vpop.eup %3516  ;;  %v1356_v22 = vmax.f32 %v1305_v7, 0.0  ;;  %v1307_v39 = vpop.f32.mrb[119].mxu1  ;;  %v1528_v58 = vsel %vm1526_vm15, %v1527_v19, %v1525_v62  ;;  %v3538_v19 = vld [vmem:[%s3703_s11 + $0x38] sm:$0xff]  ;;  %v3539_v7 = vld [vmem:[%s3703_s11 + $0x30] sm:$0xff]  ;;  %v3540_v62 = vld [vmem:[%s3703_s11 + $0x48] sm:$0xff] }
 0x33e   : > { %2996 = vmatmul.mubr.f32.gmra.mrb[86].mxu0 %v1528_v58  ;;  %v1530_v63 = vmul.f32 %v3517_v42, %v1353_v59  ;;  %v3541_v42 = vld [vmem:[%s3703_s11 + $0x40] sm:$0xff]  ;;  %v3543_v39 = vld [vmem:[%s3703_s11 + $0x50] sm:$0xff]  ;;  %v3544_v58 = vld [vmem:[%s3703_s11 + $0x68] sm:$0xff] }
 0x33f   : > { %3522 = vrsqrt.f32 %v1356_v22  ;;  %vm1552_vm6 = vcmp.eq.f32.partialorder %v1356_v22, inf  ;;  %v1555_v15 = vand.u32 2147483648, %v1356_v22  ;;  %vm1554_vm7 = vcmp.eq.f32.partialorder %v1356_v22, 0.0 }
 0x340   : > { %v1310_v3 = vpop.f32.mrb[120].mxu1  ;;  %v1532_v45 = vsel %vm1531_vm0, %v1353_v59, %v1530_v63  ;;  %v3545_v63 = vld [vmem:[%s3703_s11 + $0x60] sm:$0xff] }
 0x341   : > { %v3519_v25 = vpop.eup %3518  ;;  %v1357_v44 = vmax.f32 %v1310_v3, 0.0  ;;  %v1312_v8 = vpop.f32.mrb[121].mxu1  ;;  %v1535_v51 = vsel %vm1533_vm1, %v1534_v49, %v1532_v45  ;;  %v2154_v49 = vld [vmem:[%s5015_s6] sm:$0xff]  ;;  %v2155_v3 = vld [vmem:[%s5015_s6 + $0x8] sm:$0xff]  ;;  %v3546_v45 = vld [vmem:[%s3703_s11 + $0x78] sm:$0xff] }
 0x342   : > { %2998 = vmatprep.mubr.f32.mxu0 %v1535_v51  ;;  %v1537_v5 = vmul.f32 %v3519_v25, %v1354_v35  ;;  %v3378_v25 = vpack.c.bf16 %v2155_v3, %v2154_v49  ;;  %v3548_v8 = vld [vmem:[%s3703_s11 + $0x88] sm:$0xff]  ;;  %v3549_v51 = vld [vmem:[%s3703_s11 + $0x80] sm:$0xff]  ;;  %v3582_v49 = vld [vmem:[%s3703_s11 + $0x198] sm:$0xff] }
 0x343   : > { %3524 = vrsqrt.f32 %v1357_v44  ;;  %vm1559_vm8 = vcmp.eq.f32.partialorder %v1357_v44, inf  ;;  %v1562_v29 = vand.u32 2147483648, %v1357_v44  ;;  %vm1561_vm9 = vcmp.eq.f32.partialorder %v1357_v44, 0.0  ;;  %v3583_v3 = vld [vmem:[%s3703_s11 + $0x190] sm:$0xff] }
 0x344   : > { %v1315_v4 = vpop.f32.mrb[122].mxu1  ;;  %v1539_v28 = vsel %vm1538_vm2, %v1354_v35, %v1537_v5  ;;  %3379 = vmatprep.subr.bf16.mxu0 %v3378_v25  ;;  %3442 = vmatprep.subr.bf16.mxu1 %v3378_v25  ;;  %v3550_v5 = vld [vmem:[%s3703_s11 + $0x98] sm:$0xff] }
 0x345   : > { %v3521_v48 = vpop.eup %3520  ;;  %v1358_v61 = vmax.f32 %v1315_v4, 0.0  ;;  %v1317_v6 = vpop.f32.mrb[123].mxu1  ;;  %v1542_v14 = vsel %vm1540_vm3, %v1541_v52, %v1539_v28  ;;  %3450 = vmatpush3.bf16.msra.mxu1 %v3378_v25  ;;  %v3551_v52 = vld [vmem:[%s3703_s11 + $0x90] sm:$0xff]  ;;  %v3552_v4 = vld [vmem:[%s3703_s11 + $0xa8] sm:$0xff]  ;;  %v3553_v28 = vld [vmem:[%s3703_s11 + $0xa0] sm:$0xff] }
 0x346   : > { %2999 = vmatmul.mubr.f32.gmra.mrb[88].mxu0 %v1542_v14  ;;  %v1544_v31 = vmul.f32 %v3521_v48, %v1355_v47  ;;  %v2156_v48 = vld [vmem:[%s5015_s6 + $0x10] sm:$0xff]  ;;  %v3554_v6 = vld [vmem:[%s3703_s11 + $0xb8] sm:$0xff] }
 0x347   : > { %3526 = vrsqrt.f32 %v1358_v61  ;;  %vm1566_vm10 = vcmp.eq.f32.partialorder %v1358_v61, inf  ;;  %v1569_v24 = vand.u32 2147483648, %v1358_v61  ;;  %vm1568_vm11 = vcmp.eq.f32.partialorder %v1358_v61, 0.0 }
 0x348   : > { %v1320_v55 = vpop.f32.mrb[124].mxu1  ;;  %v1546_v17 = vsel %vm1545_vm4, %v1355_v47, %v1544_v31  ;;  %v3534_v47 = vld [vmem:[%s3703_s11 + $0x18] sm:$0xff]  ;;  %v3555_v31 = vld [vmem:[%s3703_s11 + $0xb0] sm:$0xff] }
 0x349   : > { %v3523_v56 = vpop.eup %3522  ;;  %v1359_v53 = vmax.f32 %v1320_v55, 0.0  ;;  %v1322_v10 = vpop.f32.mrb[125].mxu1  ;;  %v1549_v18 = vsel %vm1547_vm5, %v1548_v11, %v1546_v17  ;;  %v3556_v11 = vld [vmem:[%s3703_s11 + $0xc8] sm:$0xff]  ;;  %v3557_v55 = vld [vmem:[%s3703_s11 + $0xc0] sm:$0xff]  ;;  %v3558_v17 = vld [vmem:[%s3703_s11 + $0xd8] sm:$0xff] }
 0x34a   : > { %3001 = vmatprep.mubr.f32.mxu0 %v1549_v18  ;;  %v1551_v60 = vmul.f32 %v3523_v56, %v1356_v22  ;;  %v3559_v56 = vld [vmem:[%s3703_s11 + $0xd0] sm:$0xff]  ;;  %v3561_v10 = vld [vmem:[%s3703_s11 + $0xe0] sm:$0xff] }
 0x34b   : > { %3528 = vrsqrt.f32 %v1359_v53  ;;  %vm1573_vm12 = vcmp.eq.f32.partialorder %v1359_v53, inf  ;;  %v1576_v0 = vand.u32 2147483648, %v1359_v53  ;;  %vm1575_vm13 = vcmp.eq.f32.partialorder %v1359_v53, 0.0  ;;  %v2158_v18 = vld [vmem:[%s5015_s6 + $0x20] sm:$0xff] }
 0x34c   : > { %v1325_v57 = vpop.f32.mrb[126].mxu1  ;;  %v1553_v34 = vsel %vm1552_vm6, %v1356_v22, %v1551_v60  ;;  %v3542_v22 = vld [vmem:[%s3703_s11 + $0x58] sm:$0xff]  ;;  %v2159_v60 = vld [vmem:[%s5015_s6 + $0x28] sm:$0xff] }
 0x34d   : > { %v3525_v9 = vpop.eup %3524  ;;  %v1360_v37 = vmax.f32 %v1325_v57, 0.0  ;;  %v1327_v21 = vpop.f32.mrb[127].mxu1  ;;  %v1556_v50 = vsel %vm1554_vm7, %v1555_v15, %v1553_v34  ;;  %v3562_v15 = vld [vmem:[%s3703_s11 + $0xf8] sm:$0xff]  ;;  %v3386_v57 = vpack.c.bf16 %v2159_v60, %v2158_v18  ;;  %v3563_v34 = vld [vmem:[%s3703_s11 + $0xf0] sm:$0xff] }
 0x34e   : > { %3002 = vmatmul.mubr.f32.gmra.mrb[90].mxu0 %v1556_v50  ;;  %v1558_v20 = vmul.f32 %v3525_v9, %v1357_v44  ;;  %v3564_v9 = vld [vmem:[%s3703_s11 + $0x108] sm:$0xff]  ;;  %v3566_v21 = vld [vmem:[%s3703_s11 + $0x118] sm:$0xff]  ;;  %v3567_v50 = vld [vmem:[%s3703_s11 + $0x110] sm:$0xff] }
 0x34f   : > { %3530 = vrsqrt.f32 %v1360_v37  ;;  %vm1580_vm14 = vcmp.eq.f32.partialorder %v1360_v37, inf  ;;  %v1583_v33 = vand.u32 2147483648, %v1360_v37  ;;  %vm1582_vm15 = vcmp.eq.f32.partialorder %v1360_v37, 0.0 }
 0x350   : > { %v1560_v12 = vsel %vm1559_vm8, %v1357_v44, %v1558_v20  ;;  %v3547_v44 = vld [vmem:[%s3703_s11 + $0x70] sm:$0xff]  ;;  %v3568_v20 = vld [vmem:[%s3703_s11 + $0x128] sm:$0xff] }
 0x351   : > { %v3527_v23 = vpop.eup %3526  ;;  %v1563_v26 = vsel %vm1561_vm9, %v1562_v29, %v1560_v12  ;;  %v2160_v29 = vld [vmem:[%s5015_s6 + $0x30] sm:$0xff]  ;;  %v2161_v12 = vld [vmem:[%s5015_s6 + $0x38] sm:$0xff] }
 0x352   : > { %3004 = vmatprep.mubr.f32.mxu0 %v1563_v26  ;;  %v1565_v59 = vmul.f32 %v3527_v23, %v1358_v61  ;;  %v3569_v23 = vld [vmem:[%s3703_s11 + $0x120] sm:$0xff]  ;;  %v3390_v26 = vpack.c.bf16 %v2161_v12, %v2160_v29 }
 0x354   : > { %v1567_v40 = vsel %vm1566_vm10, %v1358_v61, %v1565_v59  ;;  %v2157_v61 = vld [vmem:[%s5015_s6 + $0x18] sm:$0xff]  ;;  %v2162_v59 = vld [vmem:[%s5015_s6 + $0x40] sm:$0xff] }
 0x355   : > { %v3529_v13 = vpop.eup %3528  ;;  %v1570_v41 = vsel %vm1568_vm11, %v1569_v24, %v1567_v40  ;;  %v3382_v14 = vpack.c.bf16 %v2157_v61, %v2156_v48  ;;  %v2163_v24 = vld [vmem:[%s5015_s6 + $0x48] sm:$0xff]  ;;  %v3570_v40 = vld [vmem:[%s3703_s11 + $0x138] sm:$0xff]  ;;  %v3589_v48 = vld [vmem:[%s3703_s11 + $0x1c0] sm:$0xff] }
 0x356   : > { %3005 = vmatmul.mubr.f32.gmra.mrb[92].mxu0 %v1570_v41  ;;  %v1572_v30 = vmul.f32 %v3529_v13, %v1359_v53  ;;  %v3394_v13 = vpack.c.bf16 %v2163_v24, %v2162_v59  ;;  %v3571_v41 = vld [vmem:[%s3703_s11 + $0x130] sm:$0xff]  ;;  %v3590_v61 = vld [vmem:[%s3703_s11 + $0x1d8] sm:$0xff] }
 0x357   : > { %3443 = vmatprep.subr.bf16.mxu1 %v3382_v14 }
 0x358   : > { %v1574_v27 = vsel %vm1573_vm12, %v1359_v53, %v1572_v30  ;;  %3451 = vmatpush3.bf16.msra.mxu1 %v3382_v14  ;;  %v3560_v53 = vld [vmem:[%s3703_s11 + $0xe8] sm:$0xff] }
 0x359   : > { %v3531_v35 = vpop.eup %3530  ;;  %v1577_v43 = vsel %vm1575_vm13, %v1576_v0, %v1574_v27  ;;  %3444 = vmatprep.subr.bf16.mxu1 %v3386_v57  ;;  %v3572_v30 = vld [vmem:[%s3703_s11 + $0x148] sm:$0xff]  ;;  %v2164_v0 = vld [vmem:[%s5015_s6 + $0x50] sm:$0xff]  ;;  %v2165_v27 = vld [vmem:[%s5015_s6 + $0x58] sm:$0xff] }
 0x35a   : > { %3007 = vmatprep.mubr.f32.mxu0 %v1577_v43  ;;  %v1579_v16 = vmul.f32 %v3531_v35, %v1360_v37  ;;  %v3573_v35 = vld [vmem:[%s3703_s11 + $0x140] sm:$0xff]  ;;  %v3398_v43 = vpack.c.bf16 %v2165_v27, %v2164_v0 }
 0x35b   : > { %v4776_v27 = vld [vmem:[%s5014_s5] ss:$0 sm:$0xff] }
 0x35c   : > { %v1581_v1 = vsel %vm1580_vm14, %v1360_v37, %v1579_v16  ;;  %3452 = vmatpush3.bf16.msra.mxu1 %v3386_v57  ;;  %v3565_v37 = vld [vmem:[%s3703_s11 + $0x100] sm:$0xff]  ;;  %v3574_v16 = vld [vmem:[%s3703_s11 + $0x158] sm:$0xff] }
 0x35d   : > { %v1584_v32 = vsel %vm1582_vm15, %v1583_v33, %v1581_v1  ;;  %3445 = vmatprep.subr.bf16.mxu1 %v3390_v26  ;;  %v2166_v33 = vld [vmem:[%s5015_s6 + $0x60] sm:$0xff]  ;;  %v2167_v1 = vld [vmem:[%s5015_s6 + $0x68] sm:$0xff] }
 0x35e   : > { %3008 = vmatmul.mubr.f32.gmra.mrb[94].mxu0 %v1584_v32  ;;  %v3575_v32 = vld [vmem:[%s3703_s11 + $0x150] sm:$0xff] }
 0x35f   : > { %1922 = vmatprep.mubr.f32.mxu0 %v3532_v54  ;;  %v3402_v54 = vpack.c.bf16 %v2167_v1, %v2166_v33  ;;  %v2434_v33 = vld [vmem:[%s5017_s8] sm:$0xff]  ;;  %v2435_v1 = vld [vmem:[%s5017_s8 + $0x8] sm:$0xff] }
 0x360   : > { %3453 = vmatpush3.bf16.msra.mxu1 %v3390_v26 }
 0x361   : > { %3446 = vmatprep.subr.bf16.mxu1 %v3394_v13 }
 0x362   : > { %1923 = vmatmul.mubr.f32.vlgmr.msra.gmra.mrb[96].mxu0 %v3533_v46  ;;  %v3576_v46 = vld [vmem:[%s3703_s11 + $0x168] sm:$0xff] }
 0x363   : > { %1927 = vmatprep.mubr.f32.mxu0 %v3534_v47  ;;  %3381 = vmatpush3.bf16.msra.mxu0 %v3378_v25 }
 0x364   : > { %3383 = vmatprep.subr.bf16.mxu0 %v3382_v14  ;;  %3454 = vmatpush3.bf16.msra.mxu1 %v3394_v13 }
 0x365   : > { %3447 = vmatprep.subr.bf16.mxu1 %v3398_v43 }
 0x366   : > { %1928 = vmatmul.mubr.f32.gmra.mrb[98].mxu0 %v3535_v38  ;;  %v2168_v38 = vld [vmem:[%s5015_s6 + $0x70] sm:$0xff] }
 0x367   : > { %1932 = vmatprep.mubr.f32.mxu0 %v3536_v2  ;;  %3385 = vmatpush3.bf16.msra.mxu0 %v3382_v14  ;;  %v2169_v2 = vld [vmem:[%s5015_s6 + $0x78] sm:$0xff]  ;;  %v3592_v14 = vld [vmem:[%s3703_s11 + $0x1e8] sm:$0xff] }
 0x368   : > { %3387 = vmatprep.subr.bf16.mxu0 %v3386_v57  ;;  %3455 = vmatpush3.bf16.msra.mxu1 %v3398_v43 }
 0x369   : > { %3448 = vmatprep.subr.bf16.mxu1 %v3402_v54 }
 0x36a   : > { %1933 = vmatmul.mubr.f32.gmra.mrb[100].mxu0 %v3537_v36 }
 0x36b   : > { %1937 = vmatprep.mubr.f32.mxu0 %v3538_v19  ;;  %3389 = vmatpush3.bf16.msra.mxu0 %v3386_v57  ;;  %v3577_v19 = vld [vmem:[%s3703_s11 + $0x160] sm:$0xff] }
 0x36c   : > { %3391 = vmatprep.subr.bf16.mxu0 %v3390_v26  ;;  %3456 = vmatpush3.bf16.msra.mxu1 %v3402_v54 }
 0x36e   : > { %1938 = vmatmul.mubr.f32.gmra.mrb[102].mxu0 %v3539_v7  ;;  %v3406_v7 = vpack.c.bf16 %v2169_v2, %v2168_v38 }
 0x36f   : > { %1942 = vmatprep.mubr.f32.mxu0 %v3540_v62  ;;  %3393 = vmatpush3.bf16.msra.mxu0 %v3390_v26  ;;  %v3578_v62 = vld [vmem:[%s3703_s11 + $0x178] sm:$0xff] }
 0x370   : > { %3395 = vmatprep.subr.bf16.mxu0 %v3394_v13  ;;  %3449 = vmatprep.subr.bf16.mxu1 %v3406_v7 }
 0x371   : > { %3457 = vmatpush3.bf16.msra.mxu1 %v3406_v7 }
 0x372   : > { %1943 = vmatmul.mubr.f32.gmra.mrb[104].mxu0 %v3541_v42  ;;  %v3579_v42 = vld [vmem:[%s3703_s11 + $0x170] sm:$0xff] }
 0x373   : > { %1947 = vmatprep.mubr.f32.mxu0 %v3542_v22  ;;  %3397 = vmatpush3.bf16.msra.mxu0 %v3394_v13  ;;  %v3580_v22 = vld [vmem:[%s3703_s11 + $0x188] sm:$0xff] }
 0x374   : > { %3399 = vmatprep.subr.bf16.mxu0 %v3398_v43 }
 0x376   : > { %1948 = vmatmul.mubr.f32.gmra.mrb[106].mxu0 %v3543_v39 }
 0x377   : > { %1952 = vmatprep.mubr.f32.mxu0 %v3544_v58  ;;  %3401 = vmatpush3.bf16.msra.mxu0 %v3398_v43 }
 0x378   : > { %3403 = vmatprep.subr.bf16.mxu0 %v3402_v54 }
 0x37a   : > { %1953 = vmatmul.mubr.f32.gmra.mrb[108].mxu0 %v3545_v63  ;;  %v3581_v63 = vld [vmem:[%s3703_s11 + $0x180] sm:$0xff] }
 0x37b   : > { %1957 = vmatprep.mubr.f32.mxu0 %v3546_v45  ;;  %3405 = vmatpush3.bf16.msra.mxu0 %v3402_v54  ;;  %v3584_v45 = vld [vmem:[%s3703_s11 + $0x1a8] sm:$0xff]  ;;  %v4786_v54 = vpack.c.bf16 %v2435_v1, %v2434_v33 }
 0x37c   : > { %3407 = vmatprep.subr.bf16.mxu0 %v3406_v7 }
 0x37d   : > { %3411 = vmatprep.subr.bf16.mxu1 %v4786_v54 }
 0x37e   : > { %1958 = vmatmul.mubr.f32.gmra.mrb[110].mxu0 %v3547_v44 }
 0x37f   : > { %1962 = vmatprep.mubr.f32.mxu0 %v3548_v8  ;;  %3409 = vmatpush3.bf16.msra.mxu0 %v3406_v7  ;;  %v3585_v8 = vld [vmem:[%s3703_s11 + $0x1a0] sm:$0xff] }
 0x382   : > { %1963 = vmatmul.mubr.f32.gmra.mrb[112].mxu0 %v3549_v51  ;;  %v3586_v51 = vld [vmem:[%s3703_s11 + $0x1b8] sm:$0xff] }
 0x383   : > { %1967 = vmatprep.mubr.f32.mxu0 %v3550_v5  ;;  %v3587_v5 = vld [vmem:[%s3703_s11 + $0x1b0] sm:$0xff] }
 0x386   : > { %1968 = vmatmul.mubr.f32.gmra.mrb[114].mxu0 %v3551_v52  ;;  %v3588_v52 = vld [vmem:[%s3703_s11 + $0x1c8] sm:$0xff] }
 0x387   : > { %1972 = vmatprep.mubr.f32.mxu0 %v3552_v4 }
 0x38a   : > { %1973 = vmatmul.mubr.f32.gmra.mrb[116].mxu0 %v3553_v28 }
 0x38b   : > { %1977 = vmatprep.mubr.f32.mxu0 %v3554_v6  ;;  %v3591_v6 = vld [vmem:[%s3703_s11 + $0x1d0] sm:$0xff] }
 0x38e   : > { %1978 = vmatmul.mubr.f32.gmra.mrb[118].mxu0 %v3555_v31 }
 0x38f   : > { %1982 = vmatprep.mubr.f32.mxu0 %v3556_v11 }
 0x392   : > { %1983 = vmatmul.mubr.f32.gmra.mrb[120].mxu0 %v3557_v55  ;;  %v3593_v55 = vld [vmem:[%s3703_s11 + $0x1e0] sm:$0xff] }
 0x393   : > { %1987 = vmatprep.mubr.f32.mxu0 %v3558_v17  ;;  %v3594_v17 = vld [vmem:[%s3703_s11 + $0x1f8] sm:$0xff] }
 0x396   : > { %1988 = vmatmul.mubr.f32.gmra.mrb[122].mxu0 %v3559_v56  ;;  %v3595_v56 = vld [vmem:[%s3703_s11 + $0x1f0] sm:$0xff]  ;;  %s2779_s11 = sshll.u32 %s5099_s21, 3 }
 0x397   : > { %1992 = vmatprep.mubr.f32.mxu0 %v3560_v53  ;;  %s4940_s24 = scalar_lea.vmem %s5019_s10, %s2779_s11 }
 0x39a   : > { %1993 = vmatmul.mubr.f32.gmra.mrb[124].mxu0 %v3561_v10 }
 0x39b   : > { %1997 = vmatprep.mubr.f32.mxu0 %v3562_v15 }
 0x39e   : > { %1998 = vmatmul.mubr.f32.gmra.mrb[126].mxu0 %v3563_v34 }
 0x39f   : > { %2002 = vmatprep.mubr.f32.mxu0 %v3564_v9 }
 0x3a2   : > { %2003 = vmatmul.mubr.f32.gmra.mrb[128].mxu0 %v3565_v37 }
 0x3a3   : > { %2007 = vmatprep.mubr.f32.mxu0 %v3566_v21 }
 0x3a6   : > { %2008 = vmatmul.mubr.f32.gmra.mrb[130].mxu0 %v3567_v50 }
 0x3a7   : > { %2012 = vmatprep.mubr.f32.mxu0 %v3568_v20 }
 0x3aa   : > { %2013 = vmatmul.mubr.f32.gmra.mrb[132].mxu0 %v3569_v23 }
 0x3ab   : > { %2017 = vmatprep.mubr.f32.mxu0 %v3570_v40 }
 0x3ae   : > { %2018 = vmatmul.mubr.f32.gmra.mrb[134].mxu0 %v3571_v41 }
 0x3af   : > { %2022 = vmatprep.mubr.f32.mxu0 %v3572_v30 }
 0x3b2   : > { %2023 = vmatmul.mubr.f32.gmra.mrb[136].mxu0 %v3573_v35 }
 0x3b3   : > { %2027 = vmatprep.mubr.f32.mxu0 %v3574_v16 }
 0x3b6   : > { %2028 = vmatmul.mubr.f32.gmra.mrb[138].mxu0 %v3575_v32 }
 0x3b7   : > { %2032 = vmatprep.mubr.f32.mxu0 %v3576_v46 }
 0x3b9   : > { %v4684_v47 = vpop.f32.mrb[64].mxu0 }
 0x3ba   : > { %v4692_v36 = vpop.f32.mrb[65].mxu0  ;;  %2033 = vmatmul.mubr.f32.gmra.mrb[140].mxu0 %v3577_v19 }
 0x3bb   : > { %2037 = vmatprep.mubr.f32.mxu0 %v3578_v62 }
 0x3be   : > { %2038 = vmatmul.mubr.f32.gmra.mrb[142].mxu0 %v3579_v42 }
 0x3bf   : > { %2042 = vmatprep.mubr.f32.mxu0 %v3580_v22 }
 0x3c1   : > { %v4698_v39 = vpop.f32.mrb[66].mxu0 }
 0x3c2   : > { %v4700_v58 = vpop.f32.mrb[67].mxu0  ;;  %2043 = vmatmul.mubr.f32.gmra.mrb[144].mxu0 %v3581_v63 }
 0x3c3   : > { %2047 = vmatprep.mubr.f32.mxu0 %v3582_v49 }
 0x3c6   : > { %2048 = vmatmul.mubr.f32.gmra.mrb[146].mxu0 %v3583_v3 }
 0x3c7   : > { %2052 = vmatprep.mubr.f32.mxu0 %v3584_v45 }
 0x3c9   : > { %v4706_v25 = vpop.f32.mrb[68].mxu0 }
 0x3ca   : > { %v4708_v44 = vpop.f32.mrb[69].mxu0  ;;  %2053 = vmatmul.mubr.f32.gmra.mrb[148].mxu0 %v3585_v8 }
 0x3cb   : > { %2057 = vmatprep.mubr.f32.mxu0 %v3586_v51 }
 0x3ce   : > { %2058 = vmatmul.mubr.f32.gmra.mrb[150].mxu0 %v3587_v5 }
 0x3cf   : > { %2062 = vmatprep.mubr.f32.mxu0 %v3588_v52 }
 0x3d1   : > { %v4714_v4 = vpop.f32.mrb[70].mxu0 }
 0x3d2   : > { %v4716_v28 = vpop.f32.mrb[71].mxu0  ;;  %2063 = vmatmul.mubr.f32.gmra.mrb[152].mxu0 %v3589_v48 }
 0x3d3   : > { %2067 = vmatprep.mubr.f32.mxu0 %v3590_v61 }
 0x3d6   : > { %2068 = vmatmul.mubr.f32.gmra.mrb[154].mxu0 %v3591_v6 }
 0x3d7   : > { %2072 = vmatprep.mubr.f32.mxu0 %v3592_v14 }
 0x3d9   : > { %v4722_v31 = vpop.f32.mrb[72].mxu0 }
 0x3da   : > { %v4724_v11 = vpop.f32.mrb[73].mxu0  ;;  %2073 = vmatmul.mubr.f32.gmra.mrb[156].mxu0 %v3593_v55 }
 0x3db   : > { %2077 = vmatprep.mubr.f32.mxu0 %v3594_v17 }
 0x3de   : > { %2078 = vmatmul.mubr.f32.gmra.mrb[158].mxu0 %v3595_v56 }
 0x3e1   : > { %v4729_v53 = vpop.f32.mrb[74].mxu0 }
 0x3e2   : > { %v4731_v10 = vpop.f32.mrb[75].mxu0 }
 0x3e9   : > { %v4733_v18 = vpop.f32.mrb[76].mxu0 }
 0x3ea   : > { %v4735_v60 = vpop.f32.mrb[77].mxu0 }
 0x3f1   : > { %v4737_v15 = vpop.f32.mrb[78].mxu0 }
 0x3f2   : > { %v4739_v57 = vpop.f32.mrb[79].mxu0 }
 0x3f9   : > { %v4741_v34 = vpop.f32.mrb[80].mxu0 }
 0x3fa   : > { %v4743_v9 = vpop.f32.mrb[81].mxu0 }
 0x401   : > { %v4745_v37 = vpop.f32.mrb[82].mxu0 }
 0x402   : > { %v4747_v21 = vpop.f32.mrb[83].mxu0 }
 0x409   : > { %v4749_v50 = vpop.f32.mrb[84].mxu0 }
 0x40a   : > { %v4751_v20 = vpop.f32.mrb[85].mxu0 }
 0x411   : > { %v4753_v29 = vpop.f32.mrb[86].mxu0 }
 0x412   : > { %v4755_v12 = vpop.f32.mrb[87].mxu0 }
 0x419   : > { %v4757_v23 = vpop.f32.mrb[88].mxu0 }
 0x41a   : > { %v4759_v26 = vpop.f32.mrb[89].mxu0 }
 0x421   : > { %v4761_v59 = vpop.f32.mrb[90].mxu0 }
 0x422   : > { %v4763_v24 = vpop.f32.mrb[91].mxu0 }
 0x429   : > { %v4765_v40 = vpop.f32.mrb[92].mxu0 }
 0x42a   : > { %v4767_v13 = vpop.f32.mrb[93].mxu0 }
 0x431   : > { %v4769_v41 = vpop.f32.mrb[94].mxu0 }
 0x432   : > { %v4771_v30 = vpop.f32.mrb[95].mxu0 }
 0x435   : > { %v1924_v0 = vpop.f32.mrb[96].mxu0 }
 0x436   : > { %v1925_v35 = vadd.f32 %v1924_v0, %v4692_v36  ;;  %v1926_v43 = vpop.f32.mrb[97].mxu0 }
 0x438   : > { %v2090_v16 = vadd.f32 %v4776_v27, %v1925_v35 }
 0x439   : > { %v1929_v32 = vpop.f32.mrb[98].mxu0 }
 0x43a   : > { %v2122_v46 = vmax.f32 %v2090_v16, 0.0  ;;  %v1930_v38 = vadd.f32 %v4684_v47, %v1929_v32  ;;  %v1931_v2 = vpop.f32.mrb[99].mxu0 }
 0x43c   : > { %v2091_v36 = vadd.f32 %v4776_v27, %v1930_v38  ;;  %3042 = vmatprep.mubr.f32.mxu0 %v2122_v46 }
 0x43d   : > { %v1934_v19 = vpop.f32.mrb[100].mxu0 }
 0x43e   : > { %v2123_v7 = vmax.f32 %v2091_v36, 0.0  ;;  %v1935_v62 = vadd.f32 %v1934_v19, %v4700_v58  ;;  %v1936_v42 = vpop.f32.mrb[101].mxu0 }
 0x440   : > { %v2092_v22 = vadd.f32 %v4776_v27, %v1935_v62  ;;  %3043 = vmatmul.mubr.f32.vlgmr.msra.gmra.mrb[160].mxu0 %v2123_v7  ;;  %v2437_v62 = vld [vmem:[%s5017_s8 + $0x18] sm:$0xff] }
 0x441   : > { %v1939_v63 = vpop.f32.mrb[102].mxu0 }
 0x442   : > { %v2124_v49 = vmax.f32 %v2092_v22, 0.0  ;;  %v1940_v3 = vadd.f32 %v4698_v39, %v1939_v63  ;;  %v1941_v45 = vpop.f32.mrb[103].mxu0 }
 0x443   : > { %v2439_v45 = vld [vmem:[%s5017_s8 + $0x28] sm:$0xff] }
 0x444   : > { %v2093_v47 = vadd.f32 %v4776_v27, %v1940_v3  ;;  %3045 = vmatprep.mubr.f32.mxu0 %v2124_v49 }
 0x445   : > { %v1944_v8 = vpop.f32.mrb[104].mxu0 }
 0x446   : > { %v2125_v51 = vmax.f32 %v2093_v47, 0.0  ;;  %v1945_v5 = vadd.f32 %v1944_v8, %v4708_v44  ;;  %v1946_v52 = vpop.f32.mrb[105].mxu0 }
 0x448   : > { %v2094_v48 = vadd.f32 %v4776_v27, %v1945_v5  ;;  %3046 = vmatmul.mubr.f32.gmra.mrb[162].mxu0 %v2125_v51 }
 0x449   : > { %v1949_v58 = vpop.f32.mrb[106].mxu0 }
 0x44a   : > { %v2126_v61 = vmax.f32 %v2094_v48, 0.0  ;;  %v1950_v6 = vadd.f32 %v4706_v25, %v1949_v58  ;;  %v1951_v14 = vpop.f32.mrb[107].mxu0  ;;  %v2440_v48 = vld [vmem:[%s5017_s8 + $0x30] sm:$0xff]  ;;  %v2441_v58 = vld [vmem:[%s5017_s8 + $0x38] sm:$0xff] }
 0x44c   : > { %v2095_v55 = vadd.f32 %v4776_v27, %v1950_v6  ;;  %3048 = vmatprep.mubr.f32.mxu0 %v2126_v61 }
 0x44d   : > { %v1954_v39 = vpop.f32.mrb[108].mxu0 }
 0x44e   : > { %v2127_v17 = vmax.f32 %v2095_v55, 0.0  ;;  %v1955_v56 = vadd.f32 %v1954_v39, %v4716_v28  ;;  %v1956_v0 = vpop.f32.mrb[109].mxu0  ;;  %v3422_v55 = vpack.c.bf16 %v2441_v58, %v2440_v48  ;;  %v2442_v39 = vld [vmem:[%s5017_s8 + $0x40] sm:$0xff] }
 0x450   : > { %v2096_v35 = vadd.f32 %v4776_v27, %v1955_v56  ;;  %3049 = vmatmul.mubr.f32.gmra.mrb[164].mxu0 %v2127_v17  ;;  %v2443_v17 = vld [vmem:[%s5017_s8 + $0x48] sm:$0xff] }
 0x451   : > { %v1959_v44 = vpop.f32.mrb[110].mxu0 }
 0x452   : > { %v2128_v43 = vmax.f32 %v2096_v35, 0.0  ;;  %v1960_v16 = vadd.f32 %v4714_v4, %v1959_v44  ;;  %v1961_v33 = vpop.f32.mrb[111].mxu0  ;;  %v2436_v4 = vld [vmem:[%s5017_s8 + $0x10] sm:$0xff] }
 0x453   : > { %v3414_v3 = vpack.c.bf16 %v2437_v62, %v2436_v4  ;;  %v2445_v33 = vld [vmem:[%s5017_s8 + $0x58] sm:$0xff] }
 0x454   : > { %v2097_v1 = vadd.f32 %v4776_v27, %v1960_v16  ;;  %3051 = vmatprep.mubr.f32.mxu0 %v2128_v43  ;;  %v3426_v43 = vpack.c.bf16 %v2443_v17, %v2442_v39  ;;  %v2444_v16 = vld [vmem:[%s5017_s8 + $0x50] sm:$0xff] }
 0x455   : > { %v1964_v25 = vpop.f32.mrb[112].mxu0 }
 0x456   : > { %v2129_v32 = vmax.f32 %v2097_v1, 0.0  ;;  %v1965_v46 = vadd.f32 %v1964_v25, %v4724_v11  ;;  %v1966_v38 = vpop.f32.mrb[113].mxu0 }
 0x457   : > { %v3430_v38 = vpack.c.bf16 %v2445_v33, %v2444_v16 }
 0x458   : > { %v2098_v2 = vadd.f32 %v4776_v27, %v1965_v46  ;;  %3052 = vmatmul.mubr.f32.gmra.mrb[166].mxu0 %v2129_v32 }
 0x459   : > { %v1969_v28 = vpop.f32.mrb[114].mxu0 }
 0x45a   : > { %v2130_v36 = vmax.f32 %v2098_v2, 0.0  ;;  %v1970_v19 = vadd.f32 %v4722_v31, %v1969_v28  ;;  %v1971_v7 = vpop.f32.mrb[115].mxu0  ;;  %v2438_v31 = vld [vmem:[%s5017_s8 + $0x20] sm:$0xff]  ;;  %v2447_v28 = vld [vmem:[%s5017_s8 + $0x68] sm:$0xff] }
 0x45b   : > { %v3418_v52 = vpack.c.bf16 %v2439_v45, %v2438_v31  ;;  %v2446_v2 = vld [vmem:[%s5017_s8 + $0x60] sm:$0xff] }
 0x45c   : > { %v2099_v42 = vadd.f32 %v4776_v27, %v1970_v19  ;;  %3054 = vmatprep.mubr.f32.mxu1 %v2130_v36  ;;  %v3434_v62 = vpack.c.bf16 %v2447_v28, %v2446_v2 }
 0x45d   : > { %v1974_v11 = vpop.f32.mrb[116].mxu0 }
 0x45e   : > { %v2131_v22 = vmax.f32 %v2099_v42, 0.0  ;;  %v1975_v63 = vadd.f32 %v1974_v11, %v4731_v10  ;;  %v1976_v49 = vpop.f32.mrb[117].mxu0 }
 0x460   : > { %v2100_v47 = vadd.f32 %v4776_v27, %v1975_v63  ;;  %3055 = vmatmul.mubr.f32.vlgmr.msra.gmra.mrb[128].mxu1 %v2131_v22 }
 0x461   : > { %v1979_v8 = vpop.f32.mrb[118].mxu0  ;;  %3413 = vmatpush3.bf16.msra.mxu1 %v4786_v54 }
 0x462   : > { %v2132_v51 = vmax.f32 %v2100_v47, 0.0  ;;  %v1980_v5 = vadd.f32 %v4729_v53, %v1979_v8  ;;  %v1981_v10 = vpop.f32.mrb[119].mxu0  ;;  %3415 = vmatprep.subr.bf16.mxu1 %v3414_v3 }
 0x464   : > { %v2101_v61 = vadd.f32 %v4776_v27, %v1980_v5  ;;  %3057 = vmatprep.mubr.f32.mxu1 %v2132_v51 }
 0x465   : > { %v1984_v6 = vpop.f32.mrb[120].mxu0  ;;  %3417 = vmatpush3.bf16.msra.mxu1 %v3414_v3 }
 0x466   : > { %v2133_v54 = vmax.f32 %v2101_v61, 0.0  ;;  %v1985_v14 = vadd.f32 %v1984_v6, %v4735_v60  ;;  %v1986_v53 = vpop.f32.mrb[121].mxu0  ;;  %3419 = vmatprep.subr.bf16.mxu1 %v3418_v52 }
 0x468   : > { %v2102_v56 = vadd.f32 %v4776_v27, %v1985_v14  ;;  %3058 = vmatmul.mubr.f32.gmra.mrb[130].mxu1 %v2133_v54 }
 0x469   : > { %v1989_v0 = vpop.f32.mrb[122].mxu0  ;;  %3421 = vmatpush3.bf16.msra.mxu1 %v3418_v52 }
 0x46a   : > { %v2134_v35 = vmax.f32 %v2102_v56, 0.0  ;;  %v1990_v44 = vadd.f32 %v4733_v18, %v1989_v0  ;;  %v1991_v60 = vpop.f32.mrb[123].mxu0  ;;  %3423 = vmatprep.subr.bf16.mxu1 %v3422_v55 }
 0x46c   : > { %v2103_v1 = vadd.f32 %v4776_v27, %v1990_v44  ;;  %3060 = vmatprep.mubr.f32.mxu1 %v2134_v35 }
 0x46d   : > { %v1994_v25 = vpop.f32.mrb[124].mxu0  ;;  %3425 = vmatpush3.bf16.msra.mxu1 %v3422_v55 }
 0x46e   : > { %v2135_v32 = vmax.f32 %v2103_v1, 0.0  ;;  %v1995_v46 = vadd.f32 %v1994_v25, %v4739_v57  ;;  %v1996_v18 = vpop.f32.mrb[125].mxu0  ;;  %3427 = vmatprep.subr.bf16.mxu1 %v3426_v43 }
 0x470   : > { %v2104_v36 = vadd.f32 %v4776_v27, %v1995_v46  ;;  %3061 = vmatmul.mubr.f32.gmra.mrb[132].mxu1 %v2135_v32  ;;  %v2449_v32 = vld [vmem:[%s5017_s8 + $0x78] sm:$0xff] }
 0x471   : > { %v1999_v19 = vpop.f32.mrb[126].mxu0  ;;  %3429 = vmatpush3.bf16.msra.mxu1 %v3426_v43 }
 0x472   : > { %v2136_v7 = vmax.f32 %v2104_v36, 0.0  ;;  %v2000_v4 = vadd.f32 %v4737_v15, %v1999_v19  ;;  %v2001_v57 = vpop.f32.mrb[127].mxu0  ;;  %3431 = vmatprep.subr.bf16.mxu1 %v3430_v38 }
 0x474   : > { %v2105_v42 = vadd.f32 %v4776_v27, %v2000_v4  ;;  %3063 = vmatprep.mubr.f32.mxu1 %v2136_v7 }
 0x475   : > { %v2004_v11 = vpop.f32.mrb[128].mxu0  ;;  %3433 = vmatpush3.bf16.msra.mxu1 %v3430_v38 }
 0x476   : > { %v2137_v22 = vmax.f32 %v2105_v42, 0.0  ;;  %v2005_v63 = vadd.f32 %v2004_v11, %v4743_v9  ;;  %v2006_v49 = vpop.f32.mrb[129].mxu0  ;;  %3435 = vmatprep.subr.bf16.mxu1 %v3434_v62 }
 0x478   : > { %v2106_v3 = vadd.f32 %v4776_v27, %v2005_v63  ;;  %3064 = vmatmul.mubr.f32.gmra.mrb[134].mxu1 %v2137_v22 }
 0x479   : > { %v2009_v31 = vpop.f32.mrb[130].mxu0  ;;  %3437 = vmatpush3.bf16.msra.mxu1 %v3434_v62 }
 0x47a   : > { %v2138_v45 = vmax.f32 %v2106_v3, 0.0  ;;  %v2010_v15 = vadd.f32 %v4741_v34, %v2009_v31  ;;  %v2011_v47 = vpop.f32.mrb[131].mxu0 }
 0x47c   : > { %v2107_v8 = vadd.f32 %v4776_v27, %v2010_v15  ;;  %3066 = vmatprep.mubr.f32.mxu1 %v2138_v45 }
 0x47d   : > { %v2014_v51 = vpop.f32.mrb[132].mxu0 }
 0x47e   : > { %v2139_v5 = vmax.f32 %v2107_v8, 0.0  ;;  %v2015_v10 = vadd.f32 %v2014_v51, %v4747_v21  ;;  %v2016_v52 = vpop.f32.mrb[133].mxu0 }
 0x480   : > { %v2108_v9 = vadd.f32 %v4776_v27, %v2015_v10  ;;  %3067 = vmatmul.mubr.f32.gmra.mrb[136].mxu1 %v2139_v5 }
 0x481   : > { %v2019_v48 = vpop.f32.mrb[134].mxu0 }
 0x482   : > { %v2140_v58 = vmax.f32 %v2108_v9, 0.0  ;;  %v2020_v61 = vadd.f32 %v4745_v37, %v2019_v48  ;;  %v2021_v6 = vpop.f32.mrb[135].mxu0 }
 0x484   : > { %v2109_v54 = vadd.f32 %v4776_v27, %v2020_v61  ;;  %3069 = vmatprep.mubr.f32.mxu1 %v2140_v58 }
 0x485   : > { %v2024_v34 = vpop.f32.mrb[136].mxu0 }
 0x486   : > { %v2141_v14 = vmax.f32 %v2109_v54, 0.0  ;;  %v2025_v53 = vadd.f32 %v2024_v34, %v4751_v20  ;;  %v2026_v55 = vpop.f32.mrb[137].mxu0 }
 0x487   : > { %v4897_v55 = vld [vmem:[%s5016_s7] ss:$0 sm:$0xff] }
 0x488   : > { %v2110_v39 = vadd.f32 %v4776_v27, %v2025_v53  ;;  %3070 = vmatmul.mubr.f32.gmra.mrb[138].mxu1 %v2141_v14 }
 0x489   : > { %v2029_v21 = vpop.f32.mrb[138].mxu0 }
 0x48a   : > { %v2142_v17 = vmax.f32 %v2110_v39, 0.0  ;;  %v2030_v56 = vadd.f32 %v4749_v50, %v2029_v21  ;;  %v2031_v0 = vpop.f32.mrb[139].mxu0  ;;  %v2448_v50 = vld [vmem:[%s5017_s8 + $0x70] sm:$0xff] }
 0x48c   : > { %v2111_v35 = vadd.f32 %v4776_v27, %v2030_v56  ;;  %3072 = vmatprep.mubr.f32.mxu1 %v2142_v17 }
 0x48d   : > { %v2034_v37 = vpop.f32.mrb[140].mxu0 }
 0x48e   : > { %v2143_v44 = vmax.f32 %v2111_v35, 0.0  ;;  %v2035_v60 = vadd.f32 %v2034_v37, %v4755_v12  ;;  %v2036_v43 = vpop.f32.mrb[141].mxu0  ;;  %v3438_v12 = vpack.c.bf16 %v2449_v32, %v2448_v50 }
 0x490   : > { %v2112_v16 = vadd.f32 %v4776_v27, %v2035_v60  ;;  %3073 = vmatmul.mubr.f32.gmra.mrb[140].mxu1 %v2143_v44  ;;  %3439 = vmatprep.subr.bf16.mxu1 %v3438_v12 }
 0x491   : > { %v2039_v20 = vpop.f32.mrb[142].mxu0  ;;  %3441 = vmatpush3.bf16.msra.mxu1 %v3438_v12 }
 0x492   : > { %v2144_v33 = vmax.f32 %v2112_v16, 0.0  ;;  %v2040_v1 = vadd.f32 %v4753_v29, %v2039_v20  ;;  %v2041_v25 = vpop.f32.mrb[143].mxu0 }
 0x494   : > { %v2113_v46 = vadd.f32 %v4776_v27, %v2040_v1  ;;  %3075 = vmatprep.mubr.f32.mxu1 %v2144_v33 }
 0x495   : > { %v2044_v18 = vpop.f32.mrb[144].mxu0 }
 0x496   : > { %v2145_v38 = vmax.f32 %v2113_v46, 0.0  ;;  %v2045_v2 = vadd.f32 %v2044_v18, %v4759_v26  ;;  %v2046_v28 = vpop.f32.mrb[145].mxu0 }
 0x498   : > { %v2114_v29 = vadd.f32 %v4776_v27, %v2045_v2  ;;  %3076 = vmatmul.mubr.f32.gmra.mrb[142].mxu1 %v2145_v38 }
 0x499   : > { %v2049_v36 = vpop.f32.mrb[146].mxu0 }
 0x49a   : > { %v2146_v19 = vmax.f32 %v2114_v29, 0.0  ;;  %v2050_v7 = vadd.f32 %v4757_v23, %v2049_v36  ;;  %v2051_v4 = vpop.f32.mrb[147].mxu0 }
 0x49c   : > { %v2115_v57 = vadd.f32 %v4776_v27, %v2050_v7  ;;  %3078 = vmatprep.mubr.f32.mxu1 %v2146_v19 }
 0x49d   : > { %v2054_v62 = vpop.f32.mrb[148].mxu0 }
 0x49e   : > { %v2147_v42 = vmax.f32 %v2115_v57, 0.0  ;;  %v2055_v11 = vadd.f32 %v2054_v62, %v4763_v24  ;;  %v2056_v22 = vpop.f32.mrb[149].mxu0 }
 0x4a0   : > { %v2116_v26 = vadd.f32 %v4776_v27, %v2055_v11  ;;  %3079 = vmatmul.mubr.f32.gmra.mrb[144].mxu1 %v2147_v42 }
 0x4a1   : > { %v2059_v63 = vpop.f32.mrb[150].mxu0 }
 0x4a2   : > { %v2148_v49 = vmax.f32 %v2116_v26, 0.0  ;;  %v2060_v3 = vadd.f32 %v4761_v59, %v2059_v63  ;;  %v2061_v31 = vpop.f32.mrb[151].mxu0 }
 0x4a4   : > { %v2117_v45 = vadd.f32 %v4776_v27, %v2060_v3  ;;  %3081 = vmatprep.mubr.f32.mxu1 %v2148_v49 }
 0x4a5   : > { %v2064_v23 = vpop.f32.mrb[152].mxu0 }
 0x4a6   : > { %v2149_v15 = vmax.f32 %v2117_v45, 0.0  ;;  %v2065_v47 = vadd.f32 %v2064_v23, %v4767_v13  ;;  %v2066_v8 = vpop.f32.mrb[153].mxu0 }
 0x4a8   : > { %v2118_v51 = vadd.f32 %v4776_v27, %v2065_v47  ;;  %3082 = vmatmul.mubr.f32.gmra.mrb[146].mxu1 %v2149_v15 }
 0x4a9   : > { %v2069_v24 = vpop.f32.mrb[154].mxu0 }
 0x4aa   : > { %v2150_v5 = vmax.f32 %v2118_v51, 0.0  ;;  %v2070_v10 = vadd.f32 %v4765_v40, %v2069_v24  ;;  %v2071_v52 = vpop.f32.mrb[155].mxu0 }
 0x4ac   : > { %v2119_v9 = vadd.f32 %v4776_v27, %v2070_v10  ;;  %3084 = vmatprep.mubr.f32.mxu1 %v2150_v5 }
 0x4ad   : > { %v2074_v59 = vpop.f32.mrb[156].mxu0 }
 0x4ae   : > { %v2151_v48 = vmax.f32 %v2119_v9, 0.0  ;;  %v2075_v58 = vadd.f32 %v2074_v59, %v4771_v30  ;;  %v2076_v61 = vpop.f32.mrb[157].mxu0 }
 0x4b0   : > { %v2120_v6 = vadd.f32 %v4776_v27, %v2075_v58  ;;  %3085 = vmatmul.mubr.f32.gmra.mrb[148].mxu1 %v2151_v48 }
 0x4b1   : > { %v2079_v13 = vpop.f32.mrb[158].mxu0 }
 0x4b2   : > { %v2152_v54 = vmax.f32 %v2120_v6, 0.0  ;;  %v2080_v34 = vadd.f32 %v4769_v41, %v2079_v13  ;;  %v2081_v14 = vpop.f32.mrb[159].mxu0 }
 0x4b4   : > { %v2121_v53 = vadd.f32 %v4776_v27, %v2080_v34  ;;  %3087 = vmatprep.mubr.f32.mxu1 %v2152_v54 }
 0x4b6   : > { %v2153_v40 = vmax.f32 %v2121_v53, 0.0 }
 0x4b8   : > { %3088 = vmatmul.mubr.f32.gmra.mrb[150].mxu1 %v2153_v40 }
 0x513   : > { %v3044_v30 = vpop.f32.mrb[160].mxu0 }
 0x514   : > { %v2249_v39 = vadd.f32 %v3044_v30, %v4897_v55  ;;  %v2243_v21 = vpop.f32.mrb[161].mxu0 }
 0x515   : > { %v2244_v17 = vadd.f32 %v4897_v55, %v2243_v21 }
 0x516   : > { %v2403_v0 = vmax.f32 %v2249_v39, 0.0 }
 0x517   : > { %v2402_v56 = vmax.f32 %v2244_v17, 0.0 }
 0x519   : > { %3122 = vmatprep.mubr.f32.mxu1 %v2402_v56 }
 0x51a   : > { %3123 = vmatmul.mubr.f32.vlgmr.msra.gmra.mrb[152].mxu1 %v2403_v0 }
 0x51b   : > { %v3047_v41 = vpop.f32.mrb[162].mxu0 }
 0x51c   : > { %v2259_v27 = vadd.f32 %v3047_v41, %v4897_v55  ;;  %v2253_v35 = vpop.f32.mrb[163].mxu0 }
 0x51d   : > { %v2254_v37 = vadd.f32 %v4897_v55, %v2253_v35 }
 0x51e   : > { %v2405_v60 = vmax.f32 %v2259_v27, 0.0 }
 0x51f   : > { %v2404_v44 = vmax.f32 %v2254_v37, 0.0 }
 0x521   : > { %3125 = vmatprep.mubr.f32.mxu1 %v2404_v44 }
 0x522   : > { %3126 = vmatmul.mubr.f32.gmra.mrb[154].mxu1 %v2405_v60 }
 0x523   : > { %v3050_v43 = vpop.f32.mrb[164].mxu0 }
 0x524   : > { %v2269_v16 = vadd.f32 %v3050_v43, %v4897_v55  ;;  %v2263_v20 = vpop.f32.mrb[165].mxu0 }
 0x525   : > { %v2264_v33 = vadd.f32 %v4897_v55, %v2263_v20 }
 0x526   : > { %v2407_v25 = vmax.f32 %v2269_v16, 0.0 }
 0x527   : > { %v2406_v1 = vmax.f32 %v2264_v33, 0.0 }
 0x529   : > { %3128 = vmatprep.mubr.f32.mxu1 %v2406_v1 }
 0x52a   : > { %3129 = vmatmul.mubr.f32.gmra.mrb[156].mxu1 %v2407_v25 }
 0x52b   : > { %v3053_v50 = vpop.f32.mrb[166].mxu0 }
 0x52c   : > { %v2279_v32 = vadd.f32 %v3053_v50, %v4897_v55  ;;  %v2273_v46 = vpop.f32.mrb[167].mxu0 }
 0x52d   : > { %v2274_v12 = vadd.f32 %v4897_v55, %v2273_v46 }
 0x52e   : > { %v2409_v38 = vmax.f32 %v2279_v32, 0.0 }
 0x52f   : > { %v2408_v18 = vmax.f32 %v2274_v12, 0.0 }
 0x531   : > { %3131 = vmatprep.mubr.f32.mxu1 %v2408_v18 }
 0x532   : > { %3132 = vmatmul.mubr.f32.gmra.mrb[158].mxu1 %v2409_v38 }
 0x533   : > { %v3056_v2 = vpop.f32.mrb[128].mxu1 }
 0x534   : > { %v2289_v28 = vadd.f32 %v3056_v2, %v4897_v55  ;;  %v2283_v29 = vpop.f32.mrb[129].mxu1 }
 0x535   : > { %v2284_v36 = vadd.f32 %v4897_v55, %v2283_v29 }
 0x536   : > { %v2411_v7 = vmax.f32 %v2289_v28, 0.0 }
 0x537   : > { %v2410_v19 = vmax.f32 %v2284_v36, 0.0 }
 0x539   : > { %3134 = vmatprep.mubr.f32.mxu1 %v2410_v19 }
 0x53a   : > { %3135 = vmatmul.mubr.f32.gmra.mrb[160].mxu1 %v2411_v7 }
 0x53b   : > { %v3059_v4 = vpop.f32.mrb[130].mxu1 }
 0x53c   : > { %v2299_v57 = vadd.f32 %v3059_v4, %v4897_v55  ;;  %v2293_v62 = vpop.f32.mrb[131].mxu1 }
 0x53d   : > { %v2294_v42 = vadd.f32 %v4897_v55, %v2293_v62 }
 0x53e   : > { %v2413_v22 = vmax.f32 %v2299_v57, 0.0 }
 0x53f   : > { %v2412_v11 = vmax.f32 %v2294_v42, 0.0  ;;  %v4935_v42 = vld [vmem:[%s5018_s9] ss:$0 sm:$0xff] }
 0x541   : > { %3137 = vmatprep.mubr.f32.mxu1 %v2412_v11 }
 0x542   : > { %3138 = vmatmul.mubr.f32.gmra.mrb[162].mxu1 %v2413_v22 }
 0x543   : > { %v3062_v26 = vpop.f32.mrb[132].mxu1 }
 0x544   : > { %v2309_v63 = vadd.f32 %v3062_v26, %v4897_v55  ;;  %v2303_v49 = vpop.f32.mrb[133].mxu1 }
 0x545   : > { %v2304_v3 = vadd.f32 %v4897_v55, %v2303_v49 }
 0x546   : > { %v2415_v45 = vmax.f32 %v2309_v63, 0.0 }
 0x547   : > { %v2414_v31 = vmax.f32 %v2304_v3, 0.0 }
 0x549   : > { %3140 = vmatprep.mubr.f32.mxu1 %v2414_v31 }
 0x54a   : > { %3141 = vmatmul.mubr.f32.gmra.mrb[164].mxu1 %v2415_v45 }
 0x54b   : > { %v3065_v23 = vpop.f32.mrb[134].mxu1 }
 0x54c   : > { %v2319_v15 = vadd.f32 %v3065_v23, %v4897_v55  ;;  %v2313_v47 = vpop.f32.mrb[135].mxu1 }
 0x54d   : > { %v2314_v8 = vadd.f32 %v4897_v55, %v2313_v47 }
 0x54e   : > { %v2417_v24 = vmax.f32 %v2319_v15, 0.0 }
 0x54f   : > { %v2416_v51 = vmax.f32 %v2314_v8, 0.0 }
 0x551   : > { %3143 = vmatprep.mubr.f32.mxu1 %v2416_v51 }
 0x552   : > { %3144 = vmatmul.mubr.f32.gmra.mrb[166].mxu1 %v2417_v24 }
 0x553   : > { %v3068_v5 = vpop.f32.mrb[136].mxu1 }
 0x554   : > { %v2329_v10 = vadd.f32 %v3068_v5, %v4897_v55  ;;  %v2323_v52 = vpop.f32.mrb[137].mxu1 }
 0x555   : > { %v2324_v9 = vadd.f32 %v4897_v55, %v2323_v52 }
 0x556   : > { %v2419_v48 = vmax.f32 %v2329_v10, 0.0 }
 0x557   : > { %v2418_v59 = vmax.f32 %v2324_v9, 0.0 }
 0x559   : > { %3146 = vmatprep.mubr.f32.mxu1 %v2418_v59 }
 0x55a   : > { %3147 = vmatmul.mubr.f32.gmra.mrb[168].mxu1 %v2419_v48 }
 0x55b   : > { %v3071_v58 = vpop.f32.mrb[138].mxu1 }
 0x55c   : > { %v2339_v61 = vadd.f32 %v3071_v58, %v4897_v55  ;;  %v2333_v6 = vpop.f32.mrb[139].mxu1 }
 0x55d   : > { %v2334_v13 = vadd.f32 %v4897_v55, %v2333_v6 }
 0x55e   : > { %v2421_v34 = vmax.f32 %v2339_v61, 0.0 }
 0x55f   : > { %v2420_v54 = vmax.f32 %v2334_v13, 0.0 }
 0x561   : > { %3149 = vmatprep.mubr.f32.mxu1 %v2420_v54 }
 0x562   : > { %3150 = vmatmul.mubr.f32.gmra.mrb[170].mxu1 %v2421_v34 }
 0x563   : > { %v3074_v14 = vpop.f32.mrb[140].mxu1 }
 0x564   : > { %v2349_v53 = vadd.f32 %v3074_v14, %v4897_v55  ;;  %v2343_v40 = vpop.f32.mrb[141].mxu1 }
 0x565   : > { %v2344_v30 = vadd.f32 %v4897_v55, %v2343_v40 }
 0x566   : > { %v2423_v21 = vmax.f32 %v2349_v53, 0.0 }
 0x567   : > { %v2422_v39 = vmax.f32 %v2344_v30, 0.0 }
 0x569   : > { %3152 = vmatprep.mubr.f32.mxu1 %v2422_v39 }
 0x56a   : > { %3153 = vmatmul.mubr.f32.gmra.mrb[172].mxu1 %v2423_v21 }
 0x56b   : > { %v3077_v17 = vpop.f32.mrb[142].mxu1 }
 0x56c   : > { %v2359_v56 = vadd.f32 %v3077_v17, %v4897_v55  ;;  %v2353_v0 = vpop.f32.mrb[143].mxu1 }
 0x56d   : > { %v2354_v41 = vadd.f32 %v4897_v55, %v2353_v0 }
 0x56e   : > { %v2425_v35 = vmax.f32 %v2359_v56, 0.0 }
 0x56f   : > { %v2424_v27 = vmax.f32 %v2354_v41, 0.0 }
 0x571   : > { %3155 = vmatprep.mubr.f32.mxu1 %v2424_v27 }
 0x572   : > { %3156 = vmatmul.mubr.f32.gmra.mrb[174].mxu1 %v2425_v35 }
 0x573   : > { %v3080_v37 = vpop.f32.mrb[144].mxu1 }
 0x574   : > { %v2369_v44 = vadd.f32 %v3080_v37, %v4897_v55  ;;  %v2363_v60 = vpop.f32.mrb[145].mxu1 }
 0x575   : > { %v2364_v43 = vadd.f32 %v4897_v55, %v2363_v60 }
 0x576   : > { %v2427_v20 = vmax.f32 %v2369_v44, 0.0 }
 0x577   : > { %v2426_v16 = vmax.f32 %v2364_v43, 0.0 }
 0x579   : > { %3158 = vmatprep.mubr.f32.mxu1 %v2426_v16 }
 0x57a   : > { %3159 = vmatmul.mubr.f32.gmra.mrb[176].mxu1 %v2427_v20 }
 0x57b   : > { %v3083_v33 = vpop.f32.mrb[146].mxu1 }
 0x57c   : > { %v2379_v1 = vadd.f32 %v3083_v33, %v4897_v55  ;;  %v2373_v25 = vpop.f32.mrb[147].mxu1 }
 0x57d   : > { %v2374_v50 = vadd.f32 %v4897_v55, %v2373_v25 }
 0x57e   : > { %v2429_v46 = vmax.f32 %v2379_v1, 0.0 }
 0x57f   : > { %v2428_v32 = vmax.f32 %v2374_v50, 0.0 }
 0x581   : > { %3161 = vmatprep.mubr.f32.mxu1 %v2428_v32 }
 0x582   : > { %3162 = vmatmul.mubr.f32.gmra.mrb[178].mxu1 %v2429_v46 }
 0x583   : > { %v3086_v12 = vpop.f32.mrb[148].mxu1 }
 0x584   : > { %v2389_v18 = vadd.f32 %v3086_v12, %v4897_v55  ;;  %v2383_v38 = vpop.f32.mrb[149].mxu1 }
 0x585   : > { %v2384_v2 = vadd.f32 %v4897_v55, %v2383_v38 }
 0x586   : > { %v2431_v29 = vmax.f32 %v2389_v18, 0.0 }
 0x587   : > { %v2430_v28 = vmax.f32 %v2384_v2, 0.0 }
 0x589   : > { %3164 = vmatprep.mubr.f32.mxu1 %v2430_v28 }
 0x58a   : > { %3165 = vmatmul.mubr.f32.gmra.mrb[180].mxu1 %v2431_v29 }
 0x58b   : > { %v3089_v36 = vpop.f32.mrb[150].mxu1 }
 0x58c   : > { %v2399_v19 = vadd.f32 %v3089_v36, %v4897_v55  ;;  %v2393_v7 = vpop.f32.mrb[151].mxu1 }
 0x58d   : > { %v2394_v4 = vadd.f32 %v4897_v55, %v2393_v7 }
 0x58e   : > { %v2433_v62 = vmax.f32 %v2399_v19, 0.0 }
 0x58f   : > { %v2432_v57 = vmax.f32 %v2394_v4, 0.0 }
 0x591   : > { %3167 = vmatprep.mubr.f32.mxu1 %v2432_v57 }
 0x592   : > { %3168 = vmatmul.mubr.f32.gmra.mrb[182].mxu1 %v2433_v62 }
 0x5ed   : > { %v3124_v55 = vpop.f32.mrb[152].mxu1 }
 0x5ee   : > { %v2529_v11 = vadd.f32 %v3124_v55, %v4935_v42  ;;  %v2523_v22 = vpop.f32.mrb[153].mxu1 }
 0x5ef   : > { %v2524_v26 = vadd.f32 %v4935_v42, %v2523_v22 }
 0x5f0   : > { %2683 = vst [vmem:[%s4940_s24 + $0x8] sm:$0xff] %v2529_v11 }
 0x5f1   : > { %2682 = vst [vmem:[%s4940_s24] sm:$0xff] %v2524_v26 }
 0x5f5   : > { %v3127_v63 = vpop.f32.mrb[154].mxu1 }
 0x5f6   : > { %v2539_v49 = vadd.f32 %v3127_v63, %v4935_v42  ;;  %v2533_v3 = vpop.f32.mrb[155].mxu1 }
 0x5f7   : > { %v2534_v31 = vadd.f32 %v4935_v42, %v2533_v3 }
 0x5f8   : > { %2685 = vst [vmem:[%s4940_s24 + $0x18] sm:$0xff] %v2539_v49 }
 0x5f9   : > { %2684 = vst [vmem:[%s4940_s24 + $0x10] sm:$0xff] %v2534_v31 }
 0x5fd   : > { %v3130_v45 = vpop.f32.mrb[156].mxu1 }
 0x5fe   : > { %v2549_v23 = vadd.f32 %v3130_v45, %v4935_v42  ;;  %v2543_v15 = vpop.f32.mrb[157].mxu1 }
 0x5ff   : > { %v2544_v47 = vadd.f32 %v4935_v42, %v2543_v15 }
 0x600   : > { %2687 = vst [vmem:[%s4940_s24 + $0x28] sm:$0xff] %v2549_v23 }
 0x601   : > { %2686 = vst [vmem:[%s4940_s24 + $0x20] sm:$0xff] %v2544_v47 }
 0x605   : > { %v3133_v8 = vpop.f32.mrb[158].mxu1 }
 0x606   : > { %v2559_v51 = vadd.f32 %v3133_v8, %v4935_v42  ;;  %v2553_v24 = vpop.f32.mrb[159].mxu1 }
 0x607   : > { %v2554_v5 = vadd.f32 %v4935_v42, %v2553_v24 }
 0x608   : > { %2689 = vst [vmem:[%s4940_s24 + $0x38] sm:$0xff] %v2559_v51 }
 0x609   : > { %2688 = vst [vmem:[%s4940_s24 + $0x30] sm:$0xff] %v2554_v5 }
 0x60d   : > { %v3136_v10 = vpop.f32.mrb[160].mxu1 }
 0x60e   : > { %v2569_v52 = vadd.f32 %v3136_v10, %v4935_v42  ;;  %v2563_v9 = vpop.f32.mrb[161].mxu1 }
 0x60f   : > { %v2564_v59 = vadd.f32 %v4935_v42, %v2563_v9 }
 0x610   : > { %2691 = vst [vmem:[%s4940_s24 + $0x48] sm:$0xff] %v2569_v52 }
 0x611   : > { %2690 = vst [vmem:[%s4940_s24 + $0x40] sm:$0xff] %v2564_v59 }
 0x615   : > { %v3139_v48 = vpop.f32.mrb[162].mxu1 }
 0x616   : > { %v2579_v58 = vadd.f32 %v3139_v48, %v4935_v42  ;;  %v2573_v61 = vpop.f32.mrb[163].mxu1 }
 0x617   : > { %v2574_v6 = vadd.f32 %v4935_v42, %v2573_v61 }
 0x618   : > { %2693 = vst [vmem:[%s4940_s24 + $0x58] sm:$0xff] %v2579_v58 }
 0x619   : > { %2692 = vst [vmem:[%s4940_s24 + $0x50] sm:$0xff] %v2574_v6 }
 0x61d   : > { %v3142_v13 = vpop.f32.mrb[164].mxu1 }
 0x61e   : > { %v2589_v54 = vadd.f32 %v3142_v13, %v4935_v42  ;;  %v2583_v34 = vpop.f32.mrb[165].mxu1 }
 0x61f   : > { %v2584_v14 = vadd.f32 %v4935_v42, %v2583_v34 }
 0x620   : > { %2695 = vst [vmem:[%s4940_s24 + $0x68] sm:$0xff] %v2589_v54 }
 0x621   : > { %2694 = vst [vmem:[%s4940_s24 + $0x60] sm:$0xff] %v2584_v14 }
 0x625   : > { %v3145_v53 = vpop.f32.mrb[166].mxu1 }
 0x626   : > { %v2599_v40 = vadd.f32 %v3145_v53, %v4935_v42  ;;  %v2593_v30 = vpop.f32.mrb[167].mxu1 }
 0x627   : > { %v2594_v39 = vadd.f32 %v4935_v42, %v2593_v30 }
 0x628   : > { %2697 = vst [vmem:[%s4940_s24 + $0x78] sm:$0xff] %v2599_v40 }
 0x629   : > { %2696 = vst [vmem:[%s4940_s24 + $0x70] sm:$0xff] %v2594_v39 }
 0x62d   : > { %v3148_v21 = vpop.f32.mrb[168].mxu1 }
 0x62e   : > { %v2609_v17 = vadd.f32 %v3148_v21, %v4935_v42  ;;  %v2603_v56 = vpop.f32.mrb[169].mxu1 }
 0x62f   : > { %v2604_v0 = vadd.f32 %v4935_v42, %v2603_v56 }
 0x630   : > { %2699 = vst [vmem:[%s4940_s24 + $0x88] sm:$0xff] %v2609_v17 }
 0x631   : > { %2698 = vst [vmem:[%s4940_s24 + $0x80] sm:$0xff] %v2604_v0 }
 0x635   : > { %v3151_v41 = vpop.f32.mrb[170].mxu1 }
 0x636   : > { %v2619_v27 = vadd.f32 %v3151_v41, %v4935_v42  ;;  %v2613_v35 = vpop.f32.mrb[171].mxu1 }
 0x637   : > { %v2614_v37 = vadd.f32 %v4935_v42, %v2613_v35 }
 0x638   : > { %2701 = vst [vmem:[%s4940_s24 + $0x98] sm:$0xff] %v2619_v27 }
 0x639   : > { %2700 = vst [vmem:[%s4940_s24 + $0x90] sm:$0xff] %v2614_v37 }
 0x63d   : > { %v3154_v44 = vpop.f32.mrb[172].mxu1 }
 0x63e   : > { %v2629_v60 = vadd.f32 %v3154_v44, %v4935_v42  ;;  %v2623_v43 = vpop.f32.mrb[173].mxu1 }
 0x63f   : > { %v2624_v16 = vadd.f32 %v4935_v42, %v2623_v43 }
 0x640   : > { %2703 = vst [vmem:[%s4940_s24 + $0xa8] sm:$0xff] %v2629_v60 }
 0x641   : > { %2702 = vst [vmem:[%s4940_s24 + $0xa0] sm:$0xff] %v2624_v16 }
 0x645   : > { %v3157_v20 = vpop.f32.mrb[174].mxu1 }
 0x646   : > { %v2639_v33 = vadd.f32 %v3157_v20, %v4935_v42  ;;  %v2633_v1 = vpop.f32.mrb[175].mxu1 }
 0x647   : > { %v2634_v25 = vadd.f32 %v4935_v42, %v2633_v1 }
 0x648   : > { %2705 = vst [vmem:[%s4940_s24 + $0xb8] sm:$0xff] %v2639_v33 }
 0x649   : > { %2704 = vst [vmem:[%s4940_s24 + $0xb0] sm:$0xff] %v2634_v25 }
 0x64d   : > { %v3160_v50 = vpop.f32.mrb[176].mxu1 }
 0x64e   : > { %v2649_v32 = vadd.f32 %v3160_v50, %v4935_v42  ;;  %v2643_v46 = vpop.f32.mrb[177].mxu1 }
 0x64f   : > { %v2644_v12 = vadd.f32 %v4935_v42, %v2643_v46 }
 0x650   : > { %2707 = vst [vmem:[%s4940_s24 + $0xc8] sm:$0xff] %v2649_v32 }
 0x651   : > { %2706 = vst [vmem:[%s4940_s24 + $0xc0] sm:$0xff] %v2644_v12 }
 0x655   : > { %v3163_v18 = vpop.f32.mrb[178].mxu1 }
 0x656   : > { %v2659_v38 = vadd.f32 %v3163_v18, %v4935_v42  ;;  %v2653_v2 = vpop.f32.mrb[179].mxu1 }
 0x657   : > { %v2654_v28 = vadd.f32 %v4935_v42, %v2653_v2 }
 0x658   : > { %2709 = vst [vmem:[%s4940_s24 + $0xd8] sm:$0xff] %v2659_v38 }
 0x659   : > { %2708 = vst [vmem:[%s4940_s24 + $0xd0] sm:$0xff] %v2654_v28 }
 0x65d   : > { %v3166_v29 = vpop.f32.mrb[180].mxu1 }
 0x65e   : > { %v2669_v36 = vadd.f32 %v3166_v29, %v4935_v42  ;;  %v2663_v19 = vpop.f32.mrb[181].mxu1 }
 0x65f   : > { %v2664_v7 = vadd.f32 %v4935_v42, %v2663_v19 }
 0x660   : > { %2711 = vst [vmem:[%s4940_s24 + $0xe8] sm:$0xff] %v2669_v36 }
 0x661   : > { %2710 = vst [vmem:[%s4940_s24 + $0xe0] sm:$0xff] %v2664_v7 }
 0x665   : > { %v3169_v4 = vpop.f32.mrb[182].mxu1 }
 0x666   : > { %v2679_v57 = vadd.f32 %v3169_v4, %v4935_v42  ;;  %v2673_v62 = vpop.f32.mrb[183].mxu1 }
 0x667   : > { %v2674_v55 = vadd.f32 %v4935_v42, %v2673_v62 }
 0x668   : > { %2713 = vst [vmem:[%s4940_s24 + $0xf8] sm:$0xff] %v2679_v57 }
 0x669   : > { %2712 = vst [vmem:[%s4940_s24 + $0xf0] sm:$0xff] %v2674_v55 }
 0x66a PF: > { %s20_s13 = sadd.s32 1, %s3602_s13  }
 0x66b   : > { %p17_p4 = scmp.ge.s32.totalorder %s20_s13, 4  }
 0x66d   :  { %19 = sbr.rel (!%p17_p4) target bundleno = 1 (0x1), region = 90 }

</bundles_post_ra>
